<compile_context>
chip_gen: v5e
topology: v5e:2x2
jax: 0.10.0
libtpu: 0.0.40
codegen_flags: <defaults>
</compile_context>

<pallas_src>
import jax
import jax.numpy as jnp
from jax.experimental import pallas as pl
from jax.experimental.pallas import tpu as pltpu

HIDDEN_SIZE = 500
NUM_CLASSES = 10
IN_FEATURES = 28 * 28            # 784

# Lane/sublane-aligned padded dims (zero padding keeps results exact).
IN_P = 896                        # 7 * 128
HIDDEN_P = 512                    # 4 * 128
OUT_P = 128                       # 1 * 128 -> unmasked lane-dense output store

DEFAULT_TILE_B = 256              # MXU-friendly M (2x128 on v5e, 1x256 on v6e/v7x)


def _round_up(v, m):
    return ((v + m - 1) // m) * m


def mlp_kernel(x_ref, w1_ref, b1_ref, w2_ref, b2_ref, w3_ref, b3_ref,
               w4_ref, b4_ref, o_ref):
    """Four chained MXU matmuls (bf16 operands, fp32 accumulation) + fp32 bias."""
    # Hoist bias loads once per grid step.
    b1 = b1_ref[...]
    b2 = b2_ref[...]
    b3 = b3_ref[...]
    b4 = b4_ref[...]

    x = x_ref[...]                                                  # bf16 (tile_b, IN_P)
    h = jnp.dot(x, w1_ref[...], preferred_element_type=jnp.float32) + b1
    h = jnp.dot(h.astype(jnp.bfloat16), w2_ref[...],
                preferred_element_type=jnp.float32) + b2
    h = jnp.dot(h.astype(jnp.bfloat16), w3_ref[...],
                preferred_element_type=jnp.float32) + b3
    h = jnp.dot(h.astype(jnp.bfloat16), w4_ref[...],
                preferred_element_type=jnp.float32) + b4
    o_ref[...] = h.astype(o_ref.dtype)


@jax.jit
def mlp_forward(x, w1, b1, w2, b2, w3, b3, w4, b4):
    """x: (b, c, h, w) with c*h*w == 784. Weights/biases already padded + bf16."""
    x2 = x.reshape(-1, IN_FEATURES)          # same as torch .reshape(-1, 28*28)
    B = x2.shape[0]

    # Tile selection: up to 256 rows, sublane (8) aligned, and split into >=2
    # grid steps when the batch allows so both v7x TensorCores get work.
    tile_b = min(DEFAULT_TILE_B, max(8, _round_up(-(-B // 2), 8)))
    B_pad = _round_up(B, tile_b)
    nb = B_pad // tile_b

    x_pad = jnp.pad(x2, ((0, B_pad - B), (0, IN_P - IN_FEATURES))).astype(jnp.bfloat16)

    # Weight / bias blocks are the full (padded) arrays, resident across the grid.
    def full_spec(shape):
        return pl.BlockSpec(shape, lambda i: (0, 0))

    out_pad = pl.pallas_call(
        mlp_kernel,
        out_shape=jax.ShapeDtypeStruct((B_pad, OUT_P), jnp.float32),
        grid_spec=pltpu.PrefetchScalarGridSpec(
            num_scalar_prefetch=0,
            grid=(nb,),
            in_specs=[
                pl.BlockSpec((tile_b, IN_P), lambda i: (i, 0)),   # x tile (bf16)
                full_spec((IN_P, HIDDEN_P)),                      # w1 (bf16)
                full_spec((1, HIDDEN_P)),                         # b1 (f32)
                full_spec((HIDDEN_P, HIDDEN_P)),                  # w2 (bf16)
                full_spec((1, HIDDEN_P)),                         # b2 (f32)
                full_spec((HIDDEN_P, HIDDEN_P)),                  # w3 (bf16)
                full_spec((1, HIDDEN_P)),                         # b3 (f32)
                full_spec((HIDDEN_P, OUT_P)),                     # w4 (bf16)
                full_spec((1, OUT_P)),                            # b4 (f32)
            ],
            out_specs=pl.BlockSpec((tile_b, OUT_P), lambda i: (i, 0)),
        ),
        compiler_params=pltpu.CompilerParams(
            dimension_semantics=("parallel",),
        ),
    )(x_pad, w1, b1, w2, b2, w3, b3, w4, b4)

    return out_pad[:B, :NUM_CLASSES]


def init_params(key):
    """nn.Linear-style uniform(-1/sqrt(fan_in), +) init; weights stored (in, out)."""
    dims = [(IN_FEATURES, HIDDEN_SIZE),
            (HIDDEN_SIZE, HIDDEN_SIZE),
            (HIDDEN_SIZE, HIDDEN_SIZE),
            (HIDDEN_SIZE, NUM_CLASSES)]
    params = []
    for fan_in, fan_out in dims:
        key, kw, kb = jax.random.split(key, 3)
        bound = 1.0 / jnp.sqrt(fan_in)
        W = jax.random.uniform(kw, (fan_in, fan_out), jnp.float32, -bound, bound)
        bvec = jax.random.uniform(kb, (1, fan_out), jnp.float32, -bound, bound)
        params += [W, bvec]
    return params


def prepare_params(params):
    """One-time: zero-pad to lane-aligned shapes; weights -> bf16, biases stay f32."""
    padded_dims = [(IN_P, HIDDEN_P), (HIDDEN_P, HIDDEN_P),
                   (HIDDEN_P, HIDDEN_P), (HIDDEN_P, OUT_P)]
    prepared = []
    for (W, bvec), (in_p, out_p) in zip(zip(params[0::2], params[1::2]), padded_dims):
        Wp = jnp.pad(W, ((0, in_p - W.shape[0]), (0, out_p - W.shape[1])))
        bp = jnp.pad(bvec, ((0, 0), (0, out_p - bvec.shape[1])))
        prepared += [Wp.astype(jnp.bfloat16), bp.astype(jnp.float32)]
    return prepared


if __name__ == "__main__":
    key = jax.random.PRNGKey(0)
    key, kx = jax.random.split(key)

    # Input consistent with the module's forward: (b, c, h, w) with c*h*w = 784.
    x = jax.random.normal(kx, (2, 1, 28, 28), jnp.float32)

    params = init_params(key)
    padded_params = prepare_params(params)

    out = mlp_forward(x, *padded_params)
    out = jax.block_until_ready(out)
    assert out.shape == (2, NUM_CLASSES)

    # Pure-JAX reference with the same numerics (bf16 operands, fp32 accumulate).
    ref = x.reshape(-1, IN_FEATURES)
    for W, bvec in zip(params[0::2], params[1::2]):
        ref = jnp.dot(ref.astype(jnp.bfloat16), W.astype(jnp.bfloat16),
                      preferred_element_type=jnp.float32) + bvec
    assert jnp.allclose(out, ref, atol=1e-2, rtol=1e-2), float(
        jnp.max(jnp.abs(out - ref)))

    print("KERNEL_OK")
</pallas_src>

<mosaic_0001>
module attributes {stable_mosaic.version = 11 : i64} {
  func.func @mlp_kernel(%arg0: i32, %arg1: memref<8x896xbf16, #tpu.memory_space<vmem>>, %arg2: memref<896x512xbf16, #tpu.memory_space<vmem>>, %arg3: memref<1x512xf32, #tpu.memory_space<vmem>>, %arg4: memref<512x512xbf16, #tpu.memory_space<vmem>>, %arg5: memref<1x512xf32, #tpu.memory_space<vmem>>, %arg6: memref<512x512xbf16, #tpu.memory_space<vmem>>, %arg7: memref<1x512xf32, #tpu.memory_space<vmem>>, %arg8: memref<512x128xbf16, #tpu.memory_space<vmem>>, %arg9: memref<1x128xf32, #tpu.memory_space<vmem>>, %arg10: memref<8x128xf32, #tpu.memory_space<vmem>>) attributes {dimension_semantics = [#tpu.dimension_semantics<parallel>], iteration_bounds = array<i64: 1>, scalar_prefetch = 0 : i64, scratch_operands = 0 : i64, tpu.core_type = #tpu.core_type<tc>, window_params = [{transform_indices = @transform_0, window_bounds = array<i64: 8, 896>}, {pipeline_mode = #tpu.pipeline_mode<synchronous>, transform_indices = @transform_1, window_bounds = array<i64: 896, 512>}, {pipeline_mode = #tpu.pipeline_mode<synchronous>, transform_indices = @transform_2, window_bounds = array<i64: 1, 512>}, {pipeline_mode = #tpu.pipeline_mode<synchronous>, transform_indices = @transform_3, window_bounds = array<i64: 512, 512>}, {pipeline_mode = #tpu.pipeline_mode<synchronous>, transform_indices = @transform_4, window_bounds = array<i64: 1, 512>}, {pipeline_mode = #tpu.pipeline_mode<synchronous>, transform_indices = @transform_5, window_bounds = array<i64: 512, 512>}, {pipeline_mode = #tpu.pipeline_mode<synchronous>, transform_indices = @transform_6, window_bounds = array<i64: 1, 512>}, {pipeline_mode = #tpu.pipeline_mode<synchronous>, transform_indices = @transform_7, window_bounds = array<i64: 512, 128>}, {pipeline_mode = #tpu.pipeline_mode<synchronous>, transform_indices = @transform_8, window_bounds = array<i64: 1, 128>}, {transform_indices = @transform_9, window_bounds = array<i64: 8, 128>}]} {
    %c0 = arith.constant 0 : index
    %c0_0 = arith.constant 0 : index
    %0 = vector.load %arg3[%c0, %c0_0] : memref<1x512xf32, #tpu.memory_space<vmem>>, vector<1x512xf32>
    %c0_1 = arith.constant 0 : index
    %c0_2 = arith.constant 0 : index
    %1 = vector.load %arg5[%c0_1, %c0_2] : memref<1x512xf32, #tpu.memory_space<vmem>>, vector<1x512xf32>
    %c0_3 = arith.constant 0 : index
    %c0_4 = arith.constant 0 : index
    %2 = vector.load %arg7[%c0_3, %c0_4] : memref<1x512xf32, #tpu.memory_space<vmem>>, vector<1x512xf32>
    %c0_5 = arith.constant 0 : index
    %c0_6 = arith.constant 0 : index
    %3 = vector.load %arg9[%c0_5, %c0_6] : memref<1x128xf32, #tpu.memory_space<vmem>>, vector<1x128xf32>
    %c0_7 = arith.constant 0 : index
    %c0_8 = arith.constant 0 : index
    %4 = vector.load %arg1[%c0_7, %c0_8] : memref<8x896xbf16, #tpu.memory_space<vmem>>, vector<8x896xbf16>
    %c0_9 = arith.constant 0 : index
    %c0_10 = arith.constant 0 : index
    %5 = vector.load %arg2[%c0_9, %c0_10] : memref<896x512xbf16, #tpu.memory_space<vmem>>, vector<896x512xbf16>
    %cst = arith.constant dense<0.000000e+00> : vector<8x512xf32>
    %6 = tpu.matmul %4, %5, %cst {dimension_numbers = #tpu.dot_dimension_numbers<[1], [0], [0], [1], [0, 0, 1, 1], [], []>} : vector<8x896xbf16>, vector<896x512xbf16>, vector<8x512xf32> -> vector<8x512xf32>
    %7 = vector.broadcast %0 : vector<1x512xf32> to vector<8x512xf32>
    %8 = arith.addf %6, %7 : vector<8x512xf32>
    %9 = arith.truncf %8 : vector<8x512xf32> to vector<8x512xbf16>
    %c0_11 = arith.constant 0 : index
    %c0_12 = arith.constant 0 : index
    %10 = vector.load %arg4[%c0_11, %c0_12] : memref<512x512xbf16, #tpu.memory_space<vmem>>, vector<512x512xbf16>
    %cst_13 = arith.constant dense<0.000000e+00> : vector<8x512xf32>
    %11 = tpu.matmul %9, %10, %cst_13 {dimension_numbers = #tpu.dot_dimension_numbers<[1], [0], [0], [1], [0, 0, 1, 1], [], []>} : vector<8x512xbf16>, vector<512x512xbf16>, vector<8x512xf32> -> vector<8x512xf32>
    %12 = vector.broadcast %1 : vector<1x512xf32> to vector<8x512xf32>
    %13 = arith.addf %11, %12 : vector<8x512xf32>
    %14 = arith.truncf %13 : vector<8x512xf32> to vector<8x512xbf16>
    %c0_14 = arith.constant 0 : index
    %c0_15 = arith.constant 0 : index
    %15 = vector.load %arg6[%c0_14, %c0_15] : memref<512x512xbf16, #tpu.memory_space<vmem>>, vector<512x512xbf16>
    %cst_16 = arith.constant dense<0.000000e+00> : vector<8x512xf32>
    %16 = tpu.matmul %14, %15, %cst_16 {dimension_numbers = #tpu.dot_dimension_numbers<[1], [0], [0], [1], [0, 0, 1, 1], [], []>} : vector<8x512xbf16>, vector<512x512xbf16>, vector<8x512xf32> -> vector<8x512xf32>
    %17 = vector.broadcast %2 : vector<1x512xf32> to vector<8x512xf32>
    %18 = arith.addf %16, %17 : vector<8x512xf32>
    %19 = arith.truncf %18 : vector<8x512xf32> to vector<8x512xbf16>
    %c0_17 = arith.constant 0 : index
    %c0_18 = arith.constant 0 : index
    %20 = vector.load %arg8[%c0_17, %c0_18] : memref<512x128xbf16, #tpu.memory_space<vmem>>, vector<512x128xbf16>
    %cst_19 = arith.constant dense<0.000000e+00> : vector<8x128xf32>
    %21 = tpu.matmul %19, %20, %cst_19 {dimension_numbers = #tpu.dot_dimension_numbers<[1], [0], [0], [1], [0, 0, 1, 1], [], []>} : vector<8x512xbf16>, vector<512x128xbf16>, vector<8x128xf32> -> vector<8x128xf32>
    %22 = vector.broadcast %3 : vector<1x128xf32> to vector<8x128xf32>
    %23 = arith.addf %21, %22 : vector<8x128xf32>
    %c0_20 = arith.constant 0 : index
    %c0_21 = arith.constant 0 : index
    %24 = vector.load %arg10[%c0_20, %c0_21] : memref<8x128xf32, #tpu.memory_space<vmem>>, vector<8x128xf32>
    tpu.vector_store %arg10[%c0_20, %c0_21], %23 {strides = array<i32>} : memref<8x128xf32, #tpu.memory_space<vmem>>, vector<8x128xf32>,
    return
  }
  func.func @transform_0(%arg0: i32) -> (i32, i32) {
    %c0_i32 = arith.constant 0 : i32
    %c0_i32_0 = arith.constant 0 : i32
    return %arg0, %c0_i32 : i32, i32
  }
  func.func @transform_1(%arg0: i32) -> (i32, i32) {
    %c0_i32 = arith.constant 0 : i32
    %c0_i32_0 = arith.constant 0 : i32
    %c0_i32_1 = arith.constant 0 : i32
    return %c0_i32, %c0_i32_0 : i32, i32
  }
  func.func @transform_2(%arg0: i32) -> (i32, i32) {
    %c0_i32 = arith.constant 0 : i32
    %c0_i32_0 = arith.constant 0 : i32
    %c0_i32_1 = arith.constant 0 : i32
    return %c0_i32, %c0_i32_0 : i32, i32
  }
  func.func @transform_3(%arg0: i32) -> (i32, i32) {
    %c0_i32 = arith.constant 0 : i32
    %c0_i32_0 = arith.constant 0 : i32
    %c0_i32_1 = arith.constant 0 : i32
    return %c0_i32, %c0_i32_0 : i32, i32
  }
  func.func @transform_4(%arg0: i32) -> (i32, i32) {
    %c0_i32 = arith.constant 0 : i32
    %c0_i32_0 = arith.constant 0 : i32
    %c0_i32_1 = arith.constant 0 : i32
    return %c0_i32, %c0_i32_0 : i32, i32
  }
  func.func @transform_5(%arg0: i32) -> (i32, i32) {
    %c0_i32 = arith.constant 0 : i32
    %c0_i32_0 = arith.constant 0 : i32
    %c0_i32_1 = arith.constant 0 : i32
    return %c0_i32, %c0_i32_0 : i32, i32
  }
  func.func @transform_6(%arg0: i32) -> (i32, i32) {
    %c0_i32 = arith.constant 0 : i32
    %c0_i32_0 = arith.constant 0 : i32
    %c0_i32_1 = arith.constant 0 : i32
    return %c0_i32, %c0_i32_0 : i32, i32
  }
  func.func @transform_7(%arg0: i32) -> (i32, i32) {
    %c0_i32 = arith.constant 0 : i32
    %c0_i32_0 = arith.constant 0 : i32
    %c0_i32_1 = arith.constant 0 : i32
    return %c0_i32, %c0_i32_0 : i32, i32
  }
  func.func @transform_8(%arg0: i32) -> (i32, i32) {
    %c0_i32 = arith.constant 0 : i32
    %c0_i32_0 = arith.constant 0 : i32
    %c0_i32_1 = arith.constant 0 : i32
    return %c0_i32, %c0_i32_0 : i32, i32
  }
  func.func @transform_9(%arg0: i32) -> (i32, i32) {
    %c0_i32 = arith.constant 0 : i32
    %c0_i32_0 = arith.constant 0 : i32
    return %arg0, %c0_i32 : i32, i32
  }
}

</mosaic_0001>

<bundles_post_ra>
// kernel: mlp_forward.1
= control target key start
LH: loop header
LB: loop body
LE: loop exit
PB: predicated region body
PF: predicated region fallthrough
CT: control target
= control target key end

     0   :  { %14 = vsyncpa [#allocation3], 0  ;;  %s7112_s0 = inlined_call_operand.vmem [shape: bf16[8,896], index: 0, kind: input, shape index: {}]   ;;  %s7113_s1 = inlined_call_operand.hbm [shape: bf16[896,512], index: 1, kind: input, shape index: {}]   ;;  %s7114_s2 = inlined_call_operand.vmem [shape: f32[1,512], index: 2, kind: input, shape index: {}]   ;;  %s7115_s3 = inlined_call_operand.hbm [shape: bf16[512,512], index: 3, kind: input, shape index: {}]   ;;  %s7116_s4 = inlined_call_operand.vmem [shape: f32[1,512], index: 4, kind: input, shape index: {}]   ;;  %s7117_s5 = inlined_call_operand.hbm [shape: bf16[512,512], index: 5, kind: input, shape index: {}]   ;;  %s7118_s6 = inlined_call_operand.vmem [shape: f32[1,512], index: 6, kind: input, shape index: {}]   ;;  %s7119_s7 = inlined_call_operand.hbm [shape: bf16[512,128], index: 7, kind: input, shape index: {}]   ;;  %s7120_s8 = inlined_call_operand.vmem [shape: f32[1,128], index: 8, kind: input, shape index: {}]   ;;  %s7121_s9 = inlined_call_operand.vmem [shape: f32[8,128], index: 9, kind: output, shape index: {}]  }
   0x1   :  { %15 = vsyncpa [#allocation5], 0 }
   0x2   :  { %16 = vsyncpa [#allocation8], 0  ;;  %s38_s11 = sshll.u32 %s7115_s3, 4  ;;  %s6817_s12 = smov [#allocation4]   ;;  %s39_s11 = int_to_ptr.hbm [resolvable:$true] %s38_s11 }
   0x3   :  { %s40_s13 = sshll.u32 %s6817_s12, 4  ;;  %s23_s16 = sshll.u32 %s7113_s1, 4  ;;  %s41_s13 = int_to_ptr.vmem [resolvable:$true] %s40_s13  ;;  %s24_s16 = int_to_ptr.hbm [resolvable:$true] %s23_s16 }
   0x4   :  { %s6818_s17 = smov 256   ;;  %s6819_s18 = smov 16  }
   0x5   :  { %46 = dma.hbm_to_vmem [thread:$0]  %s39_s11, 16384, %s41_s13, [#allocation5], %s6818_s17, %s6818_s17, %s6819_s18  }
   0x6   :  { %s6820_s19 = smov [#allocation2]   ;;  %s53_s23 = sshll.u32 %s7117_s5, 4  ;;  %s54_s23 = int_to_ptr.hbm [resolvable:$true] %s53_s23 }
   0x7   :  { %s25_s20 = sshll.u32 %s6820_s19, 4  ;;  %s68_s25 = sshll.u32 %s7119_s7, 4  ;;  %s26_s20 = int_to_ptr.vmem [resolvable:$true] %s25_s20  ;;  %s69_s25 = int_to_ptr.hbm [resolvable:$true] %s68_s25 }
   0x8   :  { %31 = dma.hbm_to_vmem [thread:$0]  %s24_s16, 28672, %s26_s20, [#allocation3], %s6818_s17, %s6818_s17, %s6819_s18  }
   0x9   :  { %s6821_s26 = smov [#allocation6]   ;;  %s6822_s1 = smov [#allocation7]  }
   0xa   :  { %s55_s27 = sshll.u32 %s6821_s26, 4  ;;  %s70_s28 = sshll.u32 %s6822_s1, 4  ;;  %s56_s27 = int_to_ptr.vmem [resolvable:$true] %s55_s27  ;;  %s71_s28 = int_to_ptr.vmem [resolvable:$true] %s70_s28 }
   0xb   :  { %61 = dma.hbm_to_vmem [thread:$0]  %s54_s23, 16384, %s56_s27, [#allocation5], %s6818_s17, %s6818_s17, %s6819_s18  }
   0xc   :  { %s6823_s29 = smov 64   ;;  %s6824_s30 = smov 4  }
   0xd   :  { %76 = dma.hbm_to_vmem [thread:$0]  %s69_s25, 4096, %s71_s28, [#allocation8], %s6823_s29, %s6823_s29, %s6824_s30  }
   0xe   :  { %6811 = dma.done.wait [#allocation3], 28672  }
   0xf   :  { %6812 = vsyncadd [#allocation3], 4294938624 }
  0x10   :  { %6813 = dma.done.wait [#allocation5], 32768  }
  0x11   :  { %6814 = vsyncadd [#allocation5], 4294934528 }
  0x12   :  { %6815 = dma.done.wait [#allocation8], 4096  }
  0x13   :  { %6816 = vsyncadd [#allocation8], 4294963200  ;;  %v4260_v0 = vld [vmem:[#allocation2 + $0xe0] sm:$0xf]  ;;  %v6224_v1 = vld [vmem:[#allocation2 + $0xec] sm:$0xf0] }
  0x14   :  { %v4388_v2 = vld [vmem:[#allocation2 + $0x1e0] sm:$0xf]  ;;  %v4261_v3 = vor.u32 %v6224_v1, %v4260_v0  ;;  %v6256_v4 = vld [vmem:[#allocation2 + $0x1ec] sm:$0xf0] }
  0x15   :  { %v4516_v5 = vld [vmem:[#allocation2 + $0x2e0] sm:$0xf]  ;;  %v6288_v6 = vld [vmem:[#allocation2 + $0x2ec] sm:$0xf0]  ;;  %v4389_v7 = vor.u32 %v6256_v4, %v4388_v2 }
  0x16   :  { %v4517_v8 = vor.u32 %v6288_v6, %v4516_v5  ;;  %v4644_v9 = vld [vmem:[#allocation2 + $0x3e0] sm:$0xf]  ;;  %v6320_v10 = vld [vmem:[#allocation2 + $0x3ec] sm:$0xf0]  ;;  %1481 = vmatpush.bf16.msra.mxu0 %v4261_v3 }
  0x17   :  { %v4244_v11 = vld [vmem:[#allocation2 + $0xc0] sm:$0xf]  ;;  %v4645_v12 = vor.u32 %v6320_v10, %v4644_v9  ;;  %v6220_v13 = vld [vmem:[#allocation2 + $0xcc] sm:$0xf0]  ;;  %1494 = vmatpush.bf16.msra.mxu1 %v4389_v7 }
  0x18   :  { %v4372_v14 = vld [vmem:[#allocation2 + $0x1c0] sm:$0xf]  ;;  %v6252_v15 = vld [vmem:[#allocation2 + $0x1cc] sm:$0xf0]  ;;  %1507 = vmatpush.bf16.msra.mxu2 %v4517_v8  ;;  %v4245_v16 = vor.u32 %v6220_v13, %v4244_v11 }
  0x19   :  { %v4373_v17 = vor.u32 %v6252_v15, %v4372_v14  ;;  %v4500_v18 = vld [vmem:[#allocation2 + $0x2c0] sm:$0xf]  ;;  %v6284_v19 = vld [vmem:[#allocation2 + $0x2cc] sm:$0xf0]  ;;  %1520 = vmatpush.bf16.msra.mxu3 %v4645_v12 }
  0x1a   :  { %v4628_v20 = vld [vmem:[#allocation2 + $0x3c0] sm:$0xf]  ;;  %v4501_v21 = vor.u32 %v6284_v19, %v4500_v18  ;;  %v6316_v22 = vld [vmem:[#allocation2 + $0x3cc] sm:$0xf0]  ;;  %1482 = vmatpush.bf16.msra.mxu0 %v4245_v16 }
  0x1b   :  { %v4228_v23 = vld [vmem:[#allocation2 + $0xa0] sm:$0xf]  ;;  %v6216_v24 = vld [vmem:[#allocation2 + $0xac] sm:$0xf0]  ;;  %v4629_v25 = vor.u32 %v6316_v22, %v4628_v20  ;;  %1495 = vmatpush.bf16.msra.mxu1 %v4373_v17 }
  0x1c   :  { %v4356_v26 = vld [vmem:[#allocation2 + $0x1a0] sm:$0xf]  ;;  %v6248_v27 = vld [vmem:[#allocation2 + $0x1ac] sm:$0xf0]  ;;  %v4229_v29 = vor.u32 %v6216_v24, %v4228_v23  ;;  %1508 = vmatpush.bf16.msra.mxu2 %v4501_v21 }
  0x1d   :  { %v4484_v28 = vld [vmem:[#allocation2 + $0x2a0] sm:$0xf]  ;;  %v6280_v30 = vld [vmem:[#allocation2 + $0x2ac] sm:$0xf0]  ;;  %v4357_v33 = vor.u32 %v6248_v27, %v4356_v26  ;;  %1521 = vmatpush.bf16.msra.mxu3 %v4629_v25 }
  0x1e   :  { %v4612_v31 = vld [vmem:[#allocation2 + $0x3a0] sm:$0xf]  ;;  %v6312_v32 = vld [vmem:[#allocation2 + $0x3ac] sm:$0xf0]  ;;  %v4485_v34 = vor.u32 %v6280_v30, %v4484_v28  ;;  %1483 = vmatpush.bf16.msra.mxu0 %v4229_v29 }
  0x1f   :  { %v4212_v35 = vld [vmem:[#allocation2 + $0x80] sm:$0xf]  ;;  %v6212_v36 = vld [vmem:[#allocation2 + $0x8c] sm:$0xf0]  ;;  %v4613_v38 = vor.u32 %v6312_v32, %v4612_v31  ;;  %1496 = vmatpush.bf16.msra.mxu1 %v4357_v33 }
  0x20   :  { %v4340_v37 = vld [vmem:[#allocation2 + $0x180] sm:$0xf]  ;;  %v6244_v39 = vld [vmem:[#allocation2 + $0x18c] sm:$0xf0]  ;;  %v4213_v44 = vor.u32 %v6212_v36, %v4212_v35  ;;  %1509 = vmatpush.bf16.msra.mxu2 %v4485_v34 }
  0x21   :  { %v4468_v40 = vld [vmem:[#allocation2 + $0x280] sm:$0xf]  ;;  %v6276_v41 = vld [vmem:[#allocation2 + $0x28c] sm:$0xf0]  ;;  %v4341_v45 = vor.u32 %v6244_v39, %v4340_v37  ;;  %1522 = vmatpush.bf16.msra.mxu3 %v4613_v38  ;;  %v6222_v37 = vld [vmem:[#allocation2 + $0xe4] sm:$0xf] }
  0x22   :  { %v4596_v42 = vld [vmem:[#allocation2 + $0x380] sm:$0xf]  ;;  %v6308_v43 = vld [vmem:[#allocation2 + $0x38c] sm:$0xf0]  ;;  %v4469_v46 = vor.u32 %v6276_v41, %v4468_v40  ;;  %1484 = vmatpush.bf16.msra.mxu0 %v4213_v44  ;;  %v4262_v38 = vld [vmem:[#allocation2 + $0xf0] sm:$0xf0] }
  0x23   :  { %v4196_v47 = vld [vmem:[#allocation2 + $0x60] sm:$0xf]  ;;  %v6208_v48 = vld [vmem:[#allocation2 + $0x6c] sm:$0xf0]  ;;  %v4597_v50 = vor.u32 %v6308_v43, %v4596_v42  ;;  %1497 = vmatpush.bf16.msra.mxu1 %v4341_v45 }
  0x24   :  { %v4324_v49 = vld [vmem:[#allocation2 + $0x160] sm:$0xf]  ;;  %v6240_v51 = vld [vmem:[#allocation2 + $0x16c] sm:$0xf0]  ;;  %v4197_v56 = vor.u32 %v6208_v48, %v4196_v47  ;;  %1510 = vmatpush.bf16.msra.mxu2 %v4469_v46  ;;  %v4265_v46 = vor.u32 %v6222_v37, %v4262_v38 }
  0x25   :  { %v4452_v52 = vld [vmem:[#allocation2 + $0x260] sm:$0xf]  ;;  %v6272_v53 = vld [vmem:[#allocation2 + $0x26c] sm:$0xf0]  ;;  %v4325_v57 = vor.u32 %v6240_v51, %v4324_v49  ;;  %1523 = vmatpush.bf16.msra.mxu3 %v4597_v50  ;;  %v6218_v50 = vld [vmem:[#allocation2 + $0xc4] sm:$0xf] }
  0x26   :  { %v4580_v54 = vld [vmem:[#allocation2 + $0x360] sm:$0xf]  ;;  %v6304_v55 = vld [vmem:[#allocation2 + $0x36c] sm:$0xf0]  ;;  %v4453_v58 = vor.u32 %v6272_v53, %v4452_v52  ;;  %1485 = vmatpush.bf16.msra.mxu0 %v4197_v56  ;;  %v4246_v51 = vld [vmem:[#allocation2 + $0xd0] sm:$0xf0] }
  0x27   :  { %v4180_v59 = vld [vmem:[#allocation2 + $0x40] sm:$0xf]  ;;  %v6204_v60 = vld [vmem:[#allocation2 + $0x4c] sm:$0xf0]  ;;  %v4581_v62 = vor.u32 %v6304_v55, %v4580_v54  ;;  %1498 = vmatpush.bf16.msra.mxu1 %v4325_v57 }
  0x28   :  { %v4308_v61 = vld [vmem:[#allocation2 + $0x140] sm:$0xf]  ;;  %v6236_v63 = vld [vmem:[#allocation2 + $0x14c] sm:$0xf0]  ;;  %v4181_v4 = vor.u32 %v6204_v60, %v4180_v59  ;;  %1511 = vmatpush.bf16.msra.mxu2 %v4453_v58  ;;  %v4249_v59 = vor.u32 %v6218_v50, %v4246_v51 }
  0x29   :  { %v4436_v0 = vld [vmem:[#allocation2 + $0x240] sm:$0xf]  ;;  %v6268_v1 = vld [vmem:[#allocation2 + $0x24c] sm:$0xf0]  ;;  %v4309_v5 = vor.u32 %v6236_v63, %v4308_v61  ;;  %1524 = vmatpush.bf16.msra.mxu3 %v4581_v62  ;;  %v6214_v62 = vld [vmem:[#allocation2 + $0xa4] sm:$0xf] }
  0x2a   :  { %v4564_v2 = vld [vmem:[#allocation2 + $0x340] sm:$0xf]  ;;  %v6300_v3 = vld [vmem:[#allocation2 + $0x34c] sm:$0xf0]  ;;  %v4437_v6 = vor.u32 %v6268_v1, %v4436_v0  ;;  %1486 = vmatpush.bf16.msra.mxu0 %v4181_v4  ;;  %v4230_v63 = vld [vmem:[#allocation2 + $0xb0] sm:$0xf0] }
  0x2b   :  { %v4164_v7 = vld [vmem:[#allocation2 + $0x20] sm:$0xf]  ;;  %v6200_v8 = vld [vmem:[#allocation2 + $0x2c] sm:$0xf0]  ;;  %v4565_v10 = vor.u32 %v6300_v3, %v4564_v2  ;;  %1499 = vmatpush.bf16.msra.mxu1 %v4309_v5  ;;  %v100_v2 = vld [vmem:[%s7112_s0 + $0x8] sm:$0xff] }
  0x2c   :  { %v4292_v9 = vld [vmem:[#allocation2 + $0x120] sm:$0xf]  ;;  %v6232_v11 = vld [vmem:[#allocation2 + $0x12c] sm:$0xf0]  ;;  %v4165_v16 = vor.u32 %v6200_v8, %v4164_v7  ;;  %1512 = vmatpush.bf16.msra.mxu2 %v4437_v6  ;;  %v342_v8 = vunpack.c.l.b16 %v100_v2 }
  0x2d   :  { %v4420_v12 = vld [vmem:[#allocation2 + $0x220] sm:$0xf]  ;;  %v6264_v13 = vld [vmem:[#allocation2 + $0x22c] sm:$0xf0]  ;;  %v4293_v19 = vor.u32 %v6232_v11, %v4292_v9  ;;  %1525 = vmatpush.bf16.msra.mxu3 %v4565_v10  ;;  %v343_v10 = vunpack.c.h.b16 %v100_v2  ;;  %v4233_v11 = vor.u32 %v6214_v62, %v4230_v63 }
  0x2e   :  { %v4548_v14 = vld [vmem:[#allocation2 + $0x320] sm:$0xf]  ;;  %v6296_v15 = vld [vmem:[#allocation2 + $0x32c] sm:$0xf0]  ;;  %v4421_v20 = vor.u32 %v6264_v13, %v4420_v12  ;;  %1487 = vmatpush.bf16.msra.mxu0 %v4165_v16  ;;  %v6210_v16 = vld [vmem:[#allocation2 + $0x84] sm:$0xf] }
  0x2f   :  { %v4148_v17 = vld [vmem:[#allocation2] sm:$0xf]  ;;  %v6196_v18 = vld [vmem:[#allocation2 + $0xc] sm:$0xf0]  ;;  %v4549_v24 = vor.u32 %v6296_v15, %v4548_v14  ;;  %1500 = vmatpush.bf16.msra.mxu1 %v4293_v19 }
  0x30   :  { %v4276_v21 = vld [vmem:[#allocation2 + $0x100] sm:$0xf]  ;;  %v6228_v22 = vld [vmem:[#allocation2 + $0x10c] sm:$0xf0]  ;;  %v4149_v31 = vor.u32 %v6196_v18, %v4148_v17  ;;  %1513 = vmatpush.bf16.msra.mxu2 %v4421_v20  ;;  %v4214_v17 = vld [vmem:[#allocation2 + $0x90] sm:$0xf0]  ;;  %v6893_v18 = vpack.c.b16 %v342_v8, %v342_v8  ;;  %v6897_v20 = vpack.c.b16 %v343_v10, %v343_v10 }
  0x31   :  { %v4404_v23 = vld [vmem:[#allocation2 + $0x200] sm:$0xf]  ;;  %v6260_v25 = vld [vmem:[#allocation2 + $0x20c] sm:$0xf0]  ;;  %v4277_v35 = vor.u32 %v6228_v22, %v4276_v21  ;;  %1526 = vmatpush.bf16.msra.mxu3 %v4549_v24  ;;  %v6254_v8 = vld [vmem:[#allocation2 + $0x1e4] sm:$0xf] }
  0x32   :  { %v4532_v26 = vld [vmem:[#allocation2 + $0x300] sm:$0xf]  ;;  %v6292_v27 = vld [vmem:[#allocation2 + $0x30c] sm:$0xf0]  ;;  %v4405_v36 = vor.u32 %v6260_v25, %v4404_v23  ;;  %1488 = vmatpush.bf16.msra.mxu0 %v4149_v31  ;;  %v6286_v10 = vld [vmem:[#allocation2 + $0x2e4] sm:$0xf] }
  0x33   :  { %v4772_v28 = vld [vmem:[#allocation2 + $0x4e0] sm:$0xf]  ;;  %v6352_v29 = vld [vmem:[#allocation2 + $0x4ec] sm:$0xf0]  ;;  %v4533_v39 = vor.u32 %v6292_v27, %v4532_v26  ;;  %1501 = vmatpush.bf16.msra.mxu1 %v4277_v35 }
  0x34   :  { %v4900_v30 = vld [vmem:[#allocation2 + $0x5e0] sm:$0xf]  ;;  %v6384_v32 = vld [vmem:[#allocation2 + $0x5ec] sm:$0xf0]  ;;  %v4773_v40 = vor.u32 %v6352_v29, %v4772_v28  ;;  %1514 = vmatpush.bf16.msra.mxu2 %v4405_v36  ;;  %v4217_v28 = vor.u32 %v6210_v16, %v4214_v17 }
  0x35   :  { %v5028_v33 = vld [vmem:[#allocation2 + $0x6e0] sm:$0xf]  ;;  %v6416_v34 = vld [vmem:[#allocation2 + $0x6ec] sm:$0xf0]  ;;  %v4901_v41 = vor.u32 %v6384_v32, %v4900_v30  ;;  %1527 = vmatpush.bf16.msra.mxu3 %v4533_v39  ;;  %v6206_v32 = vld [vmem:[#allocation2 + $0x64] sm:$0xf] }
  0x36   :  { %v5029_v42 = vor.u32 %v6416_v34, %v5028_v33  ;;  %v4756_v43 = vld [vmem:[#allocation2 + $0x4c0] sm:$0xf]  ;;  %v6348_v44 = vld [vmem:[#allocation2 + $0x4cc] sm:$0xf0]  ;;  %1533 = vmatpush.bf16.msrb.mxu0 %v4773_v40  ;;  %v4198_v33 = vld [vmem:[#allocation2 + $0x70] sm:$0xf0] }
  0x37   :  { %v4884_v45 = vld [vmem:[#allocation2 + $0x5c0] sm:$0xf]  ;;  %v6380_v47 = vld [vmem:[#allocation2 + $0x5cc] sm:$0xf0]  ;;  %v4757_v52 = vor.u32 %v6348_v44, %v4756_v43  ;;  %1546 = vmatpush.bf16.msrb.mxu1 %v4901_v41  ;;  %1515 = vmatmul.bf16.vlgmr.msra.gmra.mxu2 %v6893_v18  ;;  %v4201_v40 = vor.u32 %v6206_v32, %v4198_v33  ;;  %v6202_v44 = vld [vmem:[#allocation2 + $0x44] sm:$0xf] }
  0x38   :  { %v5012_v48 = vld [vmem:[#allocation2 + $0x6c0] sm:$0xf]  ;;  %v6412_v49 = vld [vmem:[#allocation2 + $0x6cc] sm:$0xf0]  ;;  %1559 = vmatpush.bf16.msrb.mxu2 %v5029_v42  ;;  %v4885_v54 = vor.u32 %v6380_v47, %v4884_v45  ;;  %1528 = vmatmul.bf16.vlgmr.msra.gmra.mxu3 %v6897_v20  ;;  %v4182_v45 = vld [vmem:[#allocation2 + $0x50] sm:$0xf0] }
  0x39   :  { %v4740_v53 = vld [vmem:[#allocation2 + $0x4a0] sm:$0xf]  ;;  %v5013_v55 = vor.u32 %v6412_v49, %v5012_v48  ;;  %v6344_v56 = vld [vmem:[#allocation2 + $0x4ac] sm:$0xf0]  ;;  %1572 = vmatpush.bf16.msrb.mxu3 %v4265_v46  ;;  %v6282_v32 = vld [vmem:[#allocation2 + $0x2c4] sm:$0xf] }
  0x3a   :  { %v4868_v57 = vld [vmem:[#allocation2 + $0x5a0] sm:$0xf]  ;;  %v6376_v58 = vld [vmem:[#allocation2 + $0x5ac] sm:$0xf0]  ;;  %1534 = vmatpush.bf16.msrb.mxu0 %v4757_v52  ;;  %v4741_v0 = vor.u32 %v6344_v56, %v4740_v53  ;;  %v4185_v52 = vor.u32 %v6202_v44, %v4182_v45  ;;  %v6198_v56 = vld [vmem:[#allocation2 + $0x24] sm:$0xf] }
  0x3b   :  { %v4996_v60 = vld [vmem:[#allocation2 + $0x6a0] sm:$0xf]  ;;  %v6408_v61 = vld [vmem:[#allocation2 + $0x6ac] sm:$0xf0]  ;;  %v4869_v1 = vor.u32 %v6376_v58, %v4868_v57  ;;  %1547 = vmatpush.bf16.msrb.mxu1 %v4885_v54  ;;  %v4166_v57 = vld [vmem:[#allocation2 + $0x30] sm:$0xf0] }
  0x3c   :  { %v99_v3 = vld [vmem:[%s7112_s0] sm:$0xff]  ;;  %1560 = vmatpush.bf16.msrb.mxu2 %v5013_v55  ;;  %v4997_v4 = vor.u32 %v6408_v61, %v4996_v60  ;;  %v6340_v6 = vld [vmem:[#allocation2 + $0x48c] sm:$0xf0] }
  0x3d   :  { %v4724_v5 = vld [vmem:[#allocation2 + $0x480] sm:$0xf]  ;;  %v340_v9 = vunpack.c.l.b16 %v99_v3  ;;  %1573 = vmatpush.bf16.msrb.mxu3 %v4249_v59  ;;  %v6372_v12 = vld [vmem:[#allocation2 + $0x58c] sm:$0xf0]  ;;  %v341_v15 = vunpack.c.h.b16 %v99_v3  ;;  %v102_v3 = vld [vmem:[%s7112_s0 + $0x18] sm:$0xf] }
  0x3e   :  { %v4852_v7 = vld [vmem:[#allocation2 + $0x580] sm:$0xf]  ;;  %v6404_v14 = vld [vmem:[#allocation2 + $0x68c] sm:$0xf0]  ;;  %1535 = vmatpush.bf16.msrb.mxu0 %v4741_v0  ;;  %v4725_v21 = vor.u32 %v6340_v6, %v4724_v5  ;;  %v6194_v5 = vld [vmem:[#allocation2 + $0x4] sm:$0xf] }
  0x3f   :  { %v4980_v13 = vld [vmem:[#allocation2 + $0x680] sm:$0xf]  ;;  %v6895_v19 = vpack.c.b16 %v340_v9, %v340_v9  ;;  %v6899_v22 = vpack.c.b16 %v341_v15, %v341_v15  ;;  %1548 = vmatpush.bf16.msrb.mxu1 %v4869_v1  ;;  %v4853_v23 = vor.u32 %v6372_v12, %v4852_v7  ;;  %v6336_v26 = vld [vmem:[#allocation2 + $0x46c] sm:$0xf0]  ;;  %v4150_v6 = vld [vmem:[#allocation2 + $0x10] sm:$0xf0]  ;;  %v346_v15 = vunpack.c.l.b16 %v102_v3 }
  0x40   :  { %1561 = vmatpush.bf16.msrb.mxu2 %v4997_v4  ;;  %v4981_v24 = vor.u32 %v6404_v14, %v4980_v13  ;;  %v4708_v25 = vld [vmem:[#allocation2 + $0x460] sm:$0xf]  ;;  %v6368_v29 = vld [vmem:[#allocation2 + $0x56c] sm:$0xf0]  ;;  %v4169_v4 = vor.u32 %v6198_v56, %v4166_v57  ;;  %v4390_v9 = vld [vmem:[#allocation2 + $0x1f0] sm:$0xf0] }
  0x41   :  { %v4836_v27 = vld [vmem:[#allocation2 + $0x560] sm:$0xf]  ;;  %1574 = vmatpush.bf16.msrb.mxu3 %v4233_v11  ;;  %v6400_v31 = vld [vmem:[#allocation2 + $0x66c] sm:$0xf0]  ;;  %1489 = vmatmul.bf16.vlgmr.msra.gmra.mxu0 %v6895_v19  ;;  %v4709_v34 = vor.u32 %v6336_v26, %v4708_v25  ;;  %v4518_v12 = vld [vmem:[#allocation2 + $0x2f0] sm:$0xf0]  ;;  %v4153_v26 = vor.u32 %v6194_v5, %v4150_v6 }
  0x42   :  { %v4964_v30 = vld [vmem:[#allocation2 + $0x660] sm:$0xf]  ;;  %1536 = vmatpush.bf16.msrb.mxu0 %v4725_v21  ;;  %1502 = vmatmul.bf16.vlgmr.msra.gmra.mxu1 %v6899_v22  ;;  %v4837_v35 = vor.u32 %v6368_v29, %v4836_v27  ;;  %v6332_v38 = vld [vmem:[#allocation2 + $0x44c] sm:$0xf0]  ;;  %v6318_v13 = vld [vmem:[#allocation2 + $0x3e4] sm:$0xf]  ;;  %v4393_v27 = vor.u32 %v6254_v8, %v4390_v9 }
  0x43   :  { %1549 = vmatpush.bf16.msrb.mxu1 %v4853_v23  ;;  %v4965_v36 = vor.u32 %v6400_v31, %v4964_v30  ;;  %v4692_v37 = vld [vmem:[#allocation2 + $0x440] sm:$0xf]  ;;  %v6364_v41 = vld [vmem:[#allocation2 + $0x54c] sm:$0xf0]  ;;  %v4646_v14 = vld [vmem:[#allocation2 + $0x3f0] sm:$0xf0] }
  0x44   :  { %1562 = vmatpush.bf16.msrb.mxu2 %v4981_v24  ;;  %v4820_v39 = vld [vmem:[#allocation2 + $0x540] sm:$0xf]  ;;  %v6396_v43 = vld [vmem:[#allocation2 + $0x64c] sm:$0xf0]  ;;  %v4693_v46 = vor.u32 %v6332_v38, %v4692_v37  ;;  %v6350_v21 = vld [vmem:[#allocation2 + $0x4e4] sm:$0xf]  ;;  %v4649_v29 = vor.u32 %v6318_v13, %v4646_v14  ;;  %v6911_v37 = vpack.c.b16 %v346_v15, %v346_v15 }
  0x45   :  { %1575 = vmatpush.bf16.msrb.mxu3 %v4217_v28  ;;  %v4948_v42 = vld [vmem:[#allocation2 + $0x640] sm:$0xf]  ;;  %v4821_v47 = vor.u32 %v6364_v41, %v4820_v39  ;;  %v6328_v50 = vld [vmem:[#allocation2 + $0x42c] sm:$0xf0]  ;;  %v4774_v23 = vld [vmem:[#allocation2 + $0x4f0] sm:$0xf0]  ;;  %v4521_v28 = vor.u32 %v6286_v10, %v4518_v12 }
  0x46   :  { %1537 = vmatpush.bf16.msrb.mxu0 %v4709_v34  ;;  %v4949_v48 = vor.u32 %v6396_v43, %v4948_v42  ;;  %v4676_v49 = vld [vmem:[#allocation2 + $0x420] sm:$0xf]  ;;  %v6360_v53 = vld [vmem:[#allocation2 + $0x52c] sm:$0xf0]  ;;  %v6250_v30 = vld [vmem:[#allocation2 + $0x1c4] sm:$0xf]  ;;  %v4777_v33 = vor.u32 %v6350_v21, %v4774_v23 }
  0x47   :  { %1550 = vmatpush.bf16.msrb.mxu1 %v4837_v35  ;;  %v4804_v51 = vld [vmem:[#allocation2 + $0x520] sm:$0xf]  ;;  %v6392_v55 = vld [vmem:[#allocation2 + $0x62c] sm:$0xf0]  ;;  %v4677_v59 = vor.u32 %v6328_v50, %v4676_v49  ;;  %v4374_v31 = vld [vmem:[#allocation2 + $0x1d0] sm:$0xf0] }
  0x48   :  { %1563 = vmatpush.bf16.msrb.mxu2 %v4965_v36  ;;  %v4932_v54 = vld [vmem:[#allocation2 + $0x620] sm:$0xf]  ;;  %v6324_v60 = vld [vmem:[#allocation2 + $0x40c] sm:$0xf0]  ;;  %v4805_v63 = vor.u32 %v6360_v53, %v4804_v51  ;;  %v4502_v34 = vld [vmem:[#allocation2 + $0x2d0] sm:$0xf0]  ;;  %v4377_v42 = vor.u32 %v6250_v30, %v4374_v31 }
  0x49   :  { %1576 = vmatpush.bf16.msrb.mxu3 %v4201_v40  ;;  %v4660_v58 = vld [vmem:[#allocation2 + $0x400] sm:$0xf]  ;;  %v6356_v62 = vld [vmem:[#allocation2 + $0x50c] sm:$0xf0]  ;;  %v4933_v0 = vor.u32 %v6392_v55, %v4932_v54  ;;  %v6314_v35 = vld [vmem:[#allocation2 + $0x3c4] sm:$0xf]  ;;  %v4505_v43 = vor.u32 %v6282_v32, %v4502_v34 }
  0x4a   :  { %1538 = vmatpush.bf16.msrb.mxu0 %v4693_v46  ;;  %v4788_v61 = vld [vmem:[#allocation2 + $0x500] sm:$0xf]  ;;  %v6388_v2 = vld [vmem:[#allocation2 + $0x60c] sm:$0xf0]  ;;  %v4661_v11 = vor.u32 %v6324_v60, %v4660_v58  ;;  %v4630_v36 = vld [vmem:[#allocation2 + $0x3d0] sm:$0xf0] }
  0x4b   :  { %1551 = vmatpush.bf16.msrb.mxu1 %v4821_v47  ;;  %v4916_v1 = vld [vmem:[#allocation2 + $0x600] sm:$0xf]  ;;  %v101_v7 = vld [vmem:[%s7112_s0 + $0x10] sm:$0xff]  ;;  %v4789_v16 = vor.u32 %v6356_v62, %v4788_v61  ;;  %v6346_v38 = vld [vmem:[#allocation2 + $0x4c4] sm:$0xf]  ;;  %v4633_v44 = vor.u32 %v6314_v35, %v4630_v36 }
  0x4c   :  { %1564 = vmatpush.bf16.msrb.mxu2 %v4949_v48  ;;  %v4917_v17 = vor.u32 %v6388_v2, %v4916_v1  ;;  %v344_v24 = vunpack.c.l.b16 %v101_v7  ;;  %v345_v25 = vunpack.c.h.b16 %v101_v7  ;;  %v4758_v39 = vld [vmem:[#allocation2 + $0x4d0] sm:$0xf0]  ;;  %v6246_v45 = vld [vmem:[#allocation2 + $0x1a4] sm:$0xf] }
  0x4d   :  { %1577 = vmatpush.bf16.msrb.mxu3 %v4185_v52  ;;  %v4358_v46 = vld [vmem:[#allocation2 + $0x1b0] sm:$0xf0]  ;;  %v6278_v47 = vld [vmem:[#allocation2 + $0x2a4] sm:$0xf]  ;;  %v4761_v48 = vor.u32 %v6346_v38, %v4758_v39 }
  0x4e   :  { %1539 = vmatpush.bf16.msrb.mxu0 %v4677_v59  ;;  %v6913_v40 = vpack.c.b16 %v344_v24, %v344_v24  ;;  %v6915_v41 = vpack.c.b16 %v345_v25, %v345_v25  ;;  %v4486_v49 = vld [vmem:[#allocation2 + $0x2b0] sm:$0xf0]  ;;  %v6310_v50 = vld [vmem:[#allocation2 + $0x3a4] sm:$0xf]  ;;  %v4361_v54 = vor.u32 %v6246_v45, %v4358_v46 }
  0x4f   :  { %1552 = vmatpush.bf16.msrb.mxu1 %v4805_v63  ;;  %v4614_v51 = vld [vmem:[#allocation2 + $0x3b0] sm:$0xf0]  ;;  %v6342_v52 = vld [vmem:[#allocation2 + $0x4a4] sm:$0xf]  ;;  %v4489_v55 = vor.u32 %v6278_v47, %v4486_v49 }
  0x50   :  { %1565 = vmatpush.bf16.msrb.mxu2 %v4933_v0  ;;  %v4742_v53 = vld [vmem:[#allocation2 + $0x4b0] sm:$0xf0]  ;;  %v4617_v56 = vor.u32 %v6310_v50, %v4614_v51  ;;  %v6242_v57 = vld [vmem:[#allocation2 + $0x184] sm:$0xf] }
  0x51   :  { %1578 = vmatpush.bf16.msrb.mxu3 %v4169_v4  ;;  %v4342_v58 = vld [vmem:[#allocation2 + $0x190] sm:$0xf0]  ;;  %v6274_v59 = vld [vmem:[#allocation2 + $0x284] sm:$0xf]  ;;  %v4745_v60 = vor.u32 %v6342_v52, %v4742_v53 }
  0x52   :  { %1540 = vmatpush.bf16.msrb.mxu0 %v4661_v11  ;;  %v4470_v61 = vld [vmem:[#allocation2 + $0x290] sm:$0xf0]  ;;  %v6306_v62 = vld [vmem:[#allocation2 + $0x384] sm:$0xf]  ;;  %v4345_v2 = vor.u32 %v6242_v57, %v4342_v58 }
  0x53   :  { %1553 = vmatpush.bf16.msrb.mxu1 %v4789_v16  ;;  %v4598_v63 = vld [vmem:[#allocation2 + $0x390] sm:$0xf0]  ;;  %v6338_v0 = vld [vmem:[#allocation2 + $0x484] sm:$0xf]  ;;  %v4473_v3 = vor.u32 %v6274_v59, %v4470_v61 }
  0x54   :  { %1566 = vmatpush.bf16.msrb.mxu2 %v4917_v17  ;;  %v4726_v1 = vld [vmem:[#allocation2 + $0x490] sm:$0xf0]  ;;  %v4601_v4 = vor.u32 %v6306_v62, %v4598_v63  ;;  %v6238_v5 = vld [vmem:[#allocation2 + $0x164] sm:$0xf]  ;;  %v4268_v62 = vld [vmem:[#allocation2 + $0xe8] sm:$0xf] }
  0x55   :  { %1579 = vmatpush.bf16.msrb.mxu3 %v4153_v26  ;;  %1541 = vmatmul.bf16.vlgmr.msrb.gmra.mxu0 %v6913_v40  ;;  %v4326_v6 = vld [vmem:[#allocation2 + $0x170] sm:$0xf0]  ;;  %v6270_v7 = vld [vmem:[#allocation2 + $0x264] sm:$0xf]  ;;  %v4729_v8 = vor.u32 %v6338_v0, %v4726_v1  ;;  %v6225_v63 = vld [vmem:[#allocation2 + $0xf4] sm:$0xf0] }
  0x56   :  { %1585 = vmatpush.bf16.msra.mxu0 %v4393_v27  ;;  %1554 = vmatmul.bf16.vlgmr.msrb.gmra.mxu1 %v6915_v41  ;;  %v4454_v9 = vld [vmem:[#allocation2 + $0x270] sm:$0xf0]  ;;  %v6302_v10 = vld [vmem:[#allocation2 + $0x364] sm:$0xf]  ;;  %v4329_v14 = vor.u32 %v6238_v5, %v4326_v6 }
  0x57   :  { %1598 = vmatpush.bf16.msra.mxu1 %v4521_v28  ;;  %1567 = vmatmul.bf16.vlgmr.msrb.gmra.mxu2 %v6911_v37  ;;  %v4582_v11 = vld [vmem:[#allocation2 + $0x370] sm:$0xf0]  ;;  %v6334_v12 = vld [vmem:[#allocation2 + $0x464] sm:$0xf]  ;;  %v4457_v15 = vor.u32 %v6270_v7, %v4454_v9  ;;  %v4269_v7 = vor.u32 %v6225_v63, %v4268_v62 }
  0x58   :  { %1611 = vmatpush.bf16.msra.mxu2 %v4649_v29  ;;  %1580 = vmatmul.bf16.vlgmr.msrb.gmra.mxu3 %v6895_v19  ;;  %v4710_v13 = vld [vmem:[#allocation2 + $0x470] sm:$0xf0]  ;;  %v4585_v16 = vor.u32 %v6302_v10, %v4582_v11  ;;  %v6234_v17 = vld [vmem:[#allocation2 + $0x144] sm:$0xf] }
  0x59   :  { %1624 = vmatpush.bf16.msra.mxu3 %v4777_v33  ;;  %v4310_v21 = vld [vmem:[#allocation2 + $0x150] sm:$0xf0]  ;;  %v6266_v23 = vld [vmem:[#allocation2 + $0x244] sm:$0xf]  ;;  %v4713_v24 = vor.u32 %v6334_v12, %v4710_v13  ;;  %v4252_v13 = vld [vmem:[#allocation2 + $0xc8] sm:$0xf] }
  0x5a   :  { %1586 = vmatpush.bf16.msra.mxu0 %v4377_v42  ;;  %v4438_v25 = vld [vmem:[#allocation2 + $0x250] sm:$0xf0]  ;;  %v6298_v26 = vld [vmem:[#allocation2 + $0x344] sm:$0xf]  ;;  %v4313_v30 = vor.u32 %v6234_v17, %v4310_v21 }
  0x5b   :  { %1599 = vmatpush.bf16.msra.mxu1 %v4505_v43  ;;  %v4566_v27 = vld [vmem:[#allocation2 + $0x350] sm:$0xf0]  ;;  %v6330_v28 = vld [vmem:[#allocation2 + $0x444] sm:$0xf]  ;;  %v4441_v31 = vor.u32 %v6266_v23, %v4438_v25 }
  0x5c   :  { %1612 = vmatpush.bf16.msra.mxu2 %v4633_v44  ;;  %v4694_v29 = vld [vmem:[#allocation2 + $0x450] sm:$0xf0]  ;;  %v4569_v32 = vor.u32 %v6298_v26, %v4566_v27  ;;  %v6230_v33 = vld [vmem:[#allocation2 + $0x124] sm:$0xf] }
  0x5d   :  { %1625 = vmatpush.bf16.msra.mxu3 %v4761_v48  ;;  %v4294_v34 = vld [vmem:[#allocation2 + $0x130] sm:$0xf0]  ;;  %v6262_v35 = vld [vmem:[#allocation2 + $0x224] sm:$0xf]  ;;  %v4697_v36 = vor.u32 %v6330_v28, %v4694_v29  ;;  %v4236_v29 = vld [vmem:[#allocation2 + $0xa8] sm:$0xf] }
  0x5e   :  { %1587 = vmatpush.bf16.msra.mxu0 %v4361_v54  ;;  %v4422_v38 = vld [vmem:[#allocation2 + $0x230] sm:$0xf0]  ;;  %v6294_v39 = vld [vmem:[#allocation2 + $0x324] sm:$0xf]  ;;  %v4297_v45 = vor.u32 %v6230_v33, %v4294_v34 }
  0x5f   :  { %1600 = vmatpush.bf16.msra.mxu1 %v4489_v55  ;;  %v4550_v42 = vld [vmem:[#allocation2 + $0x330] sm:$0xf0]  ;;  %v6326_v43 = vld [vmem:[#allocation2 + $0x424] sm:$0xf]  ;;  %v4425_v48 = vor.u32 %v6262_v35, %v4422_v38 }
  0x60   :  { %1613 = vmatpush.bf16.msra.mxu2 %v4617_v56  ;;  %v4678_v44 = vld [vmem:[#allocation2 + $0x430] sm:$0xf0]  ;;  %v6226_v46 = vld [vmem:[#allocation2 + $0x104] sm:$0xf]  ;;  %v4553_v49 = vor.u32 %v6294_v39, %v4550_v42 }
  0x61   :  { %1626 = vmatpush.bf16.msra.mxu3 %v4745_v60  ;;  %v4278_v47 = vld [vmem:[#allocation2 + $0x110] sm:$0xf0]  ;;  %v6258_v50 = vld [vmem:[#allocation2 + $0x204] sm:$0xf]  ;;  %v4681_v53 = vor.u32 %v6326_v43, %v4678_v44  ;;  %v4220_v44 = vld [vmem:[#allocation2 + $0x88] sm:$0xf] }
  0x62   :  { %1588 = vmatpush.bf16.msra.mxu0 %v4345_v2  ;;  %v4406_v51 = vld [vmem:[#allocation2 + $0x210] sm:$0xf0]  ;;  %v6290_v52 = vld [vmem:[#allocation2 + $0x304] sm:$0xf]  ;;  %v4281_v60 = vor.u32 %v6226_v46, %v4278_v47  ;;  %v4396_v2 = vld [vmem:[#allocation2 + $0x1e8] sm:$0xf] }
  0x63   :  { %1601 = vmatpush.bf16.msra.mxu1 %v4473_v3  ;;  %v4534_v54 = vld [vmem:[#allocation2 + $0x310] sm:$0xf0]  ;;  %v6322_v55 = vld [vmem:[#allocation2 + $0x404] sm:$0xf]  ;;  %v4409_v0 = vor.u32 %v6258_v50, %v4406_v51  ;;  %v6257_v3 = vld [vmem:[#allocation2 + $0x1f4] sm:$0xf0] }
  0x64   :  { %1614 = vmatpush.bf16.msra.mxu2 %v4601_v4  ;;  %v4662_v56 = vld [vmem:[#allocation2 + $0x410] sm:$0xf0]  ;;  %v6382_v57 = vld [vmem:[#allocation2 + $0x5e4] sm:$0xf]  ;;  %v4537_v1 = vor.u32 %v6290_v52, %v4534_v54  ;;  %v4397_v11 = vor.u32 %v6257_v3, %v4396_v2  ;;  %v4348_v46 = vld [vmem:[#allocation2 + $0x188] sm:$0xf] }
  0x65   :  { %1627 = vmatpush.bf16.msra.mxu3 %v4729_v8  ;;  %v4902_v58 = vld [vmem:[#allocation2 + $0x5f0] sm:$0xf0]  ;;  %v6414_v59 = vld [vmem:[#allocation2 + $0x6e4] sm:$0xf]  ;;  %v4665_v4 = vor.u32 %v6322_v55, %v4662_v56  ;;  %v6245_v47 = vld [vmem:[#allocation2 + $0x194] sm:$0xf0] }
  0x66   :  { %1589 = vmatpush.bf16.msra.mxu0 %v4329_v14  ;;  %v5030_v61 = vld [vmem:[#allocation2 + $0x6f0] sm:$0xf0]  ;;  %v4905_v5 = vor.u32 %v6382_v57, %v4902_v58  ;;  %v6378_v8 = vld [vmem:[#allocation2 + $0x5c4] sm:$0xf]  ;;  %v6221_v14 = vld [vmem:[#allocation2 + $0xd4] sm:$0xf0]  ;;  %v4349_v54 = vor.u32 %v6245_v47, %v4348_v46 }
  0x67   :  { %1602 = vmatpush.bf16.msra.mxu1 %v4457_v15  ;;  %v5033_v6 = vor.u32 %v6414_v59, %v5030_v61  ;;  %v4886_v9 = vld [vmem:[#allocation2 + $0x5d0] sm:$0xf0]  ;;  %v6410_v10 = vld [vmem:[#allocation2 + $0x6c4] sm:$0xf]  ;;  %v4380_v15 = vld [vmem:[#allocation2 + $0x1c8] sm:$0xf]  ;;  %v4253_v23 = vor.u32 %v6221_v14, %v4252_v13 }
  0x68   :  { %1615 = vmatpush.bf16.msra.mxu2 %v4585_v16  ;;  %v5014_v12 = vld [vmem:[#allocation2 + $0x6d0] sm:$0xf0]  ;;  %v6253_v16 = vld [vmem:[#allocation2 + $0x1d4] sm:$0xf0]  ;;  %v4889_v17 = vor.u32 %v6378_v8, %v4886_v9  ;;  %v6406_v26 = vld [vmem:[#allocation2 + $0x6a4] sm:$0xf] }
  0x69   :  { %1628 = vmatpush.bf16.msra.mxu3 %v4713_v24  ;;  %v5017_v21 = vor.u32 %v6410_v10, %v5014_v12  ;;  %v6374_v24 = vld [vmem:[#allocation2 + $0x5a4] sm:$0xf]  ;;  %v4870_v25 = vld [vmem:[#allocation2 + $0x5b0] sm:$0xf0]  ;;  %v4381_v27 = vor.u32 %v6253_v16, %v4380_v15  ;;  %v4204_v56 = vld [vmem:[#allocation2 + $0x68] sm:$0xf] }
  0x6a   :  { %1590 = vmatpush.bf16.msra.mxu0 %v4313_v30  ;;  %v4998_v28 = vld [vmem:[#allocation2 + $0x6b0] sm:$0xf0]  ;;  %v6217_v30 = vld [vmem:[#allocation2 + $0xb4] sm:$0xf0]  ;;  %v4873_v33 = vor.u32 %v6374_v24, %v4870_v25  ;;  %v6402_v39 = vld [vmem:[#allocation2 + $0x684] sm:$0xf] }
  0x6b   :  { %1603 = vmatpush.bf16.msra.mxu1 %v4441_v31  ;;  %v4364_v31 = vld [vmem:[#allocation2 + $0x1a8] sm:$0xf]  ;;  %v5001_v34 = vor.u32 %v6406_v26, %v4998_v28  ;;  %v4237_v35 = vor.u32 %v6217_v30, %v4236_v29  ;;  %v4854_v38 = vld [vmem:[#allocation2 + $0x590] sm:$0xf0]  ;;  %v6366_v51 = vld [vmem:[#allocation2 + $0x564] sm:$0xf] }
  0x6c   :  { %1616 = vmatpush.bf16.msra.mxu2 %v4569_v32  ;;  %v6249_v32 = vld [vmem:[#allocation2 + $0x1b4] sm:$0xf0]  ;;  %v4982_v43 = vld [vmem:[#allocation2 + $0x690] sm:$0xf0]  ;;  %v4332_v58 = vld [vmem:[#allocation2 + $0x168] sm:$0xf] }
  0x6d   :  { %1629 = vmatpush.bf16.msra.mxu3 %v4697_v36  ;;  %v6370_v36 = vld [vmem:[#allocation2 + $0x584] sm:$0xf]  ;;  %v4365_v42 = vor.u32 %v6249_v32, %v4364_v31  ;;  %v4838_v52 = vld [vmem:[#allocation2 + $0x570] sm:$0xf0]  ;;  %v6209_v57 = vld [vmem:[#allocation2 + $0x74] sm:$0xf0] }
  0x6e   :  { %1591 = vmatpush.bf16.msra.mxu0 %v4297_v45  ;;  %v6213_v45 = vld [vmem:[#allocation2 + $0x94] sm:$0xf0]  ;;  %v4966_v55 = vld [vmem:[#allocation2 + $0x670] sm:$0xf0]  ;;  %v4205_v62 = vor.u32 %v6209_v57, %v4204_v56  ;;  %v6362_v63 = vld [vmem:[#allocation2 + $0x544] sm:$0xf] }
  0x6f   :  { %1604 = vmatpush.bf16.msra.mxu1 %v4425_v48  ;;  %v4857_v48 = vor.u32 %v6370_v36, %v4854_v38  ;;  %v4221_v50 = vor.u32 %v6213_v45, %v4220_v44  ;;  %v6241_v59 = vld [vmem:[#allocation2 + $0x174] sm:$0xf0]  ;;  %v4950_v3 = vld [vmem:[#allocation2 + $0x650] sm:$0xf0]  ;;  %v6390_v13 = vld [vmem:[#allocation2 + $0x624] sm:$0xf] }
  0x70   :  { %1617 = vmatpush.bf16.msra.mxu2 %v4553_v49  ;;  %v4985_v49 = vor.u32 %v6402_v39, %v4982_v43  ;;  %v4333_v2 = vor.u32 %v6241_v59, %v4332_v58  ;;  %v4806_v12 = vld [vmem:[#allocation2 + $0x530] sm:$0xf0]  ;;  %v4172_v16 = vld [vmem:[#allocation2 + $0x28] sm:$0xf]  ;;  %v6354_v25 = vld [vmem:[#allocation2 + $0x504] sm:$0xf] }
  0x71   :  { %1630 = vmatpush.bf16.msra.mxu3 %v4681_v53  ;;  %v6398_v53 = vld [vmem:[#allocation2 + $0x664] sm:$0xf]  ;;  %v4934_v15 = vld [vmem:[#allocation2 + $0x630] sm:$0xf0]  ;;  %v4156_v31 = vld [vmem:[#allocation2 + $0x8] sm:$0xf] }
  0x72   :  { %1592 = vmatpush.bf16.msra.mxu0 %v4281_v60  ;;  %v4841_v60 = vor.u32 %v6366_v51, %v4838_v52  ;;  %v4969_v61 = vor.u32 %v6398_v53, %v4966_v55  ;;  %v4790_v26 = vld [vmem:[#allocation2 + $0x510] sm:$0xf0]  ;;  %v6386_v29 = vld [vmem:[#allocation2 + $0x604] sm:$0xf]  ;;  %v4524_v36 = vld [vmem:[#allocation2 + $0x2e8] sm:$0xf] }
  0x73   :  { %1605 = vmatpush.bf16.msra.mxu1 %v4409_v0  ;;  %v4822_v0 = vld [vmem:[#allocation2 + $0x550] sm:$0xf0]  ;;  %v6289_v38 = vld [vmem:[#allocation2 + $0x2f4] sm:$0xf0]  ;;  %v4652_v39 = vld [vmem:[#allocation2 + $0x3e8] sm:$0xf] }
  0x74   :  { %1618 = vmatpush.bf16.msra.mxu2 %v4537_v1  ;;  %v6394_v1 = vld [vmem:[#allocation2 + $0x644] sm:$0xf]  ;;  %v4825_v8 = vor.u32 %v6362_v63, %v4822_v0  ;;  %v4918_v30 = vld [vmem:[#allocation2 + $0x610] sm:$0xf0]  ;;  %v6321_v43 = vld [vmem:[#allocation2 + $0x3f4] sm:$0xf0]  ;;  %v4525_v51 = vor.u32 %v6289_v38, %v4524_v36 }
  0x75   :  { %1631 = vmatpush.bf16.msra.mxu3 %v4665_v4  ;;  %1593 = vmatmul.bf16.vlgmr.msra.gmra.mxu0 %v6899_v22  ;;  %v4188_v4 = vld [vmem:[#allocation2 + $0x48] sm:$0xf]  ;;  %v4953_v9 = vor.u32 %v6394_v1, %v4950_v3  ;;  %v6353_v45 = vld [vmem:[#allocation2 + $0x4f4] sm:$0xf0]  ;;  %v4921_v46 = vor.u32 %v6386_v29, %v4918_v30  ;;  %v4653_v52 = vor.u32 %v6321_v43, %v4652_v39 }
  0x76   :  { %1637 = vmatpush.bf16.msrb.mxu0 %v4905_v5  ;;  %1606 = vmatmul.bf16.vlgmr.msra.gmra.mxu1 %v6893_v18  ;;  %v6205_v5 = vld [vmem:[#allocation2 + $0x54] sm:$0xf0]  ;;  %v4780_v44 = vld [vmem:[#allocation2 + $0x4e8] sm:$0xf] }
  0x77   :  { %1650 = vmatpush.bf16.msrb.mxu1 %v5033_v6  ;;  %1619 = vmatmul.bf16.vlgmr.msra.gmra.mxu2 %v6897_v20  ;;  %v4316_v6 = vld [vmem:[#allocation2 + $0x148] sm:$0xf]  ;;  %v4189_v10 = vor.u32 %v6205_v5, %v4188_v4  ;;  %v4781_v53 = vor.u32 %v6353_v45, %v4780_v44  ;;  %v6285_v55 = vld [vmem:[#allocation2 + $0x2d4] sm:$0xf0] }
  0x78   :  { %1663 = vmatpush.bf16.msrb.mxu2 %v4269_v7  ;;  %1632 = vmatmul.bf16.vlgmr.msra.gmra.mxu3 %v6913_v40  ;;  %v6237_v7 = vld [vmem:[#allocation2 + $0x154] sm:$0xf0]  ;;  %v4636_v56 = vld [vmem:[#allocation2 + $0x3c8] sm:$0xf] }
  0x79   :  { %1676 = vmatpush.bf16.msrb.mxu3 %v4397_v11  ;;  %v6358_v11 = vld [vmem:[#allocation2 + $0x524] sm:$0xf]  ;;  %v4317_v14 = vor.u32 %v6237_v7, %v4316_v6  ;;  %v6317_v58 = vld [vmem:[#allocation2 + $0x3d4] sm:$0xf0]  ;;  %v4764_v59 = vld [vmem:[#allocation2 + $0x4c8] sm:$0xf] }
  0x7a   :  { %1638 = vmatpush.bf16.msrb.mxu0 %v4889_v17  ;;  %v6201_v17 = vld [vmem:[#allocation2 + $0x34] sm:$0xf0]  ;;  %v4809_v24 = vor.u32 %v6358_v11, %v4806_v12  ;;  %v4637_v0 = vor.u32 %v6317_v58, %v4636_v56  ;;  %v4620_v4 = vld [vmem:[#allocation2 + $0x3a8] sm:$0xf] }
  0x7b   :  { %1651 = vmatpush.bf16.msrb.mxu1 %v5017_v21  ;;  %v4300_v21 = vld [vmem:[#allocation2 + $0x128] sm:$0xf]  ;;  %v4173_v28 = vor.u32 %v6201_v17, %v4172_v16  ;;  %v6281_v3 = vld [vmem:[#allocation2 + $0x2b4] sm:$0xf0] }
  0x7c   :  { %1664 = vmatpush.bf16.msrb.mxu2 %v4253_v23  ;;  %v6233_v23 = vld [vmem:[#allocation2 + $0x134] sm:$0xf0]  ;;  %v4748_v7 = vld [vmem:[#allocation2 + $0x4a8] sm:$0xf] }
  0x7d   :  { %1677 = vmatpush.bf16.msrb.mxu3 %v4381_v27  ;;  %v4937_v27 = vor.u32 %v6390_v13, %v4934_v15  ;;  %v4301_v32 = vor.u32 %v6233_v23, %v4300_v21  ;;  %v6313_v6 = vld [vmem:[#allocation2 + $0x3b4] sm:$0xf0]  ;;  %v4604_v16 = vld [vmem:[#allocation2 + $0x388] sm:$0xf] }
  0x7e   :  { %1639 = vmatpush.bf16.msrb.mxu0 %v4873_v33  ;;  %v6197_v33 = vld [vmem:[#allocation2 + $0x14] sm:$0xf0]  ;;  %v4621_v12 = vor.u32 %v6313_v6, %v4620_v4  ;;  %v4732_v23 = vld [vmem:[#allocation2 + $0x488] sm:$0xf] }
  0x7f   :  { %1652 = vmatpush.bf16.msrb.mxu1 %v5001_v34  ;;  %v4284_v34 = vld [vmem:[#allocation2 + $0x108] sm:$0xf]  ;;  %v4157_v47 = vor.u32 %v6197_v33, %v4156_v31  ;;  %v6277_v15 = vld [vmem:[#allocation2 + $0x294] sm:$0xf0] }
  0x80   :  { %1665 = vmatpush.bf16.msrb.mxu2 %v4237_v35  ;;  %v6229_v35 = vld [vmem:[#allocation2 + $0x114] sm:$0xf0]  ;;  %v4460_v30 = vld [vmem:[#allocation2 + $0x268] sm:$0xf] }
  0x81   :  { %1678 = vmatpush.bf16.msrb.mxu3 %v4365_v42  ;;  %v4793_v42 = vor.u32 %v6354_v25, %v4790_v26  ;;  %v6309_v21 = vld [vmem:[#allocation2 + $0x394] sm:$0xf0]  ;;  %v4860_v25 = vld [vmem:[#allocation2 + $0x588] sm:$0xf] }
  0x82   :  { %1640 = vmatpush.bf16.msrb.mxu0 %v4857_v48  ;;  %v4908_v48 = vld [vmem:[#allocation2 + $0x5e8] sm:$0xf]  ;;  %v6373_v26 = vld [vmem:[#allocation2 + $0x594] sm:$0xf0] }
  0x83   :  { %1653 = vmatpush.bf16.msrb.mxu1 %v4985_v49  ;;  %v6385_v49 = vld [vmem:[#allocation2 + $0x5f4] sm:$0xf0]  ;;  %v4861_v33 = vor.u32 %v6373_v26, %v4860_v25  ;;  %v4844_v38 = vld [vmem:[#allocation2 + $0x568] sm:$0xf] }
  0x84   :  { %1666 = vmatpush.bf16.msrb.mxu2 %v4221_v50  ;;  %v4285_v50 = vor.u32 %v6229_v35, %v4284_v34  ;;  %v4909_v57 = vor.u32 %v6385_v49, %v4908_v48  ;;  %v6273_v31 = vld [vmem:[#allocation2 + $0x274] sm:$0xf0]  ;;  %v4716_v35 = vld [vmem:[#allocation2 + $0x468] sm:$0xf] }
  0x85   :  { %1679 = vmatpush.bf16.msrb.mxu3 %v4349_v54  ;;  %v4508_v54 = vld [vmem:[#allocation2 + $0x2c8] sm:$0xf]  ;;  %v6305_v34 = vld [vmem:[#allocation2 + $0x374] sm:$0xf0] }
  0x86   :  { %1641 = vmatpush.bf16.msrb.mxu0 %v4841_v60  ;;  %v6349_v60 = vld [vmem:[#allocation2 + $0x4d4] sm:$0xf0]  ;;  %v4509_v63 = vor.u32 %v6285_v55, %v4508_v54  ;;  %v4444_v45 = vld [vmem:[#allocation2 + $0x248] sm:$0xf] }
  0x87   :  { %1654 = vmatpush.bf16.msrb.mxu1 %v4969_v61  ;;  %v4892_v61 = vld [vmem:[#allocation2 + $0x5c8] sm:$0xf]  ;;  %v4765_v1 = vor.u32 %v6349_v60, %v4764_v59  ;;  %v6337_v36 = vld [vmem:[#allocation2 + $0x474] sm:$0xf0] }
  0x88   :  { %1667 = vmatpush.bf16.msrb.mxu2 %v4205_v62  ;;  %v6381_v62 = vld [vmem:[#allocation2 + $0x5d4] sm:$0xf0]  ;;  %v4717_v44 = vor.u32 %v6337_v36, %v4716_v35  ;;  %v4556_v59 = vld [vmem:[#allocation2 + $0x328] sm:$0xf]  ;;  %v6219_v35 = vld [vmem:[#allocation2 + $0xcc] sm:$0xf] }
  0x89   :  { %1680 = vmatpush.bf16.msrb.mxu3 %v4333_v2  ;;  %v4492_v2 = vld [vmem:[#allocation2 + $0x2a8] sm:$0xf]  ;;  %v4893_v5 = vor.u32 %v6381_v62, %v4892_v61  ;;  %v6369_v39 = vld [vmem:[#allocation2 + $0x574] sm:$0xf0] }
  0x8a   :  { %1642 = vmatpush.bf16.msrb.mxu0 %v4825_v8  ;;  %v6345_v8 = vld [vmem:[#allocation2 + $0x4b4] sm:$0xf0]  ;;  %v4493_v11 = vor.u32 %v6281_v3, %v4492_v2  ;;  %v4845_v48 = vor.u32 %v6369_v39, %v4844_v38  ;;  %v4684_v62 = vld [vmem:[#allocation2 + $0x428] sm:$0xf]  ;;  %v4254_v38 = vld [vmem:[#allocation2 + $0xd8] sm:$0xf0] }
  0x8b   :  { %1655 = vmatpush.bf16.msrb.mxu1 %v4953_v9  ;;  %v4876_v9 = vld [vmem:[#allocation2 + $0x5a8] sm:$0xf]  ;;  %v4749_v13 = vor.u32 %v6345_v8, %v4748_v7  ;;  %v6301_v49 = vld [vmem:[#allocation2 + $0x354] sm:$0xf0]  ;;  %v6251_v39 = vld [vmem:[#allocation2 + $0x1cc] sm:$0xf] }
  0x8c   :  { %1668 = vmatpush.bf16.msrb.mxu2 %v4189_v10  ;;  %v6377_v10 = vld [vmem:[#allocation2 + $0x5b4] sm:$0xf0]  ;;  %v4412_v3 = vld [vmem:[#allocation2 + $0x208] sm:$0xf] }
  0x8d   :  { %1681 = vmatpush.bf16.msrb.mxu3 %v4317_v14  ;;  %v4476_v14 = vld [vmem:[#allocation2 + $0x288] sm:$0xf]  ;;  %v4877_v17 = vor.u32 %v6377_v10, %v4876_v9  ;;  %v6265_v58 = vld [vmem:[#allocation2 + $0x234] sm:$0xf0] }
  0x8e   :  { %1643 = vmatpush.bf16.msrb.mxu0 %v4809_v24  ;;  %v6341_v24 = vld [vmem:[#allocation2 + $0x494] sm:$0xf0]  ;;  %v4540_v7 = vld [vmem:[#allocation2 + $0x308] sm:$0xf] }
  0x8f   :  { %1656 = vmatpush.bf16.msrb.mxu1 %v4937_v27  ;;  %v4477_v27 = vor.u32 %v6277_v15, %v4476_v14  ;;  %v4733_v29 = vor.u32 %v6341_v24, %v4732_v23  ;;  %v6297_v61 = vld [vmem:[#allocation2 + $0x334] sm:$0xf0]  ;;  %v4668_v9 = vld [vmem:[#allocation2 + $0x408] sm:$0xf]  ;;  %v6255_v23 = vld [vmem:[#allocation2 + $0x1ec] sm:$0xf] }
  0x90   :  { %1669 = vmatpush.bf16.msrb.mxu2 %v4173_v28  ;;  %v4605_v28 = vor.u32 %v6309_v21, %v4604_v16  ;;  %v6261_v4 = vld [vmem:[#allocation2 + $0x214] sm:$0xf0]  ;;  %v5036_v14 = vld [vmem:[#allocation2 + $0x6e8] sm:$0xf]  ;;  %v6223_v16 = vld [vmem:[#allocation2 + $0xec] sm:$0xf] }
  0x91   :  { %1682 = vmatpush.bf16.msrb.mxu3 %v4301_v32  ;;  %v4588_v32 = vld [vmem:[#allocation2 + $0x368] sm:$0xf]  ;;  %v6293_v8 = vld [vmem:[#allocation2 + $0x314] sm:$0xf0]  ;;  %v4270_v21 = vld [vmem:[#allocation2 + $0xf8] sm:$0xf0] }
  0x92   :  { %1644 = vmatpush.bf16.msrb.mxu0 %v4793_v42  ;;  %v4461_v42 = vor.u32 %v6273_v31, %v4460_v30  ;;  %v4589_v43 = vor.u32 %v6305_v34, %v4588_v32  ;;  %v6417_v15 = vld [vmem:[#allocation2 + $0x6f4] sm:$0xf0]  ;;  %v4398_v24 = vld [vmem:[#allocation2 + $0x1f8] sm:$0xf0]  ;;  %v4541_v25 = vor.u32 %v6293_v8, %v4540_v7  ;;  %v4273_v31 = vor.u32 %v6223_v16, %v4270_v21  ;;  %v4972_v8 = vld [vmem:[#allocation2 + $0x668] sm:$0xf] }
  0x93   :  { %1657 = vmatpush.bf16.msrb.mxu1 %v4921_v46  ;;  %v6269_v46 = vld [vmem:[#allocation2 + $0x254] sm:$0xf0]  ;;  %v5037_v30 = vor.u32 %v6417_v15, %v5036_v14  ;;  %v4401_v32 = vor.u32 %v6255_v23, %v4398_v24  ;;  %v4334_v14 = vld [vmem:[#allocation2 + $0x178] sm:$0xf0]  ;;  %v6271_v15 = vld [vmem:[#allocation2 + $0x26c] sm:$0xf] }
  0x94   :  { %1670 = vmatpush.bf16.msrb.mxu2 %v4157_v47  ;;  %v4572_v47 = vld [vmem:[#allocation2 + $0x348] sm:$0xf]  ;;  %v4445_v54 = vor.u32 %v6269_v46, %v4444_v45  ;;  %v6413_v34 = vld [vmem:[#allocation2 + $0x6d4] sm:$0xf0]  ;;  %v4257_v46 = vor.u32 %v6219_v35, %v4254_v38  ;;  %v4462_v16 = vld [vmem:[#allocation2 + $0x278] sm:$0xf0] }
  0x95   :  { %1683 = vmatpush.bf16.msrb.mxu3 %v4285_v50  ;;  %1645 = vmatmul.bf16.vlgmr.msrb.gmra.mxu0 %v6915_v41  ;;  %v4700_v50 = vld [vmem:[#allocation2 + $0x448] sm:$0xf]  ;;  %v4573_v55 = vor.u32 %v6301_v49, %v4572_v47  ;;  %v6409_v49 = vld [vmem:[#allocation2 + $0x6b4] sm:$0xf0] }
  0x96   :  { %1689 = vmatpush.bf16.msra.mxu0 %v4525_v51  ;;  %1658 = vmatmul.bf16.vlgmr.msrb.gmra.mxu1 %v6911_v37  ;;  %v6333_v51 = vld [vmem:[#allocation2 + $0x454] sm:$0xf0]  ;;  %v4956_v24 = vld [vmem:[#allocation2 + $0x648] sm:$0xf] }
  0x97   :  { %1702 = vmatpush.bf16.msra.mxu1 %v4653_v52  ;;  %1671 = vmatmul.bf16.vlgmr.msrb.gmra.mxu2 %v6895_v19  ;;  %v4828_v52 = vld [vmem:[#allocation2 + $0x548] sm:$0xf]  ;;  %v4701_v56 = vor.u32 %v6333_v51, %v4700_v50  ;;  %v6215_v50 = vld [vmem:[#allocation2 + $0xac] sm:$0xf] }
  0x98   :  { %1715 = vmatpush.bf16.msra.mxu2 %v4781_v53  ;;  %1684 = vmatmul.bf16.vlgmr.msrb.gmra.mxu3 %v6899_v22  ;;  %v6365_v53 = vld [vmem:[#allocation2 + $0x554] sm:$0xf0]  ;;  %v4940_v38 = vld [vmem:[#allocation2 + $0x628] sm:$0xf] }
  0x99   :  { %1728 = vmatpush.bf16.msra.mxu3 %v4909_v57  ;;  %v4428_v57 = vld [vmem:[#allocation2 + $0x228] sm:$0xf]  ;;  %v4829_v60 = vor.u32 %v6365_v53, %v4828_v52  ;;  %v4238_v52 = vld [vmem:[#allocation2 + $0xb8] sm:$0xf0]  ;;  %v6247_v53 = vld [vmem:[#allocation2 + $0x1ac] sm:$0xf] }
  0x9a   :  { %1690 = vmatpush.bf16.msra.mxu0 %v4509_v63  ;;  %v6329_v63 = vld [vmem:[#allocation2 + $0x434] sm:$0xf0]  ;;  %v4429_v2 = vor.u32 %v6265_v58, %v4428_v57  ;;  %v4241_v58 = vor.u32 %v6215_v50, %v4238_v52 }
  0x9b   :  { %1703 = vmatpush.bf16.msra.mxu1 %v4637_v0  ;;  %v4812_v0 = vld [vmem:[#allocation2 + $0x528] sm:$0xf]  ;;  %v4685_v6 = vor.u32 %v6329_v63, %v4684_v62  ;;  %v6211_v62 = vld [vmem:[#allocation2 + $0x8c] sm:$0xf]  ;;  %v6389_v52 = vld [vmem:[#allocation2 + $0x614] sm:$0xf0] }
  0x9c   :  { %1716 = vmatpush.bf16.msra.mxu2 %v4765_v1  ;;  %v6361_v1 = vld [vmem:[#allocation2 + $0x534] sm:$0xf0] }
  0x9d   :  { %1729 = vmatpush.bf16.msra.mxu3 %v4893_v5  ;;  %v4557_v5 = vor.u32 %v6297_v61, %v4556_v59  ;;  %v4813_v10 = vor.u32 %v6361_v1, %v4812_v0  ;;  %v6405_v61 = vld [vmem:[#allocation2 + $0x694] sm:$0xf0]  ;;  %v4222_v0 = vld [vmem:[#allocation2 + $0x98] sm:$0xf0]  ;;  %v6243_v1 = vld [vmem:[#allocation2 + $0x18c] sm:$0xf] }
  0x9e   :  { %1691 = vmatpush.bf16.msra.mxu0 %v4493_v11  ;;  %v6325_v11 = vld [vmem:[#allocation2 + $0x414] sm:$0xf0] }
  0x9f   :  { %1704 = vmatpush.bf16.msra.mxu1 %v4621_v12  ;;  %v4796_v12 = vld [vmem:[#allocation2 + $0x508] sm:$0xf]  ;;  %v4669_v26 = vor.u32 %v6325_v11, %v4668_v9  ;;  %v6401_v9 = vld [vmem:[#allocation2 + $0x674] sm:$0xf0] }
  0xa0   :  { %1717 = vmatpush.bf16.msra.mxu2 %v4749_v13  ;;  %v6357_v13 = vld [vmem:[#allocation2 + $0x514] sm:$0xf0] }
  0xa1   :  { %1730 = vmatpush.bf16.msra.mxu3 %v4877_v17  ;;  %v4413_v17 = vor.u32 %v6261_v4, %v4412_v3  ;;  %v6275_v3 = vld [vmem:[#allocation2 + $0x28c] sm:$0xf]  ;;  %v4478_v4 = vld [vmem:[#allocation2 + $0x298] sm:$0xf0] }
  0xa2   :  { %1692 = vmatpush.bf16.msra.mxu0 %v4477_v27  ;;  %v6287_v27 = vld [vmem:[#allocation2 + $0x2ec] sm:$0xf]  ;;  %v4481_v11 = vor.u32 %v6275_v3, %v4478_v4  ;;  %v4782_v4 = vld [vmem:[#allocation2 + $0x4f8] sm:$0xf0] }
  0xa3   :  { %1705 = vmatpush.bf16.msra.mxu1 %v4605_v28  ;;  %v4526_v28 = vld [vmem:[#allocation2 + $0x2f8] sm:$0xf0] }
  0xa4   :  { %1718 = vmatpush.bf16.msra.mxu2 %v4733_v29  ;;  %v4797_v29 = vor.u32 %v6357_v13, %v4796_v12  ;;  %v4529_v36 = vor.u32 %v6287_v27, %v4526_v28  ;;  %v4206_v12 = vld [vmem:[#allocation2 + $0x78] sm:$0xf0]  ;;  %v6239_v13 = vld [vmem:[#allocation2 + $0x16c] sm:$0xf]  ;;  %v4465_v27 = vor.u32 %v6271_v15, %v4462_v16 }
  0xa5   :  { %1731 = vmatpush.bf16.msra.mxu3 %v4861_v33  ;;  %v5020_v33 = vld [vmem:[#allocation2 + $0x6c8] sm:$0xf]  ;;  %v4337_v23 = vor.u32 %v6239_v13, %v4334_v14  ;;  %v4190_v28 = vld [vmem:[#allocation2 + $0x58] sm:$0xf0] }
  0xa6   :  { %1693 = vmatpush.bf16.msra.mxu0 %v4461_v42  ;;  %v4382_v42 = vld [vmem:[#allocation2 + $0x1d8] sm:$0xf0]  ;;  %v5021_v45 = vor.u32 %v6413_v34, %v5020_v33 }
  0xa7   :  { %1706 = vmatpush.bf16.msra.mxu1 %v4589_v43  ;;  %v6283_v43 = vld [vmem:[#allocation2 + $0x2cc] sm:$0xf]  ;;  %v4385_v47 = vor.u32 %v6251_v39, %v4382_v42  ;;  %v6393_v39 = vld [vmem:[#allocation2 + $0x634] sm:$0xf0] }
  0xa8   :  { %1719 = vmatpush.bf16.msra.mxu2 %v4717_v44  ;;  %v4510_v44 = vld [vmem:[#allocation2 + $0x2d8] sm:$0xf0]  ;;  %v6199_v42 = vld [vmem:[#allocation2 + $0x2c] sm:$0xf]  ;;  %v4941_v50 = vor.u32 %v6393_v39, %v4940_v38 }
  0xa9   :  { %1732 = vmatpush.bf16.msra.mxu3 %v4845_v48  ;;  %v5004_v48 = vld [vmem:[#allocation2 + $0x6a8] sm:$0xf]  ;;  %v4513_v51 = vor.u32 %v6283_v43, %v4510_v44  ;;  %v4622_v38 = vld [vmem:[#allocation2 + $0x3b8] sm:$0xf0]  ;;  %v6343_v39 = vld [vmem:[#allocation2 + $0x4ac] sm:$0xf] }
  0xaa   :  { %1694 = vmatpush.bf16.msra.mxu0 %v4445_v54  ;;  %v4366_v54 = vld [vmem:[#allocation2 + $0x1b8] sm:$0xf0]  ;;  %v5005_v57 = vor.u32 %v6409_v49, %v5004_v48  ;;  %v6263_v48 = vld [vmem:[#allocation2 + $0x22c] sm:$0xf] }
  0xab   :  { %1707 = vmatpush.bf16.msra.mxu1 %v4573_v55  ;;  %v6279_v55 = vld [vmem:[#allocation2 + $0x2ac] sm:$0xf]  ;;  %v4369_v59 = vor.u32 %v6247_v53, %v4366_v54  ;;  %v4430_v49 = vld [vmem:[#allocation2 + $0x238] sm:$0xf0] }
  0xac   :  { %1720 = vmatpush.bf16.msra.mxu2 %v4701_v56  ;;  %v4494_v56 = vld [vmem:[#allocation2 + $0x2b8] sm:$0xf0] }
  0xad   :  { %1733 = vmatpush.bf16.msra.mxu3 %v4829_v60  ;;  %v4988_v60 = vld [vmem:[#allocation2 + $0x688] sm:$0xf]  ;;  %v4497_v63 = vor.u32 %v6279_v55, %v4494_v56  ;;  %v6195_v55 = vld [vmem:[#allocation2 + $0xc] sm:$0xf]  ;;  %v4158_v56 = vld [vmem:[#allocation2 + $0x18] sm:$0xf0] }
  0xae   :  { %1695 = vmatpush.bf16.msra.mxu0 %v4429_v2  ;;  %v4350_v2 = vld [vmem:[#allocation2 + $0x198] sm:$0xf0] }
  0xaf   :  { %1708 = vmatpush.bf16.msra.mxu1 %v4557_v5  ;;  %v4989_v5 = vor.u32 %v6405_v61, %v4988_v60  ;;  %v4353_v7 = vor.u32 %v6243_v1, %v4350_v2  ;;  %v4286_v60 = vld [vmem:[#allocation2 + $0x118] sm:$0xf0]  ;;  %v6259_v61 = vld [vmem:[#allocation2 + $0x20c] sm:$0xf] }
  0xb0   :  { %1721 = vmatpush.bf16.msra.mxu2 %v4685_v6  ;;  %v4225_v6 = vor.u32 %v6211_v62, %v4222_v0  ;;  %v4414_v62 = vld [vmem:[#allocation2 + $0x218] sm:$0xf0]  ;;  %v6319_v0 = vld [vmem:[#allocation2 + $0x3ec] sm:$0xf] }
  0xb1   :  { %1734 = vmatpush.bf16.msra.mxu3 %v4813_v10  ;;  %v6207_v10 = vld [vmem:[#allocation2 + $0x6c] sm:$0xf]  ;;  %v4654_v1 = vld [vmem:[#allocation2 + $0x3f8] sm:$0xf0]  ;;  %v4417_v13 = vor.u32 %v6259_v61, %v4414_v62 }
  0xb2   :  { %1696 = vmatpush.bf16.msra.mxu0 %v4413_v17  ;;  %v4973_v17 = vor.u32 %v6401_v9, %v4972_v8  ;;  %v4209_v21 = vor.u32 %v6207_v10, %v4206_v12  ;;  %v6351_v2 = vld [vmem:[#allocation2 + $0x4ec] sm:$0xf]  ;;  %v4161_v8 = vor.u32 %v6195_v55, %v4158_v56  ;;  %v4657_v14 = vor.u32 %v6319_v0, %v4654_v1  ;;  %v4734_v56 = vld [vmem:[#allocation2 + $0x498] sm:$0xf0] }
  0xb3   :  { %1709 = vmatpush.bf16.msra.mxu1 %v4541_v25  ;;  %v6397_v25 = vld [vmem:[#allocation2 + $0x654] sm:$0xf0]  ;;  %v6415_v10 = vld [vmem:[#allocation2 + $0x6ec] sm:$0xf]  ;;  %v4785_v15 = vor.u32 %v6351_v2, %v4782_v4  ;;  %v4590_v2 = vld [vmem:[#allocation2 + $0x378] sm:$0xf0] }
  0xb4   :  { %1722 = vmatpush.bf16.msra.mxu2 %v4669_v26  ;;  %v6203_v26 = vld [vmem:[#allocation2 + $0x4c] sm:$0xf]  ;;  %v4957_v33 = vor.u32 %v6397_v25, %v4956_v24  ;;  %v4766_v25 = vld [vmem:[#allocation2 + $0x4d8] sm:$0xf0] }
  0xb5   :  { %1735 = vmatpush.bf16.msra.mxu3 %v4797_v29  ;;  %1697 = vmatmul.bf16.vlgmr.msra.gmra.mxu0 %v6893_v18  ;;  %v6235_v29 = vld [vmem:[#allocation2 + $0x14c] sm:$0xf]  ;;  %v4193_v35 = vor.u32 %v6203_v26, %v4190_v28 }
  0xb6   :  { %1741 = vmatpush.bf16.msrb.mxu0 %v5037_v30  ;;  %1710 = vmatmul.bf16.vlgmr.msra.gmra.mxu1 %v6897_v20  ;;  %v4318_v30 = vld [vmem:[#allocation2 + $0x158] sm:$0xf0]  ;;  %v6379_v26 = vld [vmem:[#allocation2 + $0x5cc] sm:$0xf] }
  0xb7   :  { %1754 = vmatpush.bf16.msrb.mxu1 %v4273_v31  ;;  %1723 = vmatmul.bf16.vlgmr.msra.gmra.mxu2 %v6913_v40  ;;  %v6267_v31 = vld [vmem:[#allocation2 + $0x24c] sm:$0xf] }
  0xb8   :  { %1767 = vmatpush.bf16.msrb.mxu2 %v4401_v32  ;;  %1736 = vmatmul.bf16.vlgmr.msra.gmra.mxu3 %v6915_v41  ;;  %v4446_v32 = vld [vmem:[#allocation2 + $0x258] sm:$0xf0]  ;;  %v6411_v28 = vld [vmem:[#allocation2 + $0x6cc] sm:$0xf] }
  0xb9   :  { %1780 = vmatpush.bf16.msrb.mxu3 %v4529_v36  ;;  %v4321_v36 = vor.u32 %v6235_v29, %v4318_v30  ;;  %v4449_v44 = vor.u32 %v6267_v31, %v4446_v32  ;;  %v5022_v29 = vld [vmem:[#allocation2 + $0x6d8] sm:$0xf0]  ;;  %v6303_v1 = vld [vmem:[#allocation2 + $0x36c] sm:$0xf] }
  0xba   :  { %1742 = vmatpush.bf16.msrb.mxu0 %v5021_v45  ;;  %v4174_v45 = vld [vmem:[#allocation2 + $0x38] sm:$0xf0] }
  0xbb   :  { %1755 = vmatpush.bf16.msrb.mxu1 %v4257_v46  ;;  %v6231_v46 = vld [vmem:[#allocation2 + $0x12c] sm:$0xf]  ;;  %v4177_v53 = vor.u32 %v6199_v42, %v4174_v45  ;;  %v5025_v42 = vor.u32 %v6411_v28, %v5022_v29 }
  0xbc   :  { %1768 = vmatpush.bf16.msrb.mxu2 %v4385_v47  ;;  %v4302_v47 = vld [vmem:[#allocation2 + $0x138] sm:$0xf0]  ;;  %v6375_v45 = vld [vmem:[#allocation2 + $0x5ac] sm:$0xf] }
  0xbd   :  { %1781 = vmatpush.bf16.msrb.mxu3 %v4513_v51  ;;  %v4924_v51 = vld [vmem:[#allocation2 + $0x608] sm:$0xf]  ;;  %v4305_v54 = vor.u32 %v6231_v46, %v4302_v47  ;;  %v4878_v46 = vld [vmem:[#allocation2 + $0x5b8] sm:$0xf0]  ;;  %v6407_v47 = vld [vmem:[#allocation2 + $0x6ac] sm:$0xf] }
  0xbe   :  { %1743 = vmatpush.bf16.msrb.mxu0 %v5005_v57  ;;  %v6933_v34 = vpop.f32.mrf.mxu0  ;;  %v6227_v57 = vld [vmem:[#allocation2 + $0x10c] sm:$0xf]  ;;  %v4925_v3 = vor.u32 %v6389_v52, %v4924_v51  ;;  %v4881_v51 = vor.u32 %v6375_v45, %v4878_v46  ;;  %v4942_v46 = vld [vmem:[#allocation2 + $0x638] sm:$0xf0] }
  0xbf   :  { %1756 = vmatpush.bf16.msrb.mxu1 %v4241_v58  ;;  %v6935_v43 = vpop.f32.mrf.mxu1  ;;  %v6937_v58 = vpop.f32.mrf.mxu2  ;;  %v4289_v9 = vor.u32 %v6227_v57, %v4286_v60  ;;  %v6307_v52 = vld [vmem:[#allocation2 + $0x38c] sm:$0xf]  ;;  %v4990_v60 = vld [vmem:[#allocation2 + $0x698] sm:$0xf0] }
  0xc0   :  { %1769 = vmatpush.bf16.msrb.mxu2 %v4369_v59  ;;  %v4433_v59 = vor.u32 %v6263_v48, %v4430_v49  ;;  %v5006_v48 = vld [vmem:[#allocation2 + $0x6b8] sm:$0xf0]  ;;  %v6371_v57 = vld [vmem:[#allocation2 + $0x58c] sm:$0xf] }
  0xc1   :  { %1782 = vmatpush.bf16.msrb.mxu3 %v4497_v63  ;;  %v6939_v63 = vpop.f32.mrf.mxu3  ;;  %v5009_v55 = vor.u32 %v6407_v47, %v5006_v48  ;;  %v6391_v45 = vld [vmem:[#allocation2 + $0x62c] sm:$0xf] }
  0xc2   :  { %1744 = vmatpush.bf16.msrb.mxu0 %v4989_v5  ;;  %v6383_v5 = vld [vmem:[#allocation2 + $0x5ec] sm:$0xf] }
  0xc3   :  { %1757 = vmatpush.bf16.msrb.mxu1 %v4225_v6  ;;  %v4910_v6 = vld [vmem:[#allocation2 + $0x5f8] sm:$0xf0]  ;;  %v6291_v48 = vld [vmem:[#allocation2 + $0x30c] sm:$0xf] }
  0xc4   :  { %1770 = vmatpush.bf16.msrb.mxu2 %v4353_v7  ;;  %v4913_v16 = vor.u32 %v6383_v5, %v4910_v6  ;;  %v4718_v5 = vld [vmem:[#allocation2 + $0x478] sm:$0xf0]  ;;  %v6367_v6 = vld [vmem:[#allocation2 + $0x56c] sm:$0xf] }
  0xc5   :  { %1783 = vmatpush.bf16.msrb.mxu3 %v4481_v11  ;;  %v5038_v11 = vld [vmem:[#allocation2 + $0x6f8] sm:$0xf0] }
  0xc6   :  { %1745 = vmatpush.bf16.msrb.mxu0 %v4973_v17  ;;  %v1492_v7 = vpop.f32.mrf.mxu0  ;;  %v6315_v17 = vld [vmem:[#allocation2 + $0x3cc] sm:$0xf]  ;;  %v5041_v24 = vor.u32 %v6415_v10, %v5038_v11  ;;  %v4593_v10 = vor.u32 %v6303_v1, %v4590_v2  ;;  %v5284_v2 = vld [vmem:[#allocation4 + $0x1e0] sm:$0xf] }
  0xc7   :  { %1758 = vmatpush.bf16.msrb.mxu1 %v4209_v21  ;;  %v1505_v12 = vpop.f32.mrf.mxu1  ;;  %v4638_v21 = vld [vmem:[#allocation2 + $0x3d8] sm:$0xf0]  ;;  %v1518_v30 = vpop.f32.mrf.mxu2 }
  0xc8   :  { %1771 = vmatpush.bf16.msrb.mxu2 %v4337_v23  ;;  %v6347_v23 = vld [vmem:[#allocation2 + $0x4cc] sm:$0xf]  ;;  %v4641_v31 = vor.u32 %v6315_v17, %v4638_v21  ;;  %v4846_v7 = vld [vmem:[#allocation2 + $0x578] sm:$0xf0] }
  0xc9   :  { %1784 = vmatpush.bf16.msrb.mxu3 %v4465_v27  ;;  %v4894_v27 = vld [vmem:[#allocation2 + $0x5d8] sm:$0xf0]  ;;  %v1531_v32 = vpop.f32.mrf.mxu3  ;;  %v4849_v12 = vor.u32 %v6367_v6, %v4846_v7 }
  0xca   :  { %1746 = vmatpush.bf16.msrb.mxu0 %v4957_v33  ;;  %v4769_v33 = vor.u32 %v6347_v23, %v4766_v25  ;;  %v4702_v21 = vld [vmem:[#allocation2 + $0x458] sm:$0xf0]  ;;  %v6363_v23 = vld [vmem:[#allocation2 + $0x54c] sm:$0xf] }
  0xcb   :  { %1759 = vmatpush.bf16.msrb.mxu1 %v4193_v35  ;;  %v4897_v35 = vor.u32 %v6379_v26, %v4894_v27  ;;  %v6395_v25 = vld [vmem:[#allocation2 + $0x64c] sm:$0xf]  ;;  %v4958_v26 = vld [vmem:[#allocation2 + $0x658] sm:$0xf0] }
  0xcc   :  { %1772 = vmatpush.bf16.msrb.mxu2 %v4321_v36  ;;  %v6311_v36 = vld [vmem:[#allocation2 + $0x3ac] sm:$0xf] }
  0xcd   :  { %1785 = vmatpush.bf16.msrb.mxu3 %v4449_v44  ;;  %v4750_v44 = vld [vmem:[#allocation2 + $0x4b8] sm:$0xf0]  ;;  %v4625_v49 = vor.u32 %v6311_v36, %v4622_v38  ;;  %v6327_v36 = vld [vmem:[#allocation2 + $0x42c] sm:$0xf]  ;;  %v4961_v38 = vor.u32 %v6395_v25, %v4958_v26  ;;  %v6472_v25 = vld [vmem:[#allocation4 + $0x1ac] sm:$0xf0] }
  0xce   :  { %1747 = vmatpush.bf16.msrb.mxu0 %v4941_v50  ;;  %v4753_v50 = vor.u32 %v6343_v39, %v4750_v44  ;;  %v4686_v39 = vld [vmem:[#allocation2 + $0x438] sm:$0xf0] }
  0xcf   :  { %1760 = vmatpush.bf16.msrb.mxu1 %v4177_v53  ;;  %v4606_v53 = vld [vmem:[#allocation2 + $0x398] sm:$0xf0] }
  0xd0   :  { %1773 = vmatpush.bf16.msrb.mxu2 %v4305_v54  ;;  %v6339_v54 = vld [vmem:[#allocation2 + $0x48c] sm:$0xf]  ;;  %v4814_v44 = vld [vmem:[#allocation2 + $0x538] sm:$0xf0] }
  0xd1   :  { %1786 = vmatpush.bf16.msrb.mxu3 %v4433_v59  ;;  %v6403_v59 = vld [vmem:[#allocation2 + $0x68c] sm:$0xf] }
  0xd2   :  { %1748 = vmatpush.bf16.msrb.mxu0 %v4925_v3  ;;  %v6945_v61 = vpop.f32.mrf.mxu0  ;;  %v6335_v3 = vld [vmem:[#allocation2 + $0x46c] sm:$0xf]  ;;  %v4993_v4 = vor.u32 %v6403_v59, %v4990_v60  ;;  %v4926_v59 = vld [vmem:[#allocation2 + $0x618] sm:$0xf0]  ;;  %v5156_v60 = vld [vmem:[#allocation4 + $0xe0] sm:$0xf] }
  0xd3   :  { %1761 = vmatpush.bf16.msrb.mxu1 %v4161_v8  ;;  %v6947_v62 = vpop.f32.mrf.mxu1  ;;  %v6399_v8 = vld [vmem:[#allocation2 + $0x66c] sm:$0xf]  ;;  %v4721_v11 = vor.u32 %v6335_v3, %v4718_v5  ;;  %v6480_v3 = vld [vmem:[#allocation4 + $0x1ec] sm:$0xf0] }
  0xd4   :  { %1774 = vmatpush.bf16.msrb.mxu2 %v4289_v9  ;;  %v4974_v9 = vld [vmem:[#allocation2 + $0x678] sm:$0xf0] }
  0xd5   :  { %1787 = vmatpush.bf16.msrb.mxu3 %v4417_v13  ;;  %1749 = vmatmul.bf16.vlgmr.msrb.gmra.mxu0 %v6911_v37  ;;  %v6299_v13 = vld [vmem:[#allocation2 + $0x34c] sm:$0xf]  ;;  %v4977_v17 = vor.u32 %v6399_v8, %v4974_v9  ;;  %v5285_v9 = vor.u32 %v6480_v3, %v5284_v2  ;;  %v6456_v2 = vld [vmem:[#allocation4 + $0x12c] sm:$0xf0]  ;;  %v5380_v3 = vld [vmem:[#allocation4 + $0x2a0] sm:$0xf] }
  0xd6   :  { %1793 = vmatpush.bf16.msra.mxu0 %v4657_v14  ;;  %1762 = vmatmul.bf16.vlgmr.msrb.gmra.mxu1 %v6895_v19  ;;  %v4737_v19 = vor.u32 %v6339_v54, %v4734_v56  ;;  %v4574_v14 = vld [vmem:[#allocation2 + $0x358] sm:$0xf0]  ;;  %v6355_v56 = vld [vmem:[#allocation2 + $0x50c] sm:$0xf] }
  0xd7   :  { %1806 = vmatpush.bf16.msra.mxu1 %v4785_v15  ;;  %1775 = vmatmul.bf16.vlgmr.msrb.gmra.mxu2 %v6899_v22  ;;  %v4862_v22 = vld [vmem:[#allocation2 + $0x598] sm:$0xf0]  ;;  %v6331_v15 = vld [vmem:[#allocation2 + $0x44c] sm:$0xf]  ;;  %v4577_v28 = vor.u32 %v6299_v13, %v4574_v14  ;;  %v6476_v13 = vld [vmem:[#allocation4 + $0x1cc] sm:$0xf0] }
  0xd8   :  { %1819 = vmatpush.bf16.msra.mxu2 %v4913_v16  ;;  %1788 = vmatmul.bf16.vlgmr.msrb.gmra.mxu3 %v6893_v18  ;;  %v4609_v18 = vor.u32 %v6307_v52, %v4606_v53  ;;  %v4865_v0 = vor.u32 %v6371_v57, %v4862_v22  ;;  %v6323_v52 = vld [vmem:[#allocation2 + $0x40c] sm:$0xf]  ;;  %v4670_v53 = vld [vmem:[#allocation2 + $0x418] sm:$0xf0] }
  0xd9   :  { %1832 = vmatpush.bf16.msra.mxu3 %v5041_v24  ;;  %v4830_v24 = vld [vmem:[#allocation2 + $0x558] sm:$0xf0]  ;;  %v6387_v22 = vld [vmem:[#allocation2 + $0x60c] sm:$0xf] }
  0xda   :  { %1794 = vmatpush.bf16.msra.mxu0 %v4641_v31  ;;  %v6949_v16 = vpop.f32.mrf.mxu2  ;;  %v1544_v29 = vpop.f32.mrf.mxu0  ;;  %v4705_v31 = vor.u32 %v6331_v15, %v4702_v21  ;;  %v4833_v32 = vor.u32 %v6363_v23, %v4830_v24  ;;  %v4798_v57 = vld [vmem:[#allocation2 + $0x518] sm:$0xf0]  ;;  %v4929_v6 = vor.u32 %v6387_v22, %v4926_v59  ;;  %v5124_v21 = vld [vmem:[#allocation4 + $0xa0] sm:$0xf]  ;;  %v6440_v23 = vld [vmem:[#allocation4 + $0xac] sm:$0xf0] }
  0xdb   :  { %1807 = vmatpush.bf16.msra.mxu1 %v4769_v33  ;;  %v6951_v27 = vpop.f32.mrf.mxu3  ;;  %v1557_v30 = vpop.f32.mrf.mxu1  ;;  %v6295_v33 = vld [vmem:[#allocation2 + $0x32c] sm:$0xf]  ;;  %v4801_v5 = vor.u32 %v6355_v56, %v4798_v57  ;;  %v5252_v24 = vld [vmem:[#allocation4 + $0x1a0] sm:$0xf]  ;;  %v5125_v26 = vor.u32 %v6440_v23, %v5124_v21  ;;  %v6500_v23 = vld [vmem:[#allocation4 + $0x28c] sm:$0xf0] }
  0xdc   :  { %1820 = vmatpush.bf16.msra.mxu2 %v4897_v35  ;;  %v4558_v35 = vld [vmem:[#allocation2 + $0x338] sm:$0xf0]  ;;  %v5108_v29 = vld [vmem:[#allocation4 + $0x80] sm:$0xf]  ;;  %v6436_v30 = vld [vmem:[#allocation4 + $0x8c] sm:$0xf0] }
  0xdd   :  { %1833 = vmatpush.bf16.msra.mxu3 %v5025_v42  ;;  %v6359_v42 = vld [vmem:[#allocation2 + $0x52c] sm:$0xf]  ;;  %v4561_v47 = vor.u32 %v6295_v33, %v4558_v35  ;;  %v5092_v35 = vld [vmem:[#allocation4 + $0x60] sm:$0xf] }
  0xde   :  { %1795 = vmatpush.bf16.msra.mxu0 %v4625_v49  ;;  %v4689_v49 = vor.u32 %v6327_v36, %v4686_v39  ;;  %v5220_v36 = vld [vmem:[#allocation4 + $0x160] sm:$0xf] }
  0xdf   :  { %1808 = vmatpush.bf16.msra.mxu1 %v4753_v50  ;;  %v4817_v50 = vor.u32 %v6359_v42, %v4814_v44  ;;  %v5412_v39 = vld [vmem:[#allocation4 + $0x2e0] sm:$0xf]  ;;  %v6512_v42 = vld [vmem:[#allocation4 + $0x2ec] sm:$0xf0] }
  0xe0   :  { %1821 = vmatpush.bf16.msra.mxu2 %v4881_v51  ;;  %v4542_v51 = vld [vmem:[#allocation2 + $0x318] sm:$0xf0]  ;;  %v5413_v44 = vor.u32 %v6512_v42, %v5412_v39  ;;  %v5364_v21 = vld [vmem:[#allocation4 + $0x280] sm:$0xf]  ;;  %v6438_v39 = vld [vmem:[#allocation4 + $0xa4] sm:$0xf] }
  0xe1   :  { %1834 = vmatpush.bf16.msra.mxu3 %v5009_v55  ;;  %v4945_v55 = vor.u32 %v6391_v45, %v4942_v46  ;;  %v4545_v1 = vor.u32 %v6291_v48, %v4542_v51  ;;  %v5076_v48 = vld [vmem:[#allocation4 + $0x40] sm:$0xf]  ;;  %v6460_v51 = vld [vmem:[#allocation4 + $0x14c] sm:$0xf0]  ;;  %v5126_v42 = vld [vmem:[#allocation4 + $0xb0] sm:$0xf0] }
  0xe2   :  { %1796 = vmatpush.bf16.msra.mxu0 %v4609_v18  ;;  %v1570_v54 = vpop.f32.mrf.mxu2  ;;  %v6448_v18 = vld [vmem:[#allocation4 + $0xec] sm:$0xf0] }
  0xe3   :  { %1809 = vmatpush.bf16.msra.mxu1 %v4737_v19  ;;  %v1583_v19 = vpop.f32.mrf.mxu3  ;;  %v5157_v7 = vor.u32 %v6448_v18, %v5156_v60  ;;  %v6508_v54 = vld [vmem:[#allocation4 + $0x2cc] sm:$0xf0]  ;;  %v5060_v60 = vld [vmem:[#allocation4 + $0x20] sm:$0xf] }
  0xe4   :  { %1822 = vmatpush.bf16.msra.mxu2 %v4865_v0  ;;  %v6956_v0 = vld [vmem:[%s7114_s2] sm:$0xf]  ;;  %v6424_v18 = vld [vmem:[#allocation4 + $0x2c] sm:$0xf0] }
  0xe5   :  { %1835 = vmatpush.bf16.msra.mxu3 %v4993_v4  ;;  %v4673_v4 = vor.u32 %v6323_v52, %v4670_v53  ;;  %v328_v8 = vperm.slane %v6956_v0, 0  ;;  %v5396_v53 = vld [vmem:[#allocation4 + $0x2c0] sm:$0xf]  ;;  %v329_v56 = vperm.slane %v6956_v0, 1 }
  0xe6   :  { %1797 = vmatpush.bf16.msra.mxu0 %v4593_v10  ;;  %v5140_v10 = vld [vmem:[#allocation4 + $0xc0] sm:$0xf] }
  0xe7   :  { %1810 = vmatpush.bf16.msra.mxu1 %v4721_v11  ;;  %v6444_v11 = vld [vmem:[#allocation4 + $0xcc] sm:$0xf0]  ;;  %v1491_v15 = vadd.f32 %v6933_v34, %v328_v8  ;;  %v5253_v34 = vor.u32 %v6472_v25, %v5252_v24  ;;  %v5188_v19 = vld [vmem:[#allocation4 + $0x120] sm:$0xf]  ;;  %v6478_v24 = vld [vmem:[#allocation4 + $0x1e4] sm:$0xf] }
  0xe8   :  { %1823 = vmatpush.bf16.msra.mxu2 %v4849_v12  ;;  %v5268_v12 = vld [vmem:[#allocation4 + $0x1c0] sm:$0xf]  ;;  %v5141_v14 = vor.u32 %v6444_v11, %v5140_v10  ;;  %v5286_v25 = vld [vmem:[#allocation4 + $0x1f0] sm:$0xf0] }
  0xe9   :  { %1836 = vmatpush.bf16.msra.mxu3 %v4977_v17  ;;  %v5269_v17 = vor.u32 %v6476_v13, %v5268_v12  ;;  %v5044_v8 = vld [vmem:[#allocation4] sm:$0xf]  ;;  %v6452_v12 = vld [vmem:[#allocation4 + $0x10c] sm:$0xf0]  ;;  %v6446_v13 = vld [vmem:[#allocation4 + $0xe4] sm:$0xf] }
  0xea   :  { %1798 = vmatpush.bf16.msra.mxu0 %v4577_v28  ;;  %v1504_v28 = vadd.f32 %v6935_v43, %v1491_v15  ;;  %v6464_v43 = vld [vmem:[#allocation4 + $0x16c] sm:$0xf0]  ;;  %v5172_v11 = vld [vmem:[#allocation4 + $0x100] sm:$0xf]  ;;  %v5158_v15 = vld [vmem:[#allocation4 + $0xf0] sm:$0xf0] }
  0xeb   :  { %1811 = vmatpush.bf16.msra.mxu1 %v4705_v31  ;;  %v6468_v31 = vld [vmem:[#allocation4 + $0x18c] sm:$0xf0] }
  0xec   :  { %1824 = vmatpush.bf16.msra.mxu2 %v4833_v32  ;;  %v5109_v32 = vor.u32 %v6436_v30, %v5108_v29  ;;  %v5161_v29 = vor.u32 %v6446_v13, %v5158_v15  ;;  %v5289_v30 = vor.u32 %v6478_v24, %v5286_v25  ;;  %v6426_v13 = vld [vmem:[#allocation4 + $0x44] sm:$0xf] }
  0xed   :  { %1837 = vmatpush.bf16.msra.mxu3 %v4961_v38  ;;  %v6458_v15 = vld [vmem:[#allocation4 + $0x144] sm:$0xf] }
  0xee   :  { %1799 = vmatpush.bf16.msra.mxu0 %v4561_v47  ;;  %v5221_v47 = vor.u32 %v6464_v43, %v5220_v36 }
  0xef   :  { %1812 = vmatpush.bf16.msra.mxu1 %v4689_v49  ;;  %v6428_v49 = vld [vmem:[#allocation4 + $0x4c] sm:$0xf0] }
  0xf0   :  { %1825 = vmatpush.bf16.msra.mxu2 %v4817_v50  ;;  %v5077_v57 = vor.u32 %v6428_v49, %v5076_v48  ;;  %v5129_v49 = vor.u32 %v6438_v39, %v5126_v42  ;;  %v6450_v39 = vld [vmem:[#allocation4 + $0x104] sm:$0xf] }
  0xf1   :  { %1838 = vmatpush.bf16.msra.mxu3 %v4945_v55  ;;  %v5397_v55 = vor.u32 %v6508_v54, %v5396_v53  ;;  %v5110_v53 = vld [vmem:[#allocation4 + $0x90] sm:$0xf0]  ;;  %v6466_v54 = vld [vmem:[#allocation4 + $0x184] sm:$0xf] }
  0xf2   :  { %1800 = vmatpush.bf16.msra.mxu0 %v4545_v1  ;;  %v6965_v33 = vpop.f32.mrf.mxu0 }
  0xf3   :  { %1813 = vmatpush.bf16.msra.mxu1 %v4673_v4  ;;  %v6968_v38 = vpop.f32.mrf.mxu1  ;;  %v6504_v4 = vld [vmem:[#allocation4 + $0x2ac] sm:$0xf0] }
  0xf4   :  { %1826 = vmatpush.bf16.msra.mxu2 %v4801_v5  ;;  %v5381_v5 = vor.u32 %v6504_v4, %v5380_v3  ;;  %v6462_v3 = vld [vmem:[#allocation4 + $0x164] sm:$0xf]  ;;  %v5222_v4 = vld [vmem:[#allocation4 + $0x170] sm:$0xf0] }
  0xf5   :  { %1839 = vmatpush.bf16.msra.mxu3 %v4929_v6  ;;  %1801 = vmatmul.bf16.vlgmr.msra.gmra.mxu0 %v6897_v20  ;;  %v5236_v20 = vld [vmem:[#allocation4 + $0x180] sm:$0xf]  ;;  %v1582_v6 = vadd.f32 %v6951_v27, %v329_v56  ;;  %v5365_v27 = vor.u32 %v6500_v23, %v5364_v21  ;;  %v6506_v21 = vld [vmem:[#allocation4 + $0x2c4] sm:$0xf]  ;;  %v5398_v23 = vld [vmem:[#allocation4 + $0x2d0] sm:$0xf0] }
  0xf6   :  { %2626 = vmatpush.bf16.msrb.mxu0 %v5157_v7  ;;  %1814 = vmatmul.bf16.vlgmr.msra.gmra.mxu1 %v6913_v40  ;;  %v1517_v40 = vadd.f32 %v6937_v58, %v1504_v28  ;;  %v5204_v58 = vld [vmem:[#allocation4 + $0x140] sm:$0xf]  ;;  %v5061_v7 = vor.u32 %v6424_v18, %v5060_v60  ;;  %v6430_v18 = vld [vmem:[#allocation4 + $0x64] sm:$0xf]  ;;  %v5401_v25 = vor.u32 %v6506_v21, %v5398_v23  ;;  %v5334_v21 = vld [vmem:[#allocation4 + $0x250] sm:$0xf0] }
  0xf7   :  { %2639 = vmatpush.bf16.msrb.mxu1 %v5285_v9  ;;  %1827 = vmatmul.bf16.vlgmr.msra.gmra.mxu2 %v6915_v41  ;;  %v5237_v41 = vor.u32 %v6468_v31, %v5236_v20  ;;  %v5205_v59 = vor.u32 %v6460_v51, %v5204_v58  ;;  %v6420_v9 = vld [vmem:[#allocation4 + $0xc] sm:$0xf0]  ;;  %v6442_v20 = vld [vmem:[#allocation4 + $0xc4] sm:$0xf]  ;;  %v5142_v31 = vld [vmem:[#allocation4 + $0xd0] sm:$0xf0] }
  0xf8   :  { %1840 = vmatmul.bf16.vlgmr.msra.gmra.mxu3 %v6911_v37  ;;  %v6432_v37 = vld [vmem:[#allocation4 + $0x6c] sm:$0xf0]  ;;  %v1530_v46 = vadd.f32 %v6939_v63, %v1517_v40  ;;  %2652 = vmatpush.bf16.msrb.mxu2 %v5413_v44  ;;  %v5045_v28 = vor.u32 %v6420_v9, %v5044_v8  ;;  %v5270_v40 = vld [vmem:[#allocation4 + $0x1d0] sm:$0xf0]  ;;  %v6470_v44 = vld [vmem:[#allocation4 + $0x1a4] sm:$0xf] }
  0xf9   :  { %v5093_v45 = vor.u32 %v6432_v37, %v5092_v35  ;;  %v6496_v35 = vld [vmem:[#allocation4 + $0x26c] sm:$0xf0]  ;;  %v6434_v51 = vld [vmem:[#allocation4 + $0x84] sm:$0xf]  ;;  %v5316_v56 = vld [vmem:[#allocation4 + $0x220] sm:$0xf] }
  0xfa   :  { %2627 = vmatpush.bf16.msrb.mxu0 %v5141_v14  ;;  %v6971_v50 = vpop.f32.mrf.mxu2  ;;  %v1596_v22 = vpop.f32.mrf.mxu0  ;;  %v1543_v63 = vadd.f32 %v6945_v61, %v1530_v46  ;;  %v5189_v61 = vor.u32 %v6456_v2, %v5188_v19  ;;  %v5332_v46 = vld [vmem:[#allocation4 + $0x240] sm:$0xf]  ;;  %v5113_v60 = vor.u32 %v6434_v51, %v5110_v53  ;;  %v5094_v2 = vld [vmem:[#allocation4 + $0x70] sm:$0xf0]  ;;  %v6481_v51 = vld [vmem:[#allocation4 + $0x1f4] sm:$0xf0] }
  0xfb   :  { %2640 = vmatpush.bf16.msrb.mxu1 %v5269_v17  ;;  %v6973_v52 = vpop.f32.mrf.mxu3  ;;  %v1609_v1 = vpop.f32.mrf.mxu1 }
  0xfc   :  { %2653 = vmatpush.bf16.msrb.mxu2 %v5397_v55  ;;  %v1556_v10 = vadd.f32 %v6947_v62, %v1543_v63  ;;  %v5238_v55 = vld [vmem:[#allocation4 + $0x190] sm:$0xf0] }
  0xfd   :  { %v5241_v19 = vor.u32 %v6466_v54, %v5238_v55  ;;  %v5366_v55 = vld [vmem:[#allocation4 + $0x290] sm:$0xf0] }
  0xfe   :  { %2628 = vmatpush.bf16.msrb.mxu0 %v5125_v26  ;;  %v1595_v26 = vadd.f32 %v6965_v33, %v1582_v6  ;;  %v1569_v62 = vadd.f32 %v6949_v16, %v1556_v10  ;;  %v5145_v16 = vor.u32 %v6442_v20, %v5142_v31  ;;  %v6484_v6 = vld [vmem:[#allocation4 + $0x20c] sm:$0xf0]  ;;  %v5414_v10 = vld [vmem:[#allocation4 + $0x2f0] sm:$0xf0] }
  0xff   :  { %2641 = vmatpush.bf16.msrb.mxu1 %v5253_v34  ;;  %v5173_v34 = vor.u32 %v6452_v12, %v5172_v11  ;;  %v5225_v12 = vor.u32 %v6462_v3, %v5222_v4  ;;  %v5190_v20 = vld [vmem:[#allocation4 + $0x130] sm:$0xf0]  ;;  %v6536_v3 = vld [vmem:[#allocation4 + $0x3ac] sm:$0xf0]  ;;  %v6494_v4 = vld [vmem:[#allocation4 + $0x264] sm:$0xf] }
 0x100   :  { %2654 = vmatpush.bf16.msrb.mxu2 %v5381_v5  ;;  %v1608_v37 = vadd.f32 %v6968_v38, %v1595_v26  ;;  %v6982_v33 = vpack.c.bf16 %v1569_v62, %v1569_v62  ;;  %v5300_v5 = vld [vmem:[#allocation4 + $0x200] sm:$0xf]  ;;  %v6422_v26 = vld [vmem:[#allocation4 + $0x24] sm:$0xf] }
 0x101   :  { %v5301_v9 = vor.u32 %v6484_v6, %v5300_v5  ;;  %v5350_v6 = vld [vmem:[#allocation4 + $0x270] sm:$0xf0] }
 0x102   :  { %2629 = vmatpush.bf16.msrb.mxu0 %v5109_v32  ;;  %v1622_v14 = vpop.f32.mrf.mxu2  ;;  %v6474_v32 = vld [vmem:[#allocation4 + $0x1c4] sm:$0xf]  ;;  %v1621_v38 = vadd.f32 %v6971_v50, %v1608_v37  ;;  %v5382_v37 = vld [vmem:[#allocation4 + $0x2b0] sm:$0xf0] }
 0x103   :  { %2642 = vmatpush.bf16.msrb.mxu1 %v5237_v41  ;;  %v1635_v17 = vpop.f32.mrf.mxu3  ;;  %v5348_v41 = vld [vmem:[#allocation4 + $0x260] sm:$0xf]  ;;  %v5273_v43 = vor.u32 %v6474_v32, %v5270_v40  ;;  %v5078_v14 = vld [vmem:[#allocation4 + $0x50] sm:$0xf0]  ;;  %v6544_v40 = vld [vmem:[#allocation4 + $0x3ec] sm:$0xf0] }
 0x104   :  { %2655 = vmatpush.bf16.msrb.mxu2 %v5365_v27  ;;  %v5349_v36 = vor.u32 %v6496_v35, %v5348_v41  ;;  %v1634_v22 = vadd.f32 %v6973_v52, %v1621_v38  ;;  %v5097_v52 = vor.u32 %v6430_v18, %v5094_v2  ;;  %v5206_v17 = vld [vmem:[#allocation4 + $0x150] sm:$0xf0]  ;;  %v5081_v27 = vor.u32 %v6426_v13, %v5078_v14  ;;  %v5540_v32 = vld [vmem:[#allocation4 + $0x3e0] sm:$0xf]  ;;  %v6502_v41 = vld [vmem:[#allocation4 + $0x2a4] sm:$0xf] }
 0x105   :  { %v5541_v35 = vor.u32 %v6544_v40, %v5540_v32  ;;  %v5385_v42 = vor.u32 %v6502_v41, %v5382_v37  ;;  %v5524_v38 = vld [vmem:[#allocation4 + $0x3c0] sm:$0xf]  ;;  %v6532_v14 = vld [vmem:[#allocation4 + $0x38c] sm:$0xf0]  ;;  %v5318_v40 = vld [vmem:[#allocation4 + $0x230] sm:$0xf0] }
 0x106   :  { %2630 = vmatpush.bf16.msrb.mxu0 %v5093_v45  ;;  %v5254_v45 = vld [vmem:[#allocation4 + $0x1b0] sm:$0xf0]  ;;  %v5508_v2 = vld [vmem:[#allocation4 + $0x3a0] sm:$0xf] }
 0x107   :  { %2643 = vmatpush.bf16.msrb.mxu1 %v5221_v47  ;;  %v6492_v47 = vld [vmem:[#allocation4 + $0x24c] sm:$0xf0]  ;;  %v5257_v58 = vor.u32 %v6470_v44, %v5254_v45  ;;  %v5174_v45 = vld [vmem:[#allocation4 + $0x110] sm:$0xf0]  ;;  %2665 = vmatpush.bf16.msrb.mxu3 %v5541_v35  ;;  %v5509_v5 = vor.u32 %v6536_v3, %v5508_v2  ;;  %v5492_v13 = vld [vmem:[#allocation4 + $0x380] sm:$0xf] }
 0x108   :  { %2656 = vmatpush.bf16.msrb.mxu2 %v5349_v36  ;;  %v5333_v48 = vor.u32 %v6492_v47, %v5332_v46  ;;  %v5164_v46 = vld [vmem:[#allocation4 + $0xe8] sm:$0xf]  ;;  %v6449_v47 = vld [vmem:[#allocation4 + $0xf4] sm:$0xf0] }
 0x109   :  { %v5100_v35 = vld [vmem:[#allocation4 + $0x68] sm:$0xf]  ;;  %v6425_v2 = vld [vmem:[#allocation4 + $0x34] sm:$0xf0] }
 0x10a   :  { %2631 = vmatpush.bf16.msrb.mxu0 %v5077_v57  ;;  %v6488_v57 = vld [vmem:[#allocation4 + $0x22c] sm:$0xf0]  ;;  %v5196_v3 = vld [vmem:[#allocation4 + $0x128] sm:$0xf] }
 0x10b   :  { %2644 = vmatpush.bf16.msrb.mxu1 %v5205_v59  ;;  %v5317_v63 = vor.u32 %v6488_v57, %v5316_v56 }
 0x10c   :  { %2657 = vmatpush.bf16.msrb.mxu2 %v5333_v48  ;;  %v6540_v48 = vld [vmem:[#allocation4 + $0x3cc] sm:$0xf0] }
 0x10d   :  { %v5525_v54 = vor.u32 %v6540_v48, %v5524_v38  ;;  %v5302_v48 = vld [vmem:[#allocation4 + $0x210] sm:$0xf0] }
 0x10e   :  { %2632 = vmatpush.bf16.msrb.mxu0 %v5061_v7  ;;  %v6510_v7 = vld [vmem:[#allocation4 + $0x2e4] sm:$0xf] }
 0x10f   :  { %2645 = vmatpush.bf16.msrb.mxu1 %v5189_v61  ;;  %v5417_v61 = vor.u32 %v6510_v7, %v5414_v10  ;;  %2666 = vmatpush.bf16.msrb.mxu3 %v5525_v54  ;;  %v5084_v54 = vld [vmem:[#allocation4 + $0x48] sm:$0xf] }
 0x110   :  { %2658 = vmatpush.bf16.msrb.mxu2 %v5317_v63  ;;  %v5177_v63 = vor.u32 %v6450_v39, %v5174_v45  ;;  %v6465_v39 = vld [vmem:[#allocation4 + $0x174] sm:$0xf0]  ;;  %v6524_v45 = vld [vmem:[#allocation4 + $0x34c] sm:$0xf0] }
 0x112   :  { %2633 = vmatpush.bf16.msrb.mxu0 %v5045_v28  ;;  %v1646_v59 = vpop.f32.mrf.mxu0 }
 0x113   :  { %2646 = vmatpush.bf16.msrb.mxu1 %v5173_v34  ;;  %v1647_v50 = vadd.f32 %v1646_v59, %v1634_v22  ;;  %v1659_v1 = vpop.f32.mrf.mxu1  ;;  %v5209_v34 = vor.u32 %v6458_v15, %v5206_v17  ;;  %v5165_v59 = vor.u32 %v6449_v47, %v5164_v46  ;;  %2667 = vmatpush.bf16.msrb.mxu3 %v5509_v5  ;;  %v6490_v15 = vld [vmem:[#allocation4 + $0x244] sm:$0xf] }
 0x114   :  { %2659 = vmatpush.bf16.msrb.mxu2 %v5301_v9  ;;  %v5353_v9 = vor.u32 %v6494_v4, %v5350_v6  ;;  %v5493_v17 = vor.u32 %v6532_v14, %v5492_v13  ;;  %v6482_v46 = vld [vmem:[#allocation4 + $0x204] sm:$0xf]  ;;  %v6457_v4 = vld [vmem:[#allocation4 + $0x134] sm:$0xf0]  ;;  %v5052_v13 = vld [vmem:[#allocation4 + $0x8] sm:$0xf] }
 0x115   :  { %2634 = vmatmul.bf16.vlgmr.msrb.gmra.mxu0 %v6982_v33  ;;  %v1660_v8 = vadd.f32 %v1659_v1, %v1647_v50  ;;  %v6445_v50 = vld [vmem:[#allocation4 + $0xd4] sm:$0xf0] }
 0x116   :  { %2678 = vmatpush.bf16.msra.mxu0 %v5161_v29  ;;  %v5062_v29 = vld [vmem:[#allocation4 + $0x30] sm:$0xf0]  ;;  %v6477_v1 = vld [vmem:[#allocation4 + $0x1d4] sm:$0xf0] }
 0x117   :  { %2691 = vmatpush.bf16.msra.mxu1 %v5289_v30  ;;  %v6987_v11 = vpack.c.bf16 %v1660_v8, %v1660_v8  ;;  %v6454_v30 = vld [vmem:[#allocation4 + $0x124] sm:$0xf]  ;;  %v5065_v36 = vor.u32 %v6422_v26, %v5062_v29  ;;  %v5132_v8 = vld [vmem:[#allocation4 + $0xa8] sm:$0xf]  ;;  %v6469_v29 = vld [vmem:[#allocation4 + $0x194] sm:$0xf0]  ;;  %2668 = vmatpush.bf16.msrb.mxu3 %v5493_v17  ;;  %v5197_v17 = vor.u32 %v6457_v4, %v5196_v3 }
 0x118   :  { %2704 = vmatpush.bf16.msra.mxu2 %v5417_v61  ;;  %v5193_v44 = vor.u32 %v6454_v30, %v5190_v20  ;;  %v5260_v61 = vld [vmem:[#allocation4 + $0x1a8] sm:$0xf]  ;;  %v5476_v30 = vld [vmem:[#allocation4 + $0x360] sm:$0xf]  ;;  %v6528_v20 = vld [vmem:[#allocation4 + $0x36c] sm:$0xf0] }
 0x119   :  { %2647 = vmatmul.bf16.vlgmr.msrb.gmra.mxu1 %v6987_v11  ;;  %v5477_v32 = vor.u32 %v6528_v20, %v5476_v30  ;;  %v6421_v14 = vld [vmem:[#allocation4 + $0x14] sm:$0xf0]  ;;  %v5420_v4 = vld [vmem:[#allocation4 + $0x2e8] sm:$0xf] }
 0x11a   :  { %2679 = vmatpush.bf16.msra.mxu0 %v5145_v16  ;;  %v6990_v24 = vpop.f32.mrf.mxu2  ;;  %v1648_v62 = vpop.f32.mrf.mxu0  ;;  %v6418_v16 = vld [vmem:[#allocation4 + $0x4] sm:$0xf] }
 0x11b   :  { %2692 = vmatpush.bf16.msra.mxu1 %v5273_v43  ;;  %v6992_v28 = vpop.f32.mrf.mxu3  ;;  %v1661_v31 = vpop.f32.mrf.mxu1  ;;  %v5046_v43 = vld [vmem:[#allocation4 + $0x10] sm:$0xf0]  ;;  %v6437_v62 = vld [vmem:[#allocation4 + $0x94] sm:$0xf0]  ;;  %2669 = vmatpush.bf16.msrb.mxu3 %v5477_v32 }
 0x11c   :  { %2705 = vmatpush.bf16.msra.mxu2 %v5401_v25  ;;  %v5049_v56 = vor.u32 %v6418_v16, %v5046_v43  ;;  %v5116_v25 = vld [vmem:[#allocation4 + $0x88] sm:$0xf]  ;;  %v6486_v31 = vld [vmem:[#allocation4 + $0x224] sm:$0xf]  ;;  %v6433_v16 = vld [vmem:[#allocation4 + $0x74] sm:$0xf0] }
 0x11d   :  { %v5117_v41 = vor.u32 %v6437_v62, %v5116_v25  ;;  %v5321_v37 = vor.u32 %v6486_v31, %v5318_v40  ;;  %v5228_v43 = vld [vmem:[#allocation4 + $0x168] sm:$0xf]  ;;  %v6447_v25 = vld [vmem:[#allocation4 + $0xec] sm:$0xf]  ;;  %v5526_v62 = vld [vmem:[#allocation4 + $0x3d0] sm:$0xf0]  ;;  %v5053_v31 = vor.u32 %v6421_v14, %v5052_v13 }
 0x11e   :  { %2680 = vmatpush.bf16.msra.mxu0 %v5129_v49  ;;  %v6498_v49 = vld [vmem:[#allocation4 + $0x284] sm:$0xf] }
 0x11f   :  { %2693 = vmatpush.bf16.msra.mxu1 %v5257_v58  ;;  %v5292_v58 = vld [vmem:[#allocation4 + $0x1e8] sm:$0xf]  ;;  %v5369_v22 = vor.u32 %v6498_v49, %v5366_v55  ;;  %v330_v49 = vperm.slane %v6956_v0, 2  ;;  %v6429_v55 = vld [vmem:[#allocation4 + $0x54] sm:$0xf0] }
 0x120   :  { %2706 = vmatpush.bf16.msra.mxu2 %v5385_v42  ;;  %v5293_v18 = vor.u32 %v6481_v51, %v5292_v58  ;;  %v5101_v58 = vor.u32 %v6433_v16, %v5100_v35  ;;  %v5305_v51 = vor.u32 %v6482_v46, %v5302_v48  ;;  %v5150_v16 = vld [vmem:[#allocation4 + $0xd8] sm:$0xf0]  ;;  %v5494_v48 = vld [vmem:[#allocation4 + $0x390] sm:$0xf0] }
 0x121   :  { %v1673_v5 = vadd.f32 %v6990_v24, %v330_v49 }
 0x122   :  { %2681 = vmatpush.bf16.msra.mxu0 %v5113_v60  ;;  %v1674_v53 = vpop.f32.mrf.mxu2  ;;  %v5148_v60 = vld [vmem:[#allocation4 + $0xc8] sm:$0xf] }
 0x123   :  { %2694 = vmatpush.bf16.msra.mxu1 %v5241_v19  ;;  %v1687_v57 = vpop.f32.mrf.mxu3  ;;  %v5276_v19 = vld [vmem:[#allocation4 + $0x1c8] sm:$0xf]  ;;  %v5149_v7 = vor.u32 %v6445_v50, %v5148_v60  ;;  %v5229_v53 = vor.u32 %v6465_v39, %v5228_v43  ;;  %v1686_v24 = vadd.f32 %v6992_v28, %v1673_v5  ;;  %v6475_v28 = vld [vmem:[#allocation4 + $0x1cc] sm:$0xf]  ;;  %v5278_v43 = vld [vmem:[#allocation4 + $0x1d8] sm:$0xf0] }
 0x124   :  { %2707 = vmatpush.bf16.msra.mxu2 %v5369_v22  ;;  %v5277_v10 = vor.u32 %v6477_v1, %v5276_v19  ;;  %v6461_v57 = vld [vmem:[#allocation4 + $0x154] sm:$0xf0]  ;;  %v5444_v22 = vld [vmem:[#allocation4 + $0x320] sm:$0xf]  ;;  %v5068_v50 = vld [vmem:[#allocation4 + $0x28] sm:$0xf] }
 0x125   :  { %v6534_v39 = vld [vmem:[#allocation4 + $0x3a4] sm:$0xf]  ;;  %v6513_v5 = vld [vmem:[#allocation4 + $0x2f4] sm:$0xf0] }
 0x126   :  { %2682 = vmatpush.bf16.msra.mxu0 %v5097_v52  ;;  %v6441_v52 = vld [vmem:[#allocation4 + $0xb4] sm:$0xf0] }
 0x127   :  { %2695 = vmatpush.bf16.msra.mxu1 %v5225_v12  ;;  %v6473_v12 = vld [vmem:[#allocation4 + $0x1b4] sm:$0xf0]  ;;  %v5133_v23 = vor.u32 %v6441_v52, %v5132_v8  ;;  %v6516_v8 = vld [vmem:[#allocation4 + $0x30c] sm:$0xf0] }
 0x128   :  { %2708 = vmatpush.bf16.msra.mxu2 %v5353_v9  ;;  %v5261_v26 = vor.u32 %v6473_v12, %v5260_v61  ;;  %v6542_v9 = vld [vmem:[#allocation4 + $0x3e4] sm:$0xf]  ;;  %v5542_v61 = vld [vmem:[#allocation4 + $0x3f0] sm:$0xf0]  ;;  %v5069_v12 = vor.u32 %v6425_v2, %v5068_v50 }
 0x129   :  { %v6526_v50 = vld [vmem:[#allocation4 + $0x364] sm:$0xf] }
 0x12a   :  { %2683 = vmatpush.bf16.msra.mxu0 %v5081_v27  ;;  %v5337_v27 = vor.u32 %v6490_v15, %v5334_v21  ;;  %v5545_v15 = vor.u32 %v6542_v9, %v5542_v61  ;;  %v5180_v21 = vld [vmem:[#allocation4 + $0x108] sm:$0xf]  ;;  %v6463_v9 = vld [vmem:[#allocation4 + $0x16c] sm:$0xf]  ;;  %v6522_v61 = vld [vmem:[#allocation4 + $0x344] sm:$0xf] }
 0x12b   :  { %2696 = vmatpush.bf16.msra.mxu1 %v5209_v34  ;;  %v5244_v34 = vld [vmem:[#allocation4 + $0x188] sm:$0xf] }
 0x12c   :  { %2709 = vmatpush.bf16.msra.mxu2 %v5337_v27  ;;  %v5166_v27 = vld [vmem:[#allocation4 + $0xf8] sm:$0xf0] }
 0x12e   :  { %2684 = vmatpush.bf16.msra.mxu0 %v5065_v36  ;;  %v5245_v36 = vor.u32 %v6469_v29, %v5244_v34  ;;  %v6479_v34 = vld [vmem:[#allocation4 + $0x1ec] sm:$0xf]  ;;  %v5294_v29 = vld [vmem:[#allocation4 + $0x1f8] sm:$0xf0] }
 0x12f   :  { %2697 = vmatpush.bf16.msra.mxu1 %v5193_v44  ;;  %v5460_v44 = vld [vmem:[#allocation4 + $0x340] sm:$0xf] }
 0x130   :  { %2710 = vmatpush.bf16.msra.mxu2 %v5321_v37  ;;  %v5461_v38 = vor.u32 %v6524_v45, %v5460_v44  ;;  %v5297_v37 = vor.u32 %v6479_v34, %v5294_v29  ;;  %v5510_v44 = vld [vmem:[#allocation4 + $0x3b0] sm:$0xf0]  ;;  %v5214_v34 = vld [vmem:[#allocation4 + $0x158] sm:$0xf0]  ;;  %v6518_v29 = vld [vmem:[#allocation4 + $0x324] sm:$0xf] }
 0x131   :  { %v5513_v45 = vor.u32 %v6534_v39, %v5510_v44  ;;  %v5198_v39 = vld [vmem:[#allocation4 + $0x138] sm:$0xf0] }
 0x132   :  { %2685 = vmatpush.bf16.msra.mxu0 %v5049_v56  ;;  %v6996_v42 = vpop.f32.mrf.mxu0  ;;  %v5212_v56 = vld [vmem:[#allocation4 + $0x148] sm:$0xf]  ;;  %2670 = vmatpush.bf16.msrb.mxu3 %v5461_v38  ;;  %v6530_v38 = vld [vmem:[#allocation4 + $0x384] sm:$0xf] }
 0x133   :  { %2698 = vmatpush.bf16.msra.mxu1 %v5177_v63  ;;  %v6998_v47 = vpop.f32.mrf.mxu1  ;;  %v6520_v63 = vld [vmem:[#allocation4 + $0x32c] sm:$0xf0]  ;;  %v5213_v1 = vor.u32 %v6461_v57, %v5212_v56  ;;  %v1699_v35 = vadd.f32 %v6996_v42, %v1686_v24  ;;  %v6439_v42 = vld [vmem:[#allocation4 + $0xac] sm:$0xf] }
 0x134   :  { %2711 = vmatpush.bf16.msra.mxu2 %v5305_v51  ;;  %v5445_v60 = vor.u32 %v6520_v63, %v5444_v22  ;;  %v5134_v51 = vld [vmem:[#allocation4 + $0xb8] sm:$0xf0]  ;;  %v6435_v63 = vld [vmem:[#allocation4 + $0x8c] sm:$0xf] }
 0x135   :  { %2686 = vmatmul.bf16.vlgmr.msra.gmra.mxu0 %v6982_v33  ;;  %v1712_v49 = vadd.f32 %v6998_v47, %v1699_v35  ;;  %v5137_v56 = vor.u32 %v6439_v42, %v5134_v51  ;;  %v5118_v47 = vld [vmem:[#allocation4 + $0x98] sm:$0xf0]  ;;  %v5372_v42 = vld [vmem:[#allocation4 + $0x288] sm:$0xf] }
 0x136   :  { %2730 = vmatpush.bf16.msrb.mxu0 %v5165_v59  ;;  %2699 = vmatmul.bf16.vlgmr.msra.gmra.mxu1 %v6987_v11  ;;  %v5121_v3 = vor.u32 %v6435_v63, %v5118_v47 }
 0x137   :  { %2743 = vmatpush.bf16.msrb.mxu1 %v5293_v18  ;;  %v5085_v18 = vor.u32 %v6429_v55, %v5084_v54  ;;  %2671 = vmatpush.bf16.msrb.mxu3 %v5445_v60  ;;  %v6471_v54 = vld [vmem:[#allocation4 + $0x1ac] sm:$0xf]  ;;  %v5262_v55 = vld [vmem:[#allocation4 + $0x1b8] sm:$0xf0] }
 0x138   :  { %v5265_v22 = vor.u32 %v6471_v54, %v5262_v55  ;;  %v6467_v60 = vld [vmem:[#allocation4 + $0x18c] sm:$0xf]  ;;  %v5054_v55 = vld [vmem:[#allocation4 + $0x18] sm:$0xf0] }
 0x139   :  { %v6419_v54 = vld [vmem:[#allocation4 + $0xc] sm:$0xf] }
 0x13a   :  { %2731 = vmatpush.bf16.msrb.mxu0 %v5149_v7  ;;  %v7001_v59 = vpop.f32.mrf.mxu2  ;;  %v1700_v6 = vpop.f32.mrf.mxu0  ;;  %v5428_v7 = vld [vmem:[#allocation4 + $0x300] sm:$0xf]  ;;  %v5057_v63 = vor.u32 %v6419_v54, %v5054_v55  ;;  %v5342_v54 = vld [vmem:[#allocation4 + $0x258] sm:$0xf0]  ;;  %v5500_v55 = vld [vmem:[#allocation4 + $0x388] sm:$0xf] }
 0x13b   :  { %2744 = vmatpush.bf16.msrb.mxu1 %v5277_v10  ;;  %v7003_v19 = vpop.f32.mrf.mxu3  ;;  %v1713_v10 = vpop.f32.mrf.mxu1  ;;  %v5429_v52 = vor.u32 %v6516_v8, %v5428_v7  ;;  %v1725_v57 = vadd.f32 %v7001_v59, %v1712_v49  ;;  %v6431_v8 = vld [vmem:[#allocation4 + $0x6c] sm:$0xf]  ;;  %v5102_v59 = vld [vmem:[#allocation4 + $0x78] sm:$0xf0] }
 0x13d   :  { %2672 = vmatpush.bf16.msrb.mxu3 %v5429_v52  ;;  %v1738_v6 = vadd.f32 %v7003_v19, %v1725_v57  ;;  %v5230_v52 = vld [vmem:[#allocation4 + $0x178] sm:$0xf0] }
 0x13e   :  { %2732 = vmatpush.bf16.msrb.mxu0 %v5133_v23  ;;  %v6453_v23 = vld [vmem:[#allocation4 + $0x114] sm:$0xf0]  ;;  %v5233_v24 = vor.u32 %v6463_v9, %v5230_v52  ;;  %v5182_v57 = vld [vmem:[#allocation4 + $0x118] sm:$0xf0] }
 0x13f   :  { %2745 = vmatpush.bf16.msrb.mxu1 %v5261_v26  ;;  %v6538_v26 = vld [vmem:[#allocation4 + $0x3c4] sm:$0xf]  ;;  %v5181_v40 = vor.u32 %v6453_v23, %v5180_v21  ;;  %v5404_v23 = vld [vmem:[#allocation4 + $0x2c8] sm:$0xf]  ;;  %v6485_v52 = vld [vmem:[#allocation4 + $0x214] sm:$0xf0] }
 0x140   :  { %v5529_v20 = vor.u32 %v6538_v26, %v5526_v62  ;;  %v5086_v26 = vld [vmem:[#allocation4 + $0x58] sm:$0xf0]  ;;  %v6459_v62 = vld [vmem:[#allocation4 + $0x14c] sm:$0xf] }
 0x141   :  { %2717 = vmatpush.bf16.msra.mxu3 %v5545_v15  ;;  %v5421_v15 = vor.u32 %v6513_v5, %v5420_v4  ;;  %v5217_v35 = vor.u32 %v6459_v62, %v5214_v34  ;;  %v5340_v4 = vld [vmem:[#allocation4 + $0x248] sm:$0xf]  ;;  %v6493_v5 = vld [vmem:[#allocation4 + $0x254] sm:$0xf0]  ;;  %v5390_v62 = vld [vmem:[#allocation4 + $0x2b8] sm:$0xf0] }
 0x142   :  { %2733 = vmatpush.bf16.msrb.mxu0 %v5117_v41  ;;  %v1726_v30 = vpop.f32.mrf.mxu2  ;;  %v5169_v41 = vor.u32 %v6447_v25, %v5166_v27  ;;  %v6509_v25 = vld [vmem:[#allocation4 + $0x2d4] sm:$0xf0]  ;;  %v6427_v27 = vld [vmem:[#allocation4 + $0x4c] sm:$0xf] }
 0x143   :  { %2746 = vmatpush.bf16.msrb.mxu1 %v5245_v36  ;;  %v1739_v32 = vpop.f32.mrf.mxu3  ;;  %v6443_v36 = vld [vmem:[#allocation4 + $0xcc] sm:$0xf]  ;;  %v5446_v30 = vld [vmem:[#allocation4 + $0x330] sm:$0xf0] }
 0x144   :  { %v5153_v46 = vor.u32 %v6443_v36, %v5150_v16  ;;  %v5089_v32 = vor.u32 %v6427_v27, %v5086_v26  ;;  %v6423_v16 = vld [vmem:[#allocation4 + $0x2c] sm:$0xf] }
 0x145   :  { %2718 = vmatpush.bf16.msra.mxu3 %v5529_v20  ;;  %v5449_v20 = vor.u32 %v6518_v29, %v5446_v30  ;;  %v6503_v26 = vld [vmem:[#allocation4 + $0x2ac] sm:$0xf] }
 0x146   :  { %2734 = vmatpush.bf16.msrb.mxu0 %v5101_v58  ;;  %v5281_v58 = vor.u32 %v6475_v28, %v5278_v43  ;;  %v5070_v28 = vld [vmem:[#allocation4 + $0x38] sm:$0xf0]  ;;  %v6455_v43 = vld [vmem:[#allocation4 + $0x12c] sm:$0xf] }
 0x147   :  { %2747 = vmatpush.bf16.msrb.mxu1 %v5229_v53  ;;  %v5497_v53 = vor.u32 %v6530_v38, %v5494_v48  ;;  %v5073_v49 = vor.u32 %v6423_v16, %v5070_v28  ;;  %v5201_v51 = vor.u32 %v6455_v43, %v5198_v39  ;;  %v5532_v28 = vld [vmem:[#allocation4 + $0x3c8] sm:$0xf]  ;;  %v6541_v43 = vld [vmem:[#allocation4 + $0x3d4] sm:$0xf0] }
 0x149   :  { %2719 = vmatpush.bf16.msra.mxu3 %v5513_v45  ;;  %v6514_v45 = vld [vmem:[#allocation4 + $0x304] sm:$0xf] }
 0x14a   :  { %2735 = vmatpush.bf16.msrb.mxu0 %v5085_v18  ;;  %v5246_v18 = vld [vmem:[#allocation4 + $0x198] sm:$0xf0] }
 0x14b   :  { %2748 = vmatpush.bf16.msrb.mxu1 %v5213_v1  ;;  %v5478_v1 = vld [vmem:[#allocation4 + $0x370] sm:$0xf0]  ;;  %v5249_v7 = vor.u32 %v6467_v60, %v5246_v18 }
 0x14c   :  { %v5481_v2 = vor.u32 %v6526_v50, %v5478_v1  ;;  %v5356_v50 = vld [vmem:[#allocation4 + $0x268] sm:$0xf]  ;;  %v6497_v1 = vld [vmem:[#allocation4 + $0x274] sm:$0xf0] }
 0x14d   :  { %2720 = vmatpush.bf16.msra.mxu3 %v5497_v53  ;;  %v6501_v53 = vld [vmem:[#allocation4 + $0x294] sm:$0xf0] }
 0x14e   :  { %2736 = vmatpush.bf16.msrb.mxu0 %v5069_v12  ;;  %v5462_v12 = vld [vmem:[#allocation4 + $0x350] sm:$0xf0] }
 0x14f   :  { %2749 = vmatpush.bf16.msrb.mxu1 %v5197_v17  ;;  %v5465_v14 = vor.u32 %v6522_v61, %v5462_v12  ;;  %v5105_v17 = vor.u32 %v6431_v8, %v5102_v59  ;;  %v5324_v8 = vld [vmem:[#allocation4 + $0x228] sm:$0xf]  ;;  %v6489_v59 = vld [vmem:[#allocation4 + $0x234] sm:$0xf0]  ;;  %v6511_v61 = vld [vmem:[#allocation4 + $0x2ec] sm:$0xf] }
 0x150   :  { %v5422_v12 = vld [vmem:[#allocation4 + $0x2f8] sm:$0xf0] }
 0x151   :  { %2721 = vmatpush.bf16.msra.mxu3 %v5481_v2  ;;  %v331_v2 = vperm.slane %v6956_v0, 3  ;;  %v5325_v0 = vor.u32 %v6489_v59, %v5324_v8  ;;  %v5452_v59 = vld [vmem:[#allocation4 + $0x328] sm:$0xf] }
 0x152   :  { %2737 = vmatpush.bf16.msrb.mxu0 %v5053_v31  ;;  %v1750_v10 = vpop.f32.mrf.mxu0  ;;  %v5405_v31 = vor.u32 %v6509_v25, %v5404_v23  ;;  %v6507_v23 = vld [vmem:[#allocation4 + $0x2cc] sm:$0xf] }
 0x153   :  { %2750 = vmatpush.bf16.msrb.mxu1 %v5181_v40  ;;  %v1751_v13 = vadd.f32 %v1750_v10, %v1738_v6  ;;  %v7013_v21 = vpop.f32.mrf.mxu1  ;;  %v5388_v40 = vld [vmem:[#allocation4 + $0x2a8] sm:$0xf] }
 0x154   :  { %v1764_v6 = vadd.f32 %v7013_v21, %v331_v2  ;;  %v5308_v10 = vld [vmem:[#allocation4 + $0x208] sm:$0xf]  ;;  %v5425_v21 = vor.u32 %v6511_v61, %v5422_v12  ;;  %v6483_v2 = vld [vmem:[#allocation4 + $0x20c] sm:$0xf]  ;;  %v6517_v61 = vld [vmem:[#allocation4 + $0x314] sm:$0xf0] }
 0x155   :  { %2738 = vmatmul.bf16.vlgmr.msrb.gmra.mxu0 %v6982_v33  ;;  %v7015_v19 = vpack.c.bf16 %v1751_v13, %v1751_v13  ;;  %2722 = vmatpush.bf16.msra.mxu3 %v5465_v14  ;;  %v6543_v12 = vld [vmem:[#allocation4 + $0x3ec] sm:$0xf] }
 0x156   :  { %2782 = vmatpush.bf16.msra.mxu0 %v5169_v41  ;;  %2751 = vmatmul.bf16.vlgmr.msrb.gmra.mxu1 %v6987_v11  ;;  %v6505_v41 = vld [vmem:[#allocation4 + $0x2b4] sm:$0xf0] }
 0x157   :  { %2795 = vmatpush.bf16.msra.mxu1 %v5297_v37  ;;  %2660 = vmatmul.bf16.vlgmr.msrb.gmra.mxu2 %v7015_v19  ;;  %v5389_v48 = vor.u32 %v6505_v41, %v5388_v40  ;;  %v5393_v41 = vor.u32 %v6503_v26, %v5390_v62  ;;  %v6535_v26 = vld [vmem:[#allocation4 + $0x3ac] sm:$0xf]  ;;  %v5518_v62 = vld [vmem:[#allocation4 + $0x3b8] sm:$0xf0] }
 0x158   :  { %2756 = vmatpush.bf16.msrb.mxu2 %v5421_v15 }
 0x159   :  { %2723 = vmatpush.bf16.msra.mxu3 %v5449_v20  ;;  %v5548_v20 = vld [vmem:[#allocation4 + $0x3e8] sm:$0xf] }
 0x15a   :  { %2783 = vmatpush.bf16.msra.mxu0 %v5153_v46  ;;  %v1776_v37 = vpop.f32.mrf.mxu2  ;;  %v1752_v44 = vpop.f32.mrf.mxu0  ;;  %v5430_v46 = vld [vmem:[#allocation4 + $0x310] sm:$0xf0] }
 0x15b   :  { %2796 = vmatpush.bf16.msra.mxu1 %v5281_v58  ;;  %v1789_v36 = vpop.f32.mrf.mxu3  ;;  %v5433_v38 = vor.u32 %v6514_v45, %v5430_v46  ;;  %v1765_v58 = vpop.f32.mrf.mxu1  ;;  %v1777_v9 = vadd.f32 %v1776_v37, %v1764_v6  ;;  %v6499_v37 = vld [vmem:[#allocation4 + $0x28c] sm:$0xf]  ;;  %v5533_v45 = vor.u32 %v6541_v43, %v5532_v28  ;;  %v6576_v28 = vld [vmem:[#allocation6 + $0xec] sm:$0xf0] }
 0x15c   :  { %2757 = vmatpush.bf16.msrb.mxu2 %v5405_v31  ;;  %v6545_v31 = vld [vmem:[#allocation4 + $0x3f4] sm:$0xf0]  ;;  %v6495_v46 = vld [vmem:[#allocation4 + $0x26c] sm:$0xf] }
 0x15d   :  { %2724 = vmatpush.bf16.msra.mxu3 %v5433_v38  ;;  %v1790_v13 = vadd.f32 %v1789_v36, %v1777_v9  ;;  %v5374_v36 = vld [vmem:[#allocation4 + $0x298] sm:$0xf0]  ;;  %v6537_v58 = vld [vmem:[#allocation4 + $0x3b4] sm:$0xf0] }
 0x15e   :  { %2784 = vmatpush.bf16.msra.mxu0 %v5137_v56  ;;  %v6451_v56 = vld [vmem:[#allocation4 + $0x10c] sm:$0xf]  ;;  %v5377_v39 = vor.u32 %v6499_v37, %v5374_v36  ;;  %v5358_v38 = vld [vmem:[#allocation4 + $0x278] sm:$0xf0]  ;;  %v6521_v9 = vld [vmem:[#allocation4 + $0x334] sm:$0xf0] }
 0x15f   :  { %2797 = vmatpush.bf16.msra.mxu1 %v5265_v22  ;;  %v5373_v22 = vor.u32 %v6501_v53, %v5372_v42  ;;  %v5185_v47 = vor.u32 %v6451_v56, %v5182_v57  ;;  %v5361_v42 = vor.u32 %v6495_v46, %v5358_v38  ;;  %v6491_v53 = vld [vmem:[#allocation4 + $0x24c] sm:$0xf]  ;;  %v6533_v56 = vld [vmem:[#allocation4 + $0x394] sm:$0xf0]  ;;  %v5470_v37 = vld [vmem:[#allocation4 + $0x358] sm:$0xf0] }
 0x160   :  { %2758 = vmatpush.bf16.msrb.mxu2 %v5389_v48  ;;  %v5345_v57 = vor.u32 %v6491_v53, %v5342_v54  ;;  %v5668_v36 = vld [vmem:[#allocation6 + $0xe0] sm:$0xf]  ;;  %v6519_v38 = vld [vmem:[#allocation4 + $0x32c] sm:$0xf] }
 0x161   :  { %v6515_v54 = vld [vmem:[#allocation4 + $0x30c] sm:$0xf] }
 0x162   :  { %2785 = vmatpush.bf16.msra.mxu0 %v5121_v3  ;;  %v1778_v60 = vpop.f32.mrf.mxu2  ;;  %v5357_v3 = vor.u32 %v6497_v1, %v5356_v50 }
 0x163   :  { %2798 = vmatpush.bf16.msra.mxu1 %v5249_v7  ;;  %v1791_v18 = vpop.f32.mrf.mxu3  ;;  %v5341_v7 = vor.u32 %v6493_v5, %v5340_v4  ;;  %v5484_v60 = vld [vmem:[#allocation4 + $0x368] sm:$0xf]  ;;  %v6525_v5 = vld [vmem:[#allocation4 + $0x354] sm:$0xf0] }
 0x164   :  { %2759 = vmatpush.bf16.msrb.mxu2 %v5373_v22  ;;  %v5501_v22 = vor.u32 %v6533_v56, %v5500_v55  ;;  %v6529_v18 = vld [vmem:[#allocation4 + $0x374] sm:$0xf0]  ;;  %v5468_v4 = vld [vmem:[#allocation4 + $0x348] sm:$0xf]  ;;  %v5438_v55 = vld [vmem:[#allocation4 + $0x318] sm:$0xf0] }
 0x165   :  { %v5485_v1 = vor.u32 %v6529_v18, %v5484_v60  ;;  %v5469_v8 = vor.u32 %v6525_v5, %v5468_v4  ;;  %v5636_v56 = vld [vmem:[#allocation6 + $0xa0] sm:$0xf] }
 0x166   :  { %2786 = vmatpush.bf16.msra.mxu0 %v5105_v17  ;;  %v5796_v4 = vld [vmem:[#allocation6 + $0x1e0] sm:$0xf] }
 0x167   :  { %2799 = vmatpush.bf16.msra.mxu1 %v5233_v24  ;;  %2712 = vmatmul.bf16.vlgmr.msra.gmra.mxu2 %v7015_v19 }
 0x168   :  { %2760 = vmatpush.bf16.msrb.mxu2 %v5357_v3  ;;  %v5310_v3 = vld [vmem:[#allocation4 + $0x218] sm:$0xf0] }
 0x16a   :  { %2787 = vmatpush.bf16.msra.mxu0 %v5089_v32 }
 0x16b   :  { %2800 = vmatpush.bf16.msra.mxu1 %v5217_v35  ;;  %v5549_v35 = vor.u32 %v6545_v31, %v5548_v20  ;;  %v6527_v31 = vld [vmem:[#allocation4 + $0x36c] sm:$0xf] }
 0x16c   :  { %2761 = vmatpush.bf16.msrb.mxu2 %v5341_v7  ;;  %v5313_v7 = vor.u32 %v6483_v2, %v5310_v3  ;;  %v5604_v2 = vld [vmem:[#allocation6 + $0x60] sm:$0xf]  ;;  %v6560_v3 = vld [vmem:[#allocation6 + $0x6c] sm:$0xf0] }
 0x16d   :  { %v5605_v5 = vor.u32 %v6560_v3, %v5604_v2  ;;  %v5684_v2 = vld [vmem:[#allocation6 + $0x100] sm:$0xf]  ;;  %v6580_v3 = vld [vmem:[#allocation6 + $0x10c] sm:$0xf0] }
 0x16e   :  { %2788 = vmatpush.bf16.msra.mxu0 %v5073_v49  ;;  %v5516_v49 = vld [vmem:[#allocation4 + $0x3a8] sm:$0xf] }
 0x16f   :  { %2801 = vmatpush.bf16.msra.mxu1 %v5201_v51  ;;  %v5517_v51 = vor.u32 %v6537_v58, %v5516_v49  ;;  %v5652_v58 = vld [vmem:[#allocation6 + $0xc0] sm:$0xf] }
 0x170   :  { %2762 = vmatpush.bf16.msrb.mxu2 %v5325_v0  ;;  %v7031_v0 = vld [vmem:[%s7116_s4] sm:$0xf] }
 0x172   :  { %2789 = vmatpush.bf16.msra.mxu0 %v5057_v63  ;;  %v1802_v14 = vpop.f32.mrf.mxu0  ;;  %v6487_v63 = vld [vmem:[#allocation4 + $0x22c] sm:$0xf] }
 0x173   :  { %2802 = vmatpush.bf16.msra.mxu1 %v5185_v47  ;;  %v1815_v15 = vpop.f32.mrf.mxu1  ;;  %v1803_v17 = vadd.f32 %v1802_v14, %v1790_v13  ;;  %v5326_v47 = vld [vmem:[#allocation4 + $0x238] sm:$0xf0]  ;;  %v1978_v14 = vperm.slane %v7031_v0, 0 }
 0x174   :  { %v5329_v50 = vor.u32 %v6487_v63, %v5326_v47  ;;  %v5550_v13 = vld [vmem:[#allocation4 + $0x3f8] sm:$0xf0]  ;;  %v5620_v63 = vld [vmem:[#allocation6 + $0x80] sm:$0xf]  ;;  %v6564_v47 = vld [vmem:[#allocation6 + $0x8c] sm:$0xf0] }
 0x175   :  { %2790 = vmatmul.bf16.vlgmr.msra.gmra.mxu0 %v6982_v33  ;;  %v5309_v33 = vor.u32 %v6485_v52, %v5308_v10  ;;  %v1816_v25 = vadd.f32 %v1815_v15, %v1803_v17  ;;  %v5453_v10 = vor.u32 %v6521_v9, %v5452_v59  ;;  %v5436_v52 = vld [vmem:[#allocation4 + $0x308] sm:$0xf]  ;;  %v5553_v17 = vor.u32 %v6543_v12, %v5550_v13  ;;  %v6556_v59 = vld [vmem:[#allocation6 + $0x4c] sm:$0xf0]  ;;  %v5780_v9 = vld [vmem:[#allocation6 + $0x1c0] sm:$0xf] }
 0x176   :  { %2803 = vmatmul.bf16.vlgmr.msra.gmra.mxu1 %v6987_v11  ;;  %v5406_v11 = vld [vmem:[#allocation4 + $0x2d8] sm:$0xf0]  ;;  %v5572_v12 = vld [vmem:[#allocation6 + $0x20] sm:$0xf]  ;;  %v6552_v13 = vld [vmem:[#allocation6 + $0x2c] sm:$0xf0] }
 0x177   :  { %2763 = vmatpush.bf16.msrb.mxu2 %v5309_v33  ;;  %v5409_v24 = vor.u32 %v6507_v23, %v5406_v11  ;;  %v5437_v33 = vor.u32 %v6517_v61, %v5436_v52  ;;  %v5534_v23 = vld [vmem:[#allocation4 + $0x3d8] sm:$0xf0]  ;;  %v6604_v52 = vld [vmem:[#allocation6 + $0x1cc] sm:$0xf0] }
 0x178   :  { %v5781_v61 = vor.u32 %v6604_v52, %v5780_v9  ;;  %v6606_v9 = vld [vmem:[#allocation6 + $0x1e4] sm:$0xf] }
 0x17a   :  { %v1828_v27 = vpop.f32.mrf.mxu2  ;;  %v1804_v30 = vpop.f32.mrf.mxu0  ;;  %2764 = vmatmul.bf16.vlgmr.msrb.gmra.mxu2 %v7015_v19 }
 0x17b   :  { %2808 = vmatpush.bf16.msra.mxu2 %v5425_v21  ;;  %v1829_v34 = vadd.f32 %v1828_v27, %v1816_v25  ;;  %v1841_v29 = vpop.f32.mrf.mxu3  ;;  %v1817_v32 = vpop.f32.mrf.mxu1  ;;  %v6539_v21 = vld [vmem:[#allocation4 + $0x3cc] sm:$0xf] }
 0x17c   :  { %v5537_v27 = vor.u32 %v6539_v21, %v5534_v23  ;;  %v5486_v32 = vld [vmem:[#allocation4 + $0x378] sm:$0xf0]  ;;  %v5556_v21 = vld [vmem:[#allocation6] sm:$0xf]  ;;  %v6548_v23 = vld [vmem:[#allocation6 + $0xc] sm:$0xf0] }
 0x17d   :  { %v1842_v40 = vadd.f32 %v1841_v29, %v1829_v34  ;;  %v6531_v34 = vld [vmem:[#allocation4 + $0x38c] sm:$0xf]  ;;  %v5502_v29 = vld [vmem:[#allocation4 + $0x398] sm:$0xf0] }
 0x17e   :  { %v5505_v20 = vor.u32 %v6531_v34, %v5502_v29 }
 0x17f   :  { %2809 = vmatpush.bf16.msra.mxu2 %v5409_v24  ;;  %v7024_v16 = vpack.c.bf16 %v1842_v40, %v1842_v40  ;;  %v1979_v40 = vperm.slane %v7031_v0, 1 }
 0x181   :  { %2673 = vmatmul.bf16.vlgmr.msrb.gmra.mxu3 %v7024_v16 }
 0x182   :  { %2769 = vmatpush.bf16.msrb.mxu3 %v5549_v35  ;;  %v1830_v44 = vpop.f32.mrf.mxu2  ;;  %v6523_v35 = vld [vmem:[#allocation4 + $0x34c] sm:$0xf] }
 0x183   :  { %2810 = vmatpush.bf16.msra.mxu2 %v5393_v41  ;;  %v1843_v48 = vpop.f32.mrf.mxu3  ;;  %v5489_v41 = vor.u32 %v6527_v31, %v5486_v32  ;;  %v5473_v46 = vor.u32 %v6523_v35, %v5470_v37  ;;  %v5732_v31 = vld [vmem:[#allocation6 + $0x160] sm:$0xf]  ;;  %v6592_v32 = vld [vmem:[#allocation6 + $0x16c] sm:$0xf0] }
 0x184   :  { %v5454_v48 = vld [vmem:[#allocation4 + $0x338] sm:$0xf0]  ;;  %v5733_v35 = vor.u32 %v6592_v32, %v5732_v31  ;;  %v6640_v37 = vld [vmem:[#allocation6 + $0x2ec] sm:$0xf0]  ;;  %v1981_v31 = vperm.slane %v7031_v0, 3 }
 0x185   :  { %v5457_v53 = vor.u32 %v6519_v38, %v5454_v48  ;;  %v6636_v48 = vld [vmem:[#allocation6 + $0x2cc] sm:$0xf0]  ;;  %v5828_v32 = vld [vmem:[#allocation6 + $0x220] sm:$0xf] }
 0x186   :  { %2770 = vmatpush.bf16.msrb.mxu3 %v5533_v45 }
 0x187   :  { %2811 = vmatpush.bf16.msra.mxu2 %v5377_v39  ;;  %v5669_v39 = vor.u32 %v6576_v28, %v5668_v36  ;;  %v6570_v36 = vld [vmem:[#allocation6 + $0xc4] sm:$0xf]  ;;  %v5654_v28 = vld [vmem:[#allocation6 + $0xd0] sm:$0xf0] }
 0x189   :  { %3615 = vmatpush.bf16.msrb.mxu0 %v5669_v39  ;;  %v5657_v39 = vor.u32 %v6570_v36, %v5654_v28  ;;  %v6546_v36 = vld [vmem:[#allocation6 + $0x4] sm:$0xf]  ;;  %v5558_v28 = vld [vmem:[#allocation6 + $0x10] sm:$0xf0] }
 0x18a   :  { %2771 = vmatpush.bf16.msrb.mxu3 %v5517_v51 }
 0x18b   :  { %2812 = vmatpush.bf16.msra.mxu2 %v5361_v42  ;;  %v6572_v42 = vld [vmem:[#allocation6 + $0xcc] sm:$0xf0] }
 0x18c   :  { %v5653_v51 = vor.u32 %v6572_v42, %v5652_v58  ;;  %v6566_v58 = vld [vmem:[#allocation6 + $0xa4] sm:$0xf]  ;;  %v5638_v42 = vld [vmem:[#allocation6 + $0xb0] sm:$0xf0] }
 0x18e   :  { %2772 = vmatpush.bf16.msrb.mxu3 %v5501_v22  ;;  %3616 = vmatpush.bf16.msrb.mxu0 %v5653_v51 }
 0x18f   :  { %2813 = vmatpush.bf16.msra.mxu2 %v5345_v57  ;;  %v6568_v57 = vld [vmem:[#allocation6 + $0xac] sm:$0xf0] }
 0x190   :  { %v5637_v22 = vor.u32 %v6568_v57, %v5636_v56  ;;  %v5700_v56 = vld [vmem:[#allocation6 + $0x120] sm:$0xf]  ;;  %v6584_v57 = vld [vmem:[#allocation6 + $0x12c] sm:$0xf0] }
 0x191   :  { %2725 = vmatmul.bf16.vlgmr.msra.gmra.mxu3 %v7024_v16 }
 0x192   :  { %v2635_v6 = vpop.f32.mrf.mxu0  ;;  %2773 = vmatpush.bf16.msrb.mxu3 %v5485_v1  ;;  %3617 = vmatpush.bf16.msrb.mxu0 %v5637_v22  ;;  %v5621_v1 = vor.u32 %v6564_v47, %v5620_v63  ;;  %v5892_v22 = vld [vmem:[#allocation6 + $0x2a0] sm:$0xf]  ;;  %v5701_v63 = vor.u32 %v6584_v57, %v5700_v56  ;;  %v6632_v47 = vld [vmem:[#allocation6 + $0x2ac] sm:$0xf0] }
 0x193   :  { %2814 = vmatpush.bf16.msra.mxu2 %v5329_v50  ;;  %v2636_v11 = vadd.f32 %v2635_v6, %v1978_v14  ;;  %v5441_v50 = vor.u32 %v6515_v54, %v5438_v55  ;;  %v6608_v6 = vld [vmem:[#allocation6 + $0x1ec] sm:$0xf0]  ;;  %v5764_v14 = vld [vmem:[#allocation6 + $0x1a0] sm:$0xf]  ;;  %v5641_v54 = vor.u32 %v6566_v58, %v5638_v42 }
 0x194   :  { %v5812_v58 = vld [vmem:[#allocation6 + $0x200] sm:$0xf]  ;;  %v6612_v42 = vld [vmem:[#allocation6 + $0x20c] sm:$0xf0] }
 0x196   :  { %2774 = vmatpush.bf16.msrb.mxu3 %v5469_v8  ;;  %v2648_v25 = vpop.f32.mrf.mxu1  ;;  %3618 = vmatpush.bf16.msrb.mxu0 %v5621_v1  ;;  %v5588_v8 = vld [vmem:[#allocation6 + $0x40] sm:$0xf] }
 0x197   :  { %2815 = vmatpush.bf16.msra.mxu2 %v5313_v7  ;;  %v7035_v24 = vadd.f32 %v2648_v25, %v2636_v11  ;;  %v5797_v7 = vor.u32 %v6608_v6, %v5796_v4  ;;  %v5748_v11 = vld [vmem:[#allocation6 + $0x180] sm:$0xf]  ;;  %v5557_v25 = vor.u32 %v6548_v23, %v5556_v21  ;;  %v6558_v6 = vld [vmem:[#allocation6 + $0x64] sm:$0xf]  ;;  %v5782_v23 = vld [vmem:[#allocation6 + $0x1d0] sm:$0xf0] }
 0x198   :  { %v5876_v4 = vld [vmem:[#allocation6 + $0x280] sm:$0xf] }
 0x199   :  { %3628 = vmatpush.bf16.msrb.mxu1 %v5797_v7  ;;  %v5606_v7 = vld [vmem:[#allocation6 + $0x70] sm:$0xf0] }
 0x19a   :  { %2816 = vmatmul.bf16.vlgmr.msra.gmra.mxu2 %v7015_v19  ;;  %v2637_v15 = vpop.f32.mrf.mxu0  ;;  %2775 = vmatpush.bf16.msrb.mxu3 %v5453_v10  ;;  %v5521_v19 = vor.u32 %v6535_v26, %v5518_v62  ;;  %v5589_v10 = vor.u32 %v6556_v59, %v5588_v8  ;;  %v6574_v26 = vld [vmem:[#allocation6 + $0xe4] sm:$0xf]  ;;  %v5670_v62 = vld [vmem:[#allocation6 + $0xf0] sm:$0xf0]  ;;  %v5685_v8 = vor.u32 %v6580_v3, %v5684_v2 }
 0x19b   :  { %3619 = vmatpush.bf16.msrb.mxu0 %v5605_v5  ;;  %v5573_v15 = vor.u32 %v6552_v13, %v5572_v12  ;;  %v5673_v29 = vor.u32 %v6574_v26, %v5670_v62  ;;  %v6628_v5 = vld [vmem:[#allocation6 + $0x28c] sm:$0xf0]  ;;  %v5609_v52 = vor.u32 %v6558_v6, %v5606_v7  ;;  %v5860_v12 = vld [vmem:[#allocation6 + $0x260] sm:$0xf]  ;;  %v6550_v62 = vld [vmem:[#allocation6 + $0x24] sm:$0xf] }
 0x19c   :  { %v5877_v59 = vor.u32 %v6628_v5, %v5876_v4  ;;  %v6624_v13 = vld [vmem:[#allocation6 + $0x26c] sm:$0xf0]  ;;  %v6586_v3 = vld [vmem:[#allocation6 + $0x144] sm:$0xf]  ;;  %v5718_v4 = vld [vmem:[#allocation6 + $0x150] sm:$0xf0] }
 0x19d   :  { %3629 = vmatpush.bf16.msrb.mxu1 %v5781_v61  ;;  %v6634_v5 = vld [vmem:[#allocation6 + $0x2c4] sm:$0xf]  ;;  %v5721_v6 = vor.u32 %v6586_v3, %v5718_v4  ;;  %v5910_v7 = vld [vmem:[#allocation6 + $0x2d0] sm:$0xf0] }
 0x19e   :  { %2776 = vmatpush.bf16.msrb.mxu3 %v5437_v33  ;;  %v2650_v30 = vpop.f32.mrf.mxu1  ;;  %v6600_v33 = vld [vmem:[#allocation6 + $0x1ac] sm:$0xf0]  ;;  %v6670_v3 = vld [vmem:[#allocation6 + $0x3e4] sm:$0xf] }
 0x19f   :  { %3620 = vmatpush.bf16.msrb.mxu0 %v5589_v10  ;;  %v5798_v10 = vld [vmem:[#allocation6 + $0x1f0] sm:$0xf0] }
 0x1a0   :  { %v5801_v61 = vor.u32 %v6606_v9, %v5798_v10  ;;  %v6020_v10 = vld [vmem:[#allocation6 + $0x3a0] sm:$0xf] }
 0x1a1   :  { %2777 = vmatmul.bf16.vlgmr.msrb.gmra.mxu3 %v7024_v16 }
 0x1a2   :  { %2821 = vmatpush.bf16.msra.mxu3 %v5553_v17  ;;  %v5765_v17 = vor.u32 %v6600_v33, %v5764_v14  ;;  %v6554_v33 = vld [vmem:[#allocation6 + $0x44] sm:$0xf] }
 0x1a3   :  { %3621 = vmatpush.bf16.msrb.mxu0 %v5573_v15  ;;  %v5861_v15 = vor.u32 %v6624_v13, %v5860_v12  ;;  %v6582_v12 = vld [vmem:[#allocation6 + $0x124] sm:$0xf]  ;;  %v5702_v13 = vld [vmem:[#allocation6 + $0x130] sm:$0xf0] }
 0x1a4   :  { %3630 = vmatpush.bf16.msrb.mxu1 %v5765_v17  ;;  %v5590_v17 = vld [vmem:[#allocation6 + $0x50] sm:$0xf0] }
 0x1a5   :  { %v5593_v21 = vor.u32 %v6554_v33, %v5590_v17  ;;  %v5705_v33 = vor.u32 %v6582_v12, %v5702_v13  ;;  %v5894_v17 = vld [vmem:[#allocation6 + $0x2b0] sm:$0xf0] }
 0x1a6   :  { %2822 = vmatpush.bf16.msra.mxu3 %v5537_v27  ;;  %v6596_v27 = vld [vmem:[#allocation6 + $0x18c] sm:$0xf0] }
 0x1a7   :  { %v5749_v34 = vor.u32 %v6596_v27, %v5748_v11  ;;  %3622 = vmatpush.bf16.msrb.mxu0 %v5557_v25  ;;  %v5844_v11 = vld [vmem:[#allocation6 + $0x240] sm:$0xf]  ;;  %v6620_v25 = vld [vmem:[#allocation6 + $0x24c] sm:$0xf0] }
 0x1a8   :  { %v5845_v26 = vor.u32 %v6620_v25, %v5844_v11 }
 0x1a9   :  { %3631 = vmatpush.bf16.msrb.mxu1 %v5749_v34  ;;  %v6598_v34 = vld [vmem:[#allocation6 + $0x1a4] sm:$0xf] }
 0x1aa   :  { %2823 = vmatpush.bf16.msra.mxu3 %v5521_v19 }
 0x1ab   :  { %3667 = vmatpush.bf16.msra.mxu0 %v5673_v29 }
 0x1ad   :  { %3632 = vmatpush.bf16.msrb.mxu1 %v5733_v35 }
 0x1ae   :  { %2824 = vmatpush.bf16.msra.mxu3 %v5505_v20 }
 0x1af   :  { %3668 = vmatpush.bf16.msra.mxu0 %v5657_v39  ;;  %v5561_v39 = vor.u32 %v6546_v36, %v5558_v28  ;;  %v6652_v36 = vld [vmem:[#allocation6 + $0x34c] sm:$0xf0] }
 0x1b2   :  { %v2687_v43 = vpop.f32.mrf.mxu0  ;;  %2825 = vmatpush.bf16.msra.mxu3 %v5489_v41 }
 0x1b3   :  { %v2688_v44 = vadd.f32 %v2687_v43, %v1979_v40  ;;  %v2700_v45 = vpop.f32.mrf.mxu1  ;;  %v5924_v40 = vld [vmem:[#allocation6 + $0x2e0] sm:$0xf]  ;;  %3669 = vmatpush.bf16.msra.mxu0 %v5641_v54  ;;  %v6590_v54 = vld [vmem:[#allocation6 + $0x164] sm:$0xf] }
 0x1b4   :  { %v5925_v43 = vor.u32 %v6640_v37, %v5924_v40  ;;  %v6616_v40 = vld [vmem:[#allocation6 + $0x22c] sm:$0xf0] }
 0x1b5   :  { %v7039_v49 = vadd.f32 %v2700_v45, %v2688_v44  ;;  %v5716_v44 = vld [vmem:[#allocation6 + $0x140] sm:$0xf]  ;;  %v6588_v45 = vld [vmem:[#allocation6 + $0x14c] sm:$0xf0]  ;;  %v5829_v37 = vor.u32 %v6616_v40, %v5828_v32  ;;  %v6622_v32 = vld [vmem:[#allocation6 + $0x264] sm:$0xf] }
 0x1b6   :  { %2826 = vmatpush.bf16.msra.mxu3 %v5473_v46  ;;  %3641 = vmatpush.bf16.msrb.mxu2 %v5925_v43  ;;  %v5908_v46 = vld [vmem:[#allocation6 + $0x2c0] sm:$0xf]  ;;  %v5717_v38 = vor.u32 %v6588_v45, %v5716_v44  ;;  %v6594_v43 = vld [vmem:[#allocation6 + $0x184] sm:$0xf]  ;;  %v5750_v44 = vld [vmem:[#allocation6 + $0x190] sm:$0xf0] }
 0x1b7   :  { %v5862_v40 = vld [vmem:[#allocation6 + $0x270] sm:$0xf0] }
 0x1b8   :  { %3633 = vmatpush.bf16.msrb.mxu1 %v5717_v38 }
 0x1ba   :  { %v2689_v60 = vpop.f32.mrf.mxu0  ;;  %2827 = vmatpush.bf16.msra.mxu3 %v5457_v53  ;;  %v5909_v53 = vor.u32 %v6636_v48, %v5908_v46  ;;  %v5753_v46 = vor.u32 %v6594_v43, %v5750_v44  ;;  %v5846_v44 = vld [vmem:[#allocation6 + $0x250] sm:$0xf0] }
 0x1bb   :  { %v2702_v18 = vpop.f32.mrf.mxu1  ;;  %v6562_v60 = vld [vmem:[#allocation6 + $0x84] sm:$0xf] }
 0x1bc   :  { %3642 = vmatpush.bf16.msrb.mxu2 %v5909_v53  ;;  %v5622_v18 = vld [vmem:[#allocation6 + $0x90] sm:$0xf0]  ;;  %3634 = vmatpush.bf16.msrb.mxu1 %v5701_v63  ;;  %v6672_v53 = vld [vmem:[#allocation6 + $0x3ec] sm:$0xf0]  ;;  %v6638_v63 = vld [vmem:[#allocation6 + $0x2e4] sm:$0xf] }
 0x1bd   :  { %v5625_v1 = vor.u32 %v6562_v60, %v5622_v18  ;;  %v6036_v18 = vld [vmem:[#allocation6 + $0x3c0] sm:$0xf] }
 0x1be   :  { %2828 = vmatpush.bf16.msra.mxu3 %v5441_v50  ;;  %v5893_v50 = vor.u32 %v6632_v47, %v5892_v22  ;;  %v5926_v47 = vld [vmem:[#allocation6 + $0x2f0] sm:$0xf0] }
 0x1bf   :  { %3670 = vmatpush.bf16.msra.mxu0 %v5625_v1  ;;  %v5929_v60 = vor.u32 %v6638_v63, %v5926_v47  ;;  %v6644_v63 = vld [vmem:[#allocation6 + $0x30c] sm:$0xf0] }
 0x1c0   :  { %3643 = vmatpush.bf16.msrb.mxu2 %v5893_v50  ;;  %3635 = vmatpush.bf16.msrb.mxu1 %v5685_v8  ;;  %v6668_v50 = vld [vmem:[#allocation6 + $0x3cc] sm:$0xf0] }
 0x1c1   :  { %2829 = vmatmul.bf16.vlgmr.msra.gmra.mxu3 %v7024_v16  ;;  %v1980_v16 = vperm.slane %v7031_v0, 2  ;;  %v6052_v0 = vld [vmem:[#allocation6 + $0x3e0] sm:$0xf]  ;;  %v6037_v2 = vor.u32 %v6668_v50, %v6036_v18  ;;  %v6610_v50 = vld [vmem:[#allocation6 + $0x204] sm:$0xf] }
 0x1c2   :  { %v6053_v57 = vor.u32 %v6672_v53, %v6052_v0  ;;  %v6577_v53 = vld [vmem:[#allocation6 + $0xf4] sm:$0xf0] }
 0x1c3   :  { %3671 = vmatpush.bf16.msra.mxu0 %v5609_v52  ;;  %v6664_v52 = vld [vmem:[#allocation6 + $0x3ac] sm:$0xf0] }
 0x1c4   :  { %3644 = vmatpush.bf16.msrb.mxu2 %v5877_v59  ;;  %3680 = vmatpush.bf16.msra.mxu1 %v5801_v61  ;;  %v5913_v59 = vor.u32 %v6634_v5, %v5910_v7  ;;  %v6021_v61 = vor.u32 %v6664_v52, %v6020_v10  ;;  %v5660_v5 = vld [vmem:[#allocation6 + $0xc8] sm:$0xf]  ;;  %v6666_v10 = vld [vmem:[#allocation6 + $0x3c4] sm:$0xf]  ;;  %v6038_v52 = vld [vmem:[#allocation6 + $0x3d0] sm:$0xf0] }
 0x1c5   :  { %3654 = vmatpush.bf16.msrb.mxu3 %v6053_v57  ;;  %v6041_v12 = vor.u32 %v6666_v10, %v6038_v52  ;;  %v5932_v10 = vld [vmem:[#allocation6 + $0x2e8] sm:$0xf]  ;;  %v6642_v52 = vld [vmem:[#allocation6 + $0x304] sm:$0xf] }
 0x1c7   :  { %3672 = vmatpush.bf16.msra.mxu0 %v5593_v21  ;;  %v6004_v21 = vld [vmem:[#allocation6 + $0x380] sm:$0xf] }
 0x1c8   :  { %3645 = vmatpush.bf16.msrb.mxu2 %v5861_v15  ;;  %v6630_v15 = vld [vmem:[#allocation6 + $0x2a4] sm:$0xf] }
 0x1c9   :  { %3655 = vmatpush.bf16.msrb.mxu3 %v6037_v2  ;;  %v5814_v2 = vld [vmem:[#allocation6 + $0x210] sm:$0xf0] }
 0x1cc   :  { %3646 = vmatpush.bf16.msrb.mxu2 %v5845_v26  ;;  %v5686_v26 = vld [vmem:[#allocation6 + $0x110] sm:$0xf0] }
 0x1cd   :  { %3656 = vmatpush.bf16.msrb.mxu3 %v6021_v61 }
 0x1d0   :  { %3647 = vmatpush.bf16.msrb.mxu2 %v5829_v37  ;;  %v5972_v37 = vld [vmem:[#allocation6 + $0x340] sm:$0xf] }
 0x1d1   :  { %v5973_v43 = vor.u32 %v6652_v36, %v5972_v37  ;;  %v5788_v37 = vld [vmem:[#allocation6 + $0x1c8] sm:$0xf] }
 0x1d2   :  { %v2739_v19 = vpop.f32.mrf.mxu0 }
 0x1d3   :  { %v2740_v30 = vadd.f32 %v2739_v19, %v1980_v16  ;;  %v2752_v20 = vpop.f32.mrf.mxu1  ;;  %v6602_v16 = vld [vmem:[#allocation6 + $0x1c4] sm:$0xf]  ;;  %v5574_v19 = vld [vmem:[#allocation6 + $0x30] sm:$0xf0] }
 0x1d4   :  { %v5785_v27 = vor.u32 %v6602_v16, %v5782_v23  ;;  %v5577_v29 = vor.u32 %v6550_v62, %v5574_v19  ;;  %v5897_v16 = vor.u32 %v6630_v15, %v5894_v17  ;;  %v6660_v23 = vld [vmem:[#allocation6 + $0x38c] sm:$0xf0]  ;;  %v6626_v62 = vld [vmem:[#allocation6 + $0x284] sm:$0xf]  ;;  %v5628_v15 = vld [vmem:[#allocation6 + $0x88] sm:$0xf] }
 0x1d5   :  { %v7043_v41 = vadd.f32 %v2752_v20, %v2740_v30  ;;  %v5766_v30 = vld [vmem:[#allocation6 + $0x1b0] sm:$0xf0]  ;;  %v6005_v25 = vor.u32 %v6660_v23, %v6004_v21  ;;  %v6662_v17 = vld [vmem:[#allocation6 + $0x3a4] sm:$0xf] }
 0x1d6   :  { %3681 = vmatpush.bf16.msra.mxu1 %v5785_v27  ;;  %v5769_v20 = vor.u32 %v6598_v34, %v5766_v30  ;;  %3673 = vmatpush.bf16.msra.mxu0 %v5577_v29  ;;  %v6578_v27 = vld [vmem:[#allocation6 + $0x104] sm:$0xf]  ;;  %v5878_v34 = vld [vmem:[#allocation6 + $0x290] sm:$0xf0]  ;;  %v5988_v30 = vld [vmem:[#allocation6 + $0x360] sm:$0xf] }
 0x1d7   :  { %v5689_v19 = vor.u32 %v6578_v27, %v5686_v26  ;;  %v5881_v29 = vor.u32 %v6626_v62, %v5878_v34  ;;  %3657 = vmatpush.bf16.msrb.mxu3 %v6005_v25  ;;  %v6561_v25 = vld [vmem:[#allocation6 + $0x74] sm:$0xf0]  ;;  %v5804_v27 = vld [vmem:[#allocation6 + $0x1e8] sm:$0xf]  ;;  %v6006_v34 = vld [vmem:[#allocation6 + $0x390] sm:$0xf0] }
 0x1d8   :  { %v6609_v62 = vld [vmem:[#allocation6 + $0x1f4] sm:$0xf0] }
 0x1da   :  { %v2741_v51 = vpop.f32.mrf.mxu0  ;;  %v7045_v14 = vpop.f32.mrf.mxu2  ;;  %3682 = vmatpush.bf16.msra.mxu1 %v5769_v20  ;;  %3674 = vmatpush.bf16.msra.mxu0 %v5561_v39  ;;  %v6656_v20 = vld [vmem:[#allocation6 + $0x36c] sm:$0xf0]  ;;  %v6618_v39 = vld [vmem:[#allocation6 + $0x244] sm:$0xf] }
 0x1db   :  { %v2754_v55 = vpop.f32.mrf.mxu1  ;;  %v5813_v51 = vor.u32 %v6612_v42, %v5812_v58  ;;  %v6614_v58 = vld [vmem:[#allocation6 + $0x224] sm:$0xf]  ;;  %v5830_v42 = vld [vmem:[#allocation6 + $0x230] sm:$0xf0]  ;;  %v2662_v0 = vadd.f32 %v7045_v14, %v7035_v24  ;;  %v5817_v24 = vor.u32 %v6610_v50, %v5814_v2  ;;  %v6575_v2 = vld [vmem:[#allocation6 + $0xec] sm:$0xf] }
 0x1dc   :  { %v5734_v55 = vld [vmem:[#allocation6 + $0x170] sm:$0xf0] }
 0x1dd   :  { %v5737_v22 = vor.u32 %v6590_v54, %v5734_v55  ;;  %3648 = vmatpush.bf16.msrb.mxu2 %v5813_v51  ;;  %v5676_v51 = vld [vmem:[#allocation6 + $0xe8] sm:$0xf]  ;;  %v5833_v54 = vor.u32 %v6614_v58, %v5830_v42  ;;  %v6054_v14 = vld [vmem:[#allocation6 + $0x3f0] sm:$0xf0]  ;;  %v6601_v42 = vld [vmem:[#allocation6 + $0x1b4] sm:$0xf0] }
 0x1de   :  { %3683 = vmatpush.bf16.msra.mxu1 %v5753_v46  ;;  %v5956_v46 = vld [vmem:[#allocation6 + $0x320] sm:$0xf]  ;;  %v6057_v7 = vor.u32 %v6670_v3, %v6054_v14  ;;  %v5958_v50 = vld [vmem:[#allocation6 + $0x330] sm:$0xf0]  ;;  %v5678_v3 = vld [vmem:[#allocation6 + $0xf8] sm:$0xf0] }
 0x1df   :  { %v5740_v14 = vld [vmem:[#allocation6 + $0x168] sm:$0xf] }
 0x1e1   :  { %3693 = vmatpush.bf16.msra.mxu2 %v5929_v60  ;;  %v5677_v60 = vor.u32 %v6577_v53, %v5676_v51  ;;  %v5974_v51 = vld [vmem:[#allocation6 + $0x350] sm:$0xf0] }
 0x1e2   :  { %v2663_v35 = vpop.f32.mrf.mxu2  ;;  %3684 = vmatpush.bf16.msra.mxu1 %v5737_v22  ;;  %v5940_v22 = vld [vmem:[#allocation6 + $0x300] sm:$0xf] }
 0x1e3   :  { %v5865_v35 = vor.u32 %v6622_v32, %v5862_v40  ;;  %v5941_v18 = vor.u32 %v6644_v63, %v5940_v22  ;;  %v5805_v32 = vor.u32 %v6609_v62, %v5804_v27  ;;  %v5596_v40 = vld [vmem:[#allocation6 + $0x48] sm:$0xf]  ;;  %v6549_v63 = vld [vmem:[#allocation6 + $0x14] sm:$0xf0]  ;;  %v6567_v62 = vld [vmem:[#allocation6 + $0xac] sm:$0xf] }
 0x1e4   :  { %v5564_v22 = vld [vmem:[#allocation6 + $0x8] sm:$0xf] }
 0x1e5   :  { %3694 = vmatpush.bf16.msra.mxu2 %v5913_v59  ;;  %v5644_v59 = vld [vmem:[#allocation6 + $0xa8] sm:$0xf] }
 0x1e6   :  { %3685 = vmatpush.bf16.msra.mxu1 %v5721_v6  ;;  %v6573_v6 = vld [vmem:[#allocation6 + $0xd4] sm:$0xf0]  ;;  %v5916_v27 = vld [vmem:[#allocation6 + $0x2c8] sm:$0xf] }
 0x1e9   :  { %3695 = vmatpush.bf16.msra.mxu2 %v5897_v16  ;;  %v6022_v16 = vld [vmem:[#allocation6 + $0x3b0] sm:$0xf0] }
 0x1ea   :  { %v7050_v1 = vpop.f32.mrf.mxu2  ;;  %3686 = vmatpush.bf16.msra.mxu1 %v5705_v33  ;;  %v6565_v33 = vld [vmem:[#allocation6 + $0x94] sm:$0xf0]  ;;  %v6025_v21 = vor.u32 %v6662_v17, %v6022_v16 }
 0x1eb   :  { %v5629_v23 = vor.u32 %v6565_v33, %v5628_v15  ;;  %v2714_v26 = vadd.f32 %v7050_v1, %v7039_v49  ;;  %v6571_v15 = vld [vmem:[#allocation6 + $0xcc] sm:$0xf]  ;;  %v5662_v33 = vld [vmem:[#allocation6 + $0xd8] sm:$0xf0] }
 0x1ed   :  { %3696 = vmatpush.bf16.msra.mxu2 %v5881_v29 }
 0x1ee   :  { %3687 = vmatpush.bf16.msra.mxu1 %v5689_v19  ;;  %v6658_v19 = vld [vmem:[#allocation6 + $0x384] sm:$0xf] }
 0x1f1   :  { %3697 = vmatpush.bf16.msra.mxu2 %v5865_v35  ;;  %v6557_v35 = vld [vmem:[#allocation6 + $0x54] sm:$0xf0] }
 0x1f2   :  { %v2791_v45 = vpop.f32.mrf.mxu0  ;;  %v2715_v11 = vpop.f32.mrf.mxu2  ;;  %v5597_v1 = vor.u32 %v6557_v35, %v5596_v40  ;;  %v6633_v35 = vld [vmem:[#allocation6 + $0x2b4] sm:$0xf0] }
 0x1f3   :  { %v2792_v38 = vadd.f32 %v2791_v45, %v1981_v31  ;;  %v2804_v48 = vpop.f32.mrf.mxu1  ;;  %v5989_v31 = vor.u32 %v6656_v20, %v5988_v30  ;;  %v5849_v45 = vor.u32 %v6618_v39, %v5846_v44  ;;  %v5612_v11 = vld [vmem:[#allocation6 + $0x68] sm:$0xf]  ;;  %v6009_v30 = vor.u32 %v6658_v19, %v6006_v34  ;;  %v6654_v39 = vld [vmem:[#allocation6 + $0x364] sm:$0xf]  ;;  %v5990_v44 = vld [vmem:[#allocation6 + $0x370] sm:$0xf0] }
 0x1f4   :  { %v5993_v49 = vor.u32 %v6654_v39, %v5990_v44  ;;  %v5646_v19 = vld [vmem:[#allocation6 + $0xb8] sm:$0xf0] }
 0x1f5   :  { %v7048_v56 = vadd.f32 %v2804_v48, %v2792_v38  ;;  %3658 = vmatpush.bf16.msrb.mxu3 %v5989_v31  ;;  %v6648_v38 = vld [vmem:[#allocation6 + $0x32c] sm:$0xf0]  ;;  %3698 = vmatpush.bf16.msra.mxu2 %v5849_v45  ;;  %v5613_v31 = vor.u32 %v6561_v25, %v5612_v11  ;;  %v6589_v25 = vld [vmem:[#allocation6 + $0x154] sm:$0xf0] }
 0x1f6   :  { %v5957_v48 = vor.u32 %v6648_v38, %v5956_v46  ;;  %v5580_v46 = vld [vmem:[#allocation6 + $0x28] sm:$0xf]  ;;  %v6553_v38 = vld [vmem:[#allocation6 + $0x34] sm:$0xf0] }
 0x1f9   :  { %3659 = vmatpush.bf16.msrb.mxu3 %v5973_v43  ;;  %3699 = vmatpush.bf16.msra.mxu2 %v5833_v54  ;;  %v6605_v43 = vld [vmem:[#allocation6 + $0x1d4] sm:$0xf0] }
 0x1fa   :  { %v2793_v8 = vpop.f32.mrf.mxu0  ;;  %v5789_v45 = vor.u32 %v6605_v43, %v5788_v37  ;;  %v6563_v37 = vld [vmem:[#allocation6 + $0x8c] sm:$0xf]  ;;  %v5630_v43 = vld [vmem:[#allocation6 + $0x98] sm:$0xf0] }
 0x1fb   :  { %v2806_v9 = vpop.f32.mrf.mxu1  ;;  %v5661_v8 = vor.u32 %v6573_v6, %v5660_v5  ;;  %v5565_v6 = vor.u32 %v6549_v63, %v5564_v22  ;;  %v6625_v63 = vld [vmem:[#allocation6 + $0x274] sm:$0xf0] }
 0x1fc   :  { %v6569_v9 = vld [vmem:[#allocation6 + $0xb4] sm:$0xf0] }
 0x1fd   :  { %v7052_v28 = vpop.f32.mrf.mxu2  ;;  %3660 = vmatpush.bf16.msrb.mxu3 %v5957_v48  ;;  %3700 = vmatpush.bf16.msra.mxu2 %v5817_v24  ;;  %v5645_v13 = vor.u32 %v6569_v9, %v5644_v59  ;;  %v5772_v48 = vld [vmem:[#allocation6 + $0x1a8] sm:$0xf]  ;;  %v5681_v9 = vor.u32 %v6575_v2, %v5678_v3 }
 0x201   :  { %3661 = vmatpush.bf16.msrb.mxu3 %v5941_v18  ;;  %v6646_v18 = vld [vmem:[#allocation6 + $0x324] sm:$0xf] }
 0x202   :  { %v5961_v5 = vor.u32 %v6646_v18, %v5958_v50  ;;  %v6603_v18 = vld [vmem:[#allocation6 + $0x1cc] sm:$0xf]  ;;  %v5790_v50 = vld [vmem:[#allocation6 + $0x1d8] sm:$0xf0] }
 0x204   :  { %v2674_v55 = vpop.f32.mrf.mxu3 }
 0x205   :  { %v2675_v57 = vadd.f32 %v2674_v55, %v2662_v0  ;;  %v2767_v47 = vpop.f32.mrf.mxu2  ;;  %3706 = vmatpush.bf16.msra.mxu3 %v6057_v7  ;;  %v6650_v0 = vld [vmem:[#allocation6 + $0x344] sm:$0xf]  ;;  %v5581_v55 = vor.u32 %v6553_v38, %v5580_v46  ;;  %v6593_v7 = vld [vmem:[#allocation6 + $0x174] sm:$0xf0]  ;;  %v5884_v46 = vld [vmem:[#allocation6 + $0x288] sm:$0xf] }
 0x206   :  { %v5977_v54 = vor.u32 %v6650_v0, %v5974_v51  ;;  %v5756_v47 = vld [vmem:[#allocation6 + $0x188] sm:$0xf]  ;;  %v6629_v38 = vld [vmem:[#allocation6 + $0x294] sm:$0xf0]  ;;  %v6607_v0 = vld [vmem:[#allocation6 + $0x1ec] sm:$0xf] }
 0x207   :  { %v7056_v4 = vpack.c.bf16 %v2675_v57, %v2675_v57  ;;  %v5773_v57 = vor.u32 %v6601_v42, %v5772_v48  ;;  %v6559_v48 = vld [vmem:[#allocation6 + $0x6c] sm:$0xf]  ;;  %v5614_v42 = vld [vmem:[#allocation6 + $0x78] sm:$0xf0] }
 0x208   :  { %v5806_v51 = vld [vmem:[#allocation6 + $0x1f8] sm:$0xf0] }
 0x209   :  { %3623 = vmatmul.bf16.vlgmr.msrb.gmra.mxu0 %v7056_v4  ;;  %3707 = vmatpush.bf16.msra.mxu3 %v6041_v12  ;;  %v5809_v22 = vor.u32 %v6607_v0, %v5806_v51  ;;  %v5710_v51 = vld [vmem:[#allocation6 + $0x138] sm:$0xf0] }
 0x20a   :  { %3719 = vmatpush.bf16.msrb.mxu0 %v5677_v60  ;;  %v6597_v60 = vld [vmem:[#allocation6 + $0x194] sm:$0xf0] }
 0x20b   :  { %v5757_v24 = vor.u32 %v6597_v60, %v5756_v47  ;;  %v6555_v47 = vld [vmem:[#allocation6 + $0x4c] sm:$0xf]  ;;  %v5598_v60 = vld [vmem:[#allocation6 + $0x58] sm:$0xf0] }
 0x20c   :  { %v2676_v61 = vpop.f32.mrf.mxu3  ;;  %v5601_v3 = vor.u32 %v6555_v47, %v5598_v60  ;;  %v6579_v47 = vld [vmem:[#allocation6 + $0x10c] sm:$0xf]  ;;  %v5694_v60 = vld [vmem:[#allocation6 + $0x118] sm:$0xf0] }
 0x20d   :  { %3708 = vmatpush.bf16.msra.mxu3 %v6025_v21  ;;  %v5942_v61 = vld [vmem:[#allocation6 + $0x310] sm:$0xf0]  ;;  %v5741_v21 = vor.u32 %v6593_v7, %v5740_v14  ;;  %v6551_v14 = vld [vmem:[#allocation6 + $0x2c] sm:$0xf]  ;;  %v5582_v7 = vld [vmem:[#allocation6 + $0x38] sm:$0xf0] }
 0x20e   :  { %3720 = vmatpush.bf16.msrb.mxu0 %v5661_v8  ;;  %v2766_v8 = vadd.f32 %v7052_v28, %v7043_v41  ;;  %v5945_v17 = vor.u32 %v6642_v52, %v5942_v61  ;;  %v5665_v41 = vor.u32 %v6571_v15, %v5662_v33  ;;  %v5724_v28 = vld [vmem:[#allocation6 + $0x148] sm:$0xf]  ;;  %v5566_v15 = vld [vmem:[#allocation6 + $0x18] sm:$0xf0]  ;;  %v6595_v33 = vld [vmem:[#allocation6 + $0x18c] sm:$0xf] }
 0x20f   :  { %v5725_v34 = vor.u32 %v6589_v25, %v5724_v28  ;;  %v5836_v52 = vld [vmem:[#allocation6 + $0x228] sm:$0xf] }
 0x211   :  { %3709 = vmatpush.bf16.msra.mxu3 %v6009_v30  ;;  %v5649_v30 = vor.u32 %v6567_v62, %v5646_v19  ;;  %v6591_v62 = vld [vmem:[#allocation6 + $0x16c] sm:$0xf] }
 0x212   :  { %3721 = vmatpush.bf16.msrb.mxu0 %v5645_v13  ;;  %v6641_v13 = vld [vmem:[#allocation6 + $0x2f4] sm:$0xf0] }
 0x213   :  { %v5933_v11 = vor.u32 %v6641_v13, %v5932_v10  ;;  %v5585_v10 = vor.u32 %v6551_v14, %v5582_v7  ;;  %v6547_v13 = vld [vmem:[#allocation6 + $0xc] sm:$0xf]  ;;  %v5870_v7 = vld [vmem:[#allocation6 + $0x278] sm:$0xf0] }
 0x214   :  { %v2726_v29 = vpop.f32.mrf.mxu3  ;;  %v6623_v14 = vld [vmem:[#allocation6 + $0x26c] sm:$0xf] }
 0x215   :  { %v2727_v20 = vadd.f32 %v2726_v29, %v2714_v26  ;;  %3710 = vmatpush.bf16.msra.mxu3 %v5993_v49  ;;  %v6637_v26 = vld [vmem:[#allocation6 + $0x2d4] sm:$0xf0]  ;;  %v5633_v49 = vor.u32 %v6563_v37, %v5630_v43  ;;  %v6587_v43 = vld [vmem:[#allocation6 + $0x14c] sm:$0xf] }
 0x216   :  { %3722 = vmatpush.bf16.msrb.mxu0 %v5629_v23  ;;  %v5917_v29 = vor.u32 %v6637_v26, %v5916_v27  ;;  %v6060_v27 = vld [vmem:[#allocation6 + $0x3e8] sm:$0xf]  ;;  %v6673_v26 = vld [vmem:[#allocation6 + $0x3f4] sm:$0xf0] }
 0x217   :  { %v7061_v36 = vpack.c.bf16 %v2727_v20, %v2727_v20  ;;  %v5708_v20 = vld [vmem:[#allocation6 + $0x128] sm:$0xf] }
 0x219   :  { %3636 = vmatmul.bf16.vlgmr.msrb.gmra.mxu1 %v7061_v36  ;;  %3675 = vmatmul.bf16.vlgmr.msra.gmra.mxu0 %v7056_v4 }
 0x21a   :  { %3723 = vmatpush.bf16.msrb.mxu0 %v5613_v31  ;;  %3732 = vmatpush.bf16.msrb.mxu1 %v5805_v32  ;;  %v6585_v31 = vld [vmem:[#allocation6 + $0x134] sm:$0xf0]  ;;  %v5900_v32 = vld [vmem:[#allocation6 + $0x2a8] sm:$0xf] }
 0x21b   :  { %3711 = vmatpush.bf16.msra.mxu3 %v5977_v54  ;;  %v5709_v39 = vor.u32 %v6585_v31, %v5708_v20  ;;  %v5901_v44 = vor.u32 %v6633_v35, %v5900_v32  ;;  %v5885_v54 = vor.u32 %v6629_v38, %v5884_v46  ;;  %v6061_v32 = vor.u32 %v6673_v26, %v6060_v27  ;;  %v6028_v38 = vld [vmem:[#allocation6 + $0x3a8] sm:$0xf]  ;;  %v5822_v27 = vld [vmem:[#allocation6 + $0x218] sm:$0xf0]  ;;  %v6671_v26 = vld [vmem:[#allocation6 + $0x3ec] sm:$0xf] }
 0x21c   :  { %v2728_v53 = vpop.f32.mrf.mxu3 }
 0x21d   :  { %v7065_v58 = vpop.f32.mrf.mxu2 }
 0x21e   :  { %3724 = vmatpush.bf16.msrb.mxu0 %v5597_v1  ;;  %3733 = vmatpush.bf16.msrb.mxu1 %v5789_v45  ;;  %v5692_v1 = vld [vmem:[#allocation6 + $0x108] sm:$0xf]  ;;  %v6581_v45 = vld [vmem:[#allocation6 + $0x114] sm:$0xf0]  ;;  %v2818_v28 = vadd.f32 %v7065_v58, %v7048_v56 }
 0x21f   :  { %3712 = vmatpush.bf16.msra.mxu3 %v5961_v5  ;;  %v5693_v53 = vor.u32 %v6581_v45, %v5692_v1  ;;  %v5852_v5 = vld [vmem:[#allocation6 + $0x248] sm:$0xf]  ;;  %v6669_v58 = vld [vmem:[#allocation6 + $0x3d4] sm:$0xf0] }
 0x220   :  { %v6044_v56 = vld [vmem:[#allocation6 + $0x3c8] sm:$0xf] }
 0x221   :  { %v6045_v1 = vor.u32 %v6669_v58, %v6044_v56  ;;  %v6014_v56 = vld [vmem:[#allocation6 + $0x398] sm:$0xf0] }
 0x222   :  { %3725 = vmatpush.bf16.msrb.mxu0 %v5581_v55  ;;  %3734 = vmatpush.bf16.msrb.mxu1 %v5773_v57  ;;  %v5617_v55 = vor.u32 %v6559_v48, %v5614_v42  ;;  %v5868_v57 = vld [vmem:[#allocation6 + $0x268] sm:$0xf]  ;;  %v6665_v48 = vld [vmem:[#allocation6 + $0x3b4] sm:$0xf0]  ;;  %v6583_v42 = vld [vmem:[#allocation6 + $0x12c] sm:$0xf] }
 0x223   :  { %3713 = vmatpush.bf16.msra.mxu3 %v5945_v17  ;;  %v5869_v2 = vor.u32 %v6625_v63, %v5868_v57  ;;  %v5758_v17 = vld [vmem:[#allocation6 + $0x198] sm:$0xf0]  ;;  %v6661_v63 = vld [vmem:[#allocation6 + $0x394] sm:$0xf0] }
 0x224   :  { %v2778_v12 = vpop.f32.mrf.mxu3  ;;  %v5761_v25 = vor.u32 %v6595_v33, %v5758_v17  ;;  %v6649_v33 = vld [vmem:[#allocation6 + $0x334] sm:$0xf0]  ;;  %v6615_v17 = vld [vmem:[#allocation6 + $0x22c] sm:$0xf] }
 0x225   :  { %v2819_v59 = vpop.f32.mrf.mxu2  ;;  %v2779_v16 = vadd.f32 %v2778_v12, %v2766_v8  ;;  %v6599_v8 = vld [vmem:[#allocation6 + $0x1ac] sm:$0xf]  ;;  %v6617_v12 = vld [vmem:[#allocation6 + $0x234] sm:$0xf0] }
 0x226   :  { %3726 = vmatpush.bf16.msrb.mxu0 %v5565_v6  ;;  %3735 = vmatpush.bf16.msrb.mxu1 %v5757_v24  ;;  %v5793_v6 = vor.u32 %v6603_v18, %v5790_v50  ;;  %v6621_v24 = vld [vmem:[#allocation6 + $0x254] sm:$0xf0]  ;;  %v5774_v59 = vld [vmem:[#allocation6 + $0x1b8] sm:$0xf0]  ;;  %v6627_v18 = vld [vmem:[#allocation6 + $0x28c] sm:$0xf] }
 0x227   :  { %v7069_v23 = vpack.c.bf16 %v2779_v16, %v2779_v16  ;;  %v5777_v61 = vor.u32 %v6599_v8, %v5774_v59  ;;  %v5837_v16 = vor.u32 %v6617_v12, %v5836_v52  ;;  %v5886_v50 = vld [vmem:[#allocation6 + $0x298] sm:$0xf0]  ;;  %v5873_v59 = vor.u32 %v6623_v14, %v5870_v7  ;;  %v6619_v52 = vld [vmem:[#allocation6 + $0x24c] sm:$0xf]  ;;  %v6674_v14 = vld [vmem:[#allocation7] sm:$0xff] }
 0x228   :  { %v6686_v7 = vld [vmem:[#allocation7 + $0x60] sm:$0xff] }
 0x229   :  { %3649 = vmatmul.bf16.vlgmr.msrb.gmra.mxu2 %v7069_v23  ;;  %3688 = vmatmul.bf16.vlgmr.msra.gmra.mxu1 %v7061_v36 }
 0x22a   :  { %3771 = vmatpush.bf16.msra.mxu0 %v5681_v9  ;;  %3736 = vmatpush.bf16.msrb.mxu1 %v5741_v21  ;;  %v5853_v9 = vor.u32 %v6621_v24, %v5852_v5  ;;  %v5569_v21 = vor.u32 %v6547_v13, %v5566_v15  ;;  %v5889_v5 = vor.u32 %v6627_v18, %v5886_v50  ;;  %v6657_v24 = vld [vmem:[#allocation6 + $0x374] sm:$0xf0]  ;;  %v5964_v15 = vld [vmem:[#allocation6 + $0x328] sm:$0xf] }
 0x22b   :  { %3727 = vmatmul.bf16.vlgmr.msrb.gmra.mxu0 %v7056_v4  ;;  %3745 = vmatpush.bf16.msrb.mxu2 %v5933_v11  ;;  %v5820_v11 = vld [vmem:[#allocation6 + $0x208] sm:$0xf]  ;;  %v6677_v18 = vld [vmem:[#allocation7 + $0x18] sm:$0xff] }
 0x22c   :  { %v2780_v40 = vpop.f32.mrf.mxu3  ;;  %v6689_v50 = vld [vmem:[#allocation7 + $0x78] sm:$0xff] }
 0x22e   :  { %3772 = vmatpush.bf16.msra.mxu0 %v5665_v41  ;;  %3737 = vmatpush.bf16.msrb.mxu1 %v5725_v34  ;;  %v6613_v41 = vld [vmem:[#allocation6 + $0x214] sm:$0xf0]  ;;  %v5742_v34 = vld [vmem:[#allocation6 + $0x178] sm:$0xf0] }
 0x22f   :  { %3746 = vmatpush.bf16.msrb.mxu2 %v5917_v29  ;;  %v6639_v29 = vld [vmem:[#allocation6 + $0x2ec] sm:$0xf]  ;;  %v5821_v31 = vor.u32 %v6613_v41, %v5820_v11  ;;  %v5745_v35 = vor.u32 %v6591_v62, %v5742_v34  ;;  %v5948_v41 = vld [vmem:[#allocation6 + $0x308] sm:$0xf]  ;;  %v6062_v62 = vld [vmem:[#allocation6 + $0x3f8] sm:$0xf0] }
 0x230   :  { %v6065_v34 = vor.u32 %v6671_v26, %v6062_v62  ;;  %v6692_v26 = vld [vmem:[#allocation7 + $0x90] sm:$0xff] }
 0x232   :  { %3773 = vmatpush.bf16.msra.mxu0 %v5649_v30  ;;  %3738 = vmatpush.bf16.msrb.mxu1 %v5709_v39  ;;  %v5934_v30 = vld [vmem:[#allocation6 + $0x2f8] sm:$0xf0] }
 0x233   :  { %3747 = vmatpush.bf16.msrb.mxu2 %v5901_v44  ;;  %v5937_v37 = vor.u32 %v6639_v29, %v5934_v30  ;;  %v5726_v39 = vld [vmem:[#allocation6 + $0x158] sm:$0xf0]  ;;  %v6635_v44 = vld [vmem:[#allocation6 + $0x2cc] sm:$0xf] }
 0x234   :  { %v5729_v45 = vor.u32 %v6587_v43, %v5726_v39  ;;  %v6667_v29 = vld [vmem:[#allocation6 + $0x3cc] sm:$0xf]  ;;  %v6046_v30 = vld [vmem:[#allocation6 + $0x3d8] sm:$0xf0] }
 0x235   :  { %v6655_v43 = vld [vmem:[#allocation6 + $0x36c] sm:$0xf]  ;;  %v5998_v39 = vld [vmem:[#allocation6 + $0x378] sm:$0xf0] }
 0x236   :  { %3774 = vmatpush.bf16.msra.mxu0 %v5633_v49  ;;  %3739 = vmatpush.bf16.msrb.mxu1 %v5693_v53  ;;  %v5918_v49 = vld [vmem:[#allocation6 + $0x2d8] sm:$0xf0]  ;;  %v6631_v53 = vld [vmem:[#allocation6 + $0x2ac] sm:$0xf] }
 0x237   :  { %3748 = vmatpush.bf16.msrb.mxu2 %v5885_v54  ;;  %v5921_v46 = vor.u32 %v6635_v44, %v5918_v49  ;;  %v5902_v54 = vld [vmem:[#allocation6 + $0x2b8] sm:$0xf0]  ;;  %v6001_v44 = vor.u32 %v6655_v43, %v5998_v39  ;;  %v6651_v49 = vld [vmem:[#allocation6 + $0x34c] sm:$0xf]  ;;  %v6704_v43 = vld [vmem:[#allocation7 + $0xf0] sm:$0xff] }
 0x238   :  { %v5905_v57 = vor.u32 %v6631_v53, %v5902_v54  ;;  %v6681_v54 = vld [vmem:[#allocation7 + $0x38] sm:$0xff] }
 0x239   :  { %3701 = vmatmul.bf16.vlgmr.msra.gmra.mxu2 %v7069_v23  ;;  %3740 = vmatmul.bf16.vlgmr.msrb.gmra.mxu1 %v7061_v36 }
 0x23a   :  { %3775 = vmatpush.bf16.msra.mxu0 %v5617_v55  ;;  %3784 = vmatpush.bf16.msra.mxu1 %v5809_v22  ;;  %v6029_v55 = vor.u32 %v6665_v48, %v6028_v38  ;;  %v6012_v22 = vld [vmem:[#allocation6 + $0x388] sm:$0xf]  ;;  %v5966_v38 = vld [vmem:[#allocation6 + $0x338] sm:$0xf0] }
 0x23b   :  { %3749 = vmatpush.bf16.msrb.mxu2 %v5869_v2  ;;  %v6013_v2 = vor.u32 %v6661_v63, %v6012_v22  ;;  %v6679_v22 = vld [vmem:[#allocation7 + $0x28] sm:$0xff]  ;;  %v6678_v63 = vld [vmem:[#allocation7 + $0x20] sm:$0xff] }
 0x23e   :  { %3776 = vmatpush.bf16.msra.mxu0 %v5601_v3  ;;  %3785 = vmatpush.bf16.msra.mxu1 %v5793_v6  ;;  %v5697_v3 = vor.u32 %v6579_v47, %v5694_v60  ;;  %v5996_v6 = vld [vmem:[#allocation6 + $0x368] sm:$0xf] }
 0x23f   :  { %3750 = vmatpush.bf16.msrb.mxu2 %v5853_v9  ;;  %v5997_v8 = vor.u32 %v6657_v24, %v5996_v6  ;;  %v5980_v9 = vld [vmem:[#allocation6 + $0x348] sm:$0xf] }
 0x242   :  { %3777 = vmatpush.bf16.msra.mxu0 %v5585_v10  ;;  %3786 = vmatpush.bf16.msra.mxu1 %v5777_v61  ;;  %v6653_v10 = vld [vmem:[#allocation6 + $0x354] sm:$0xf0]  ;;  %v5854_v61 = vld [vmem:[#allocation6 + $0x258] sm:$0xf0] }
 0x243   :  { %3751 = vmatpush.bf16.msrb.mxu2 %v5837_v16  ;;  %v5981_v12 = vor.u32 %v6653_v10, %v5980_v9  ;;  %v5857_v13 = vor.u32 %v6619_v52, %v5854_v61  ;;  %v5838_v16 = vld [vmem:[#allocation6 + $0x238] sm:$0xf0]  ;;  %v6684_v61 = vld [vmem:[#allocation7 + $0x50] sm:$0xff] }
 0x244   :  { %v2830_v19 = vpop.f32.mrf.mxu3  ;;  %v5841_v11 = vor.u32 %v6615_v17, %v5838_v16  ;;  %v6685_v9 = vld [vmem:[#allocation7 + $0x58] sm:$0xff]  ;;  %v6682_v16 = vld [vmem:[#allocation7 + $0x40] sm:$0xff] }
 0x245   :  { %v2831_v20 = vadd.f32 %v2830_v19, %v2818_v28  ;;  %v6645_v28 = vld [vmem:[#allocation6 + $0x314] sm:$0xf0] }
 0x246   :  { %3778 = vmatpush.bf16.msra.mxu0 %v5569_v21  ;;  %3787 = vmatpush.bf16.msra.mxu1 %v5761_v25  ;;  %v5965_v21 = vor.u32 %v6649_v33, %v5964_v15  ;;  %v6611_v25 = vld [vmem:[#allocation6 + $0x20c] sm:$0xf]  ;;  %v5949_v19 = vor.u32 %v6645_v28, %v5948_v41  ;;  %v6697_v10 = vld [vmem:[#allocation7 + $0xb8] sm:$0xff]  ;;  %v7097_v41 = vld [vmem:[%s7118_s6] sm:$0xf] }
 0x247   :  { %v7078_v40 = vpack.c.bf16 %v2831_v20, %v2831_v20  ;;  %3752 = vmatpush.bf16.msrb.mxu2 %v5821_v31  ;;  %v6049_v20 = vor.u32 %v6667_v29, %v6046_v30  ;;  %v6663_v31 = vld [vmem:[#allocation6 + $0x3ac] sm:$0xf]  ;;  %v2968_v39 = vperm.slane %v7097_v41, 1 }
 0x248   :  { %v6683_v15 = vld [vmem:[#allocation7 + $0x48] sm:$0xff] }
 0x249   :  { %3662 = vmatmul.bf16.vlgmr.msrb.gmra.mxu3 %v7078_v40  ;;  %3779 = vmatmul.bf16.vlgmr.msra.gmra.mxu0 %v7056_v4  ;;  %v5713_v4 = vor.u32 %v6583_v42, %v5710_v51  ;;  %v6643_v42 = vld [vmem:[#allocation6 + $0x30c] sm:$0xf] }
 0x24a   :  { %3758 = vmatpush.bf16.msrb.mxu3 %v6061_v32  ;;  %3788 = vmatpush.bf16.msra.mxu1 %v5745_v35  ;;  %v6030_v32 = vld [vmem:[#allocation6 + $0x3b8] sm:$0xf0]  ;;  %v6695_v33 = vld [vmem:[#allocation7 + $0xa8] sm:$0xff] }
 0x24b   :  { %3797 = vmatpush.bf16.msra.mxu2 %v5937_v37  ;;  %v6033_v35 = vor.u32 %v6663_v31, %v6030_v32  ;;  %v6659_v37 = vld [vmem:[#allocation6 + $0x38c] sm:$0xf]  ;;  %4086 = vmatpush.bf16.msrb.mxu0 %v6681_v54  ;;  %v6690_v32 = vld [vmem:[#allocation7 + $0x80] sm:$0xff] }
 0x24c   :  { %v2832_v0 = vpop.f32.mrf.mxu3  ;;  %3753 = vmatmul.bf16.vlgmr.msrb.gmra.mxu2 %v7069_v23  ;;  %v6017_v58 = vor.u32 %v6659_v37, %v6014_v56 }
 0x24e   :  { %3759 = vmatpush.bf16.msrb.mxu3 %v6045_v1  ;;  %3789 = vmatpush.bf16.msra.mxu1 %v5729_v45  ;;  %v5982_v1 = vld [vmem:[#allocation6 + $0x358] sm:$0xf0] }
 0x24f   :  { %3798 = vmatpush.bf16.msra.mxu2 %v5921_v46  ;;  %v5985_v45 = vor.u32 %v6651_v49, %v5982_v1  ;;  %v6647_v46 = vld [vmem:[#allocation6 + $0x32c] sm:$0xf] }
 0x250   :  { %v5969_v48 = vor.u32 %v6647_v46, %v5966_v38  ;;  %v6703_v49 = vld [vmem:[#allocation7 + $0xe8] sm:$0xff]  ;;  %v6702_v46 = vld [vmem:[#allocation7 + $0xe0] sm:$0xff] }
 0x252   :  { %3760 = vmatpush.bf16.msrb.mxu3 %v6029_v55  ;;  %3790 = vmatpush.bf16.msra.mxu1 %v5713_v4  ;;  %v6680_v55 = vld [vmem:[#allocation7 + $0x30] sm:$0xff] }
 0x253   :  { %3799 = vmatpush.bf16.msra.mxu2 %v5905_v57  ;;  %4087 = vmatpush.bf16.msrb.mxu0 %v6680_v55  ;;  %v6700_v55 = vld [vmem:[#allocation7 + $0xd0] sm:$0xff] }
 0x256   :  { %3761 = vmatpush.bf16.msrb.mxu3 %v6013_v2  ;;  %3791 = vmatpush.bf16.msra.mxu1 %v5697_v3  ;;  %v6688_v2 = vld [vmem:[#allocation7 + $0x70] sm:$0xff]  ;;  %v6675_v3 = vld [vmem:[#allocation7 + $0x8] sm:$0xff] }
 0x257   :  { %3800 = vmatpush.bf16.msra.mxu2 %v5889_v5  ;;  %4088 = vmatpush.bf16.msrb.mxu0 %v6679_v22  ;;  %v6687_v5 = vld [vmem:[#allocation7 + $0x68] sm:$0xff] }
 0x259   :  { %3714 = vmatmul.bf16.vlgmr.msra.gmra.mxu3 %v7078_v40  ;;  %3792 = vmatmul.bf16.vlgmr.msra.gmra.mxu1 %v7061_v36  ;;  %v5825_v36 = vor.u32 %v6611_v25, %v5822_v27  ;;  %v6693_v25 = vld [vmem:[#allocation7 + $0x98] sm:$0xff]  ;;  %v2967_v27 = vperm.slane %v7097_v41, 0 }
 0x25a   :  { %3762 = vmatpush.bf16.msrb.mxu3 %v5997_v8  ;;  %4099 = vmatpush.bf16.msrb.mxu1 %v6689_v50 }
 0x25b   :  { %3801 = vmatpush.bf16.msra.mxu2 %v5873_v59  ;;  %4089 = vmatpush.bf16.msrb.mxu0 %v6678_v63 }
 0x25e   :  { %3763 = vmatpush.bf16.msrb.mxu3 %v5981_v12  ;;  %4100 = vmatpush.bf16.msrb.mxu1 %v6688_v2  ;;  %v6696_v12 = vld [vmem:[#allocation7 + $0xb0] sm:$0xff] }
 0x25f   :  { %3802 = vmatpush.bf16.msra.mxu2 %v5857_v13  ;;  %4090 = vmatpush.bf16.msrb.mxu0 %v6677_v18 }
 0x262   :  { %3764 = vmatpush.bf16.msrb.mxu3 %v5965_v21  ;;  %4101 = vmatpush.bf16.msrb.mxu1 %v6687_v5  ;;  %v6694_v21 = vld [vmem:[#allocation7 + $0xa0] sm:$0xff] }
 0x263   :  { %3803 = vmatpush.bf16.msra.mxu2 %v5841_v11 }
 0x266   :  { %3765 = vmatpush.bf16.msrb.mxu3 %v5949_v19  ;;  %4102 = vmatpush.bf16.msrb.mxu1 %v6686_v7 }
 0x267   :  { %3804 = vmatpush.bf16.msra.mxu2 %v5825_v36 }
 0x269   :  { %3766 = vmatmul.bf16.vlgmr.msrb.gmra.mxu3 %v7078_v40 }
 0x26a   :  { %3810 = vmatpush.bf16.msra.mxu3 %v6065_v34  ;;  %3805 = vmatmul.bf16.vlgmr.msra.gmra.mxu2 %v7069_v23  ;;  %v5950_v23 = vld [vmem:[#allocation6 + $0x318] sm:$0xf0]  ;;  %v6691_v34 = vld [vmem:[#allocation7 + $0x88] sm:$0xff] }
 0x26b   :  { %v5953_v0 = vor.u32 %v6643_v42, %v5950_v23  ;;  %4103 = vmatpush.bf16.msrb.mxu1 %v6685_v9  ;;  %4112 = vmatpush.bf16.msrb.mxu2 %v6697_v10  ;;  %v6701_v23 = vld [vmem:[#allocation7 + $0xd8] sm:$0xff] }
 0x26e   :  { %3811 = vmatpush.bf16.msra.mxu3 %v6049_v20 }
 0x26f   :  { %4104 = vmatpush.bf16.msrb.mxu1 %v6684_v61  ;;  %4113 = vmatpush.bf16.msrb.mxu2 %v6696_v12 }
 0x272   :  { %3812 = vmatpush.bf16.msra.mxu3 %v6033_v35  ;;  %v6705_v35 = vld [vmem:[#allocation7 + $0xf8] sm:$0xff] }
 0x273   :  { %4105 = vmatpush.bf16.msrb.mxu1 %v6683_v15  ;;  %4114 = vmatpush.bf16.msrb.mxu2 %v6695_v33 }
 0x276   :  { %3813 = vmatpush.bf16.msra.mxu3 %v6017_v58 }
 0x277   :  { %4106 = vmatpush.bf16.msrb.mxu1 %v6682_v16  ;;  %4115 = vmatpush.bf16.msrb.mxu2 %v6694_v21  ;;  %v6714_v16 = vld [vmem:[%s7120_s8] ss:$0 sm:$0xff] }
 0x27a   :  { %3814 = vmatpush.bf16.msra.mxu3 %v6001_v44 }
 0x27b   :  { %4116 = vmatpush.bf16.msrb.mxu2 %v6693_v25 }
 0x27e   :  { %3815 = vmatpush.bf16.msra.mxu3 %v5985_v45 }
 0x27f   :  { %4117 = vmatpush.bf16.msrb.mxu2 %v6692_v26 }
 0x282   :  { %3816 = vmatpush.bf16.msra.mxu3 %v5969_v48 }
 0x283   :  { %4118 = vmatpush.bf16.msrb.mxu2 %v6691_v34 }
 0x286   :  { %3817 = vmatpush.bf16.msra.mxu3 %v5953_v0  ;;  %v3624_v51 = vpop.f32.mrf.mxu0 }
 0x287   :  { %v3625_v19 = vadd.f32 %v3624_v51, %v2967_v27  ;;  %4119 = vmatpush.bf16.msrb.mxu2 %v6690_v32 }
 0x289   :  { %3818 = vmatmul.bf16.vlgmr.msra.gmra.mxu3 %v7078_v40  ;;  %v6676_v40 = vld [vmem:[#allocation7 + $0x10] sm:$0xff] }
 0x28a   :  { %4091 = vmatpush.bf16.msrb.mxu0 %v6676_v40  ;;  %4125 = vmatpush.bf16.msrb.mxu3 %v6705_v35 }
 0x28e   :  { %v3626_v53 = vpop.f32.mrf.mxu0  ;;  %4092 = vmatpush.bf16.msrb.mxu0 %v6675_v3  ;;  %4126 = vmatpush.bf16.msrb.mxu3 %v6704_v43 }
 0x292   :  { %4093 = vmatpush.bf16.msrb.mxu0 %v6674_v14  ;;  %4127 = vmatpush.bf16.msrb.mxu3 %v6703_v49  ;;  %v2970_v14 = vperm.slane %v7097_v41, 3 }
 0x296   :  { %v3637_v4 = vpop.f32.mrf.mxu1  ;;  %v7088_v57 = vpop.f32.mrf.mxu0  ;;  %4128 = vmatpush.bf16.msrb.mxu3 %v6702_v46 }
 0x297   :  { %v3638_v29 = vadd.f32 %v3637_v4, %v3625_v19  ;;  %v3677_v1 = vadd.f32 %v7088_v57, %v2968_v39  ;;  %v2969_v4 = vperm.slane %v7097_v41, 2  ;;  %v6699_v57 = vld [vmem:[#allocation7 + $0xc8] sm:$0xff] }
 0x29a   :  { %4129 = vmatpush.bf16.msrb.mxu3 %v6701_v23 }
 0x29e   :  { %v3639_v47 = vpop.f32.mrf.mxu1  ;;  %v3678_v60 = vpop.f32.mrf.mxu0  ;;  %4130 = vmatpush.bf16.msrb.mxu3 %v6700_v55 }
 0x29f   :  { %v6698_v60 = vld [vmem:[#allocation7 + $0xc0] sm:$0xff] }
 0x2a2   :  { %4131 = vmatpush.bf16.msrb.mxu3 %v6699_v57 }
 0x2a6   :  { %v7090_v6 = vpop.f32.mrf.mxu1  ;;  %4132 = vmatpush.bf16.msrb.mxu3 %v6698_v60 }
 0x2a7   :  { %v3690_v48 = vadd.f32 %v7090_v6, %v3677_v1 }
 0x2a8   :  { %v7092_v24 = vpop.f32.mrf.mxu0 }
 0x2a9   :  { %v3729_v63 = vadd.f32 %v7092_v24, %v2969_v4 }
 0x2ac   :  { %v3650_v8 = vpop.f32.mrf.mxu2 }
 0x2ad   :  { %v3651_v30 = vadd.f32 %v3650_v8, %v3638_v29 }
 0x2ae   :  { %v3691_v59 = vpop.f32.mrf.mxu1 }
 0x2b0   :  { %v3730_v52 = vpop.f32.mrf.mxu0 }
 0x2b4   :  { %v3652_v13 = vpop.f32.mrf.mxu2 }
 0x2b6   :  { %v3741_v17 = vpop.f32.mrf.mxu1 }
 0x2b7   :  { %v3742_v47 = vadd.f32 %v3741_v17, %v3729_v63 }
 0x2bc   :  { %v3702_v11 = vpop.f32.mrf.mxu2 }
 0x2bd   :  { %v3703_v42 = vadd.f32 %v3702_v11, %v3690_v48 }
 0x2be   :  { %v3743_v28 = vpop.f32.mrf.mxu1 }
 0x2c4   :  { %v3704_v36 = vpop.f32.mrf.mxu2 }
 0x2c6   :  { %v3780_v62 = vpop.f32.mrf.mxu0 }
 0x2c7   :  { %v3781_v7 = vadd.f32 %v3780_v62, %v2970_v14 }
 0x2cc   :  { %v3663_v20 = vpop.f32.mrf.mxu3 }
 0x2cd   :  { %v3664_v31 = vadd.f32 %v3663_v20, %v3651_v30 }
 0x2ce   :  { %v3782_v37 = vpop.f32.mrf.mxu0 }
 0x2cf   :  { %v3823_v56 = vpack.c.bf16 %v3664_v31, %v3664_v31  ;;  %v3754_v58 = vpop.f32.mrf.mxu2 }
 0x2d0   :  { %v3755_v18 = vadd.f32 %v3754_v58, %v3742_v47 }
 0x2d1   :  { %4094 = vmatmul.bf16.vlgmr.msrb.gmra.mxu0 %v3823_v56 }
 0x2d4   :  { %v3665_v44 = vpop.f32.mrf.mxu3 }
 0x2d6   :  { %v3793_v45 = vpop.f32.mrf.mxu1 }
 0x2d7   :  { %v3756_v38 = vpop.f32.mrf.mxu2  ;;  %v3794_v8 = vadd.f32 %v3793_v45, %v3781_v7 }
 0x2dc   :  { %v3715_v0 = vpop.f32.mrf.mxu3 }
 0x2dd   :  { %v3716_v51 = vadd.f32 %v3715_v0, %v3703_v42 }
 0x2de   :  { %v3795_v54 = vpop.f32.mrf.mxu1 }
 0x2df   :  { %v3824_v53 = vpack.c.bf16 %v3716_v51, %v3716_v51 }
 0x2e1   :  { %4107 = vmatmul.bf16.vlgmr.msrb.gmra.mxu1 %v3824_v53 }
 0x2e4   :  { %v3717_v22 = vpop.f32.mrf.mxu3 }
 0x2ec   :  { %v3767_v50 = vpop.f32.mrf.mxu3 }
 0x2ed   :  { %v3768_v40 = vadd.f32 %v3767_v50, %v3755_v18  ;;  %v3806_v2 = vpop.f32.mrf.mxu2 }
 0x2ee   :  { %v3807_v59 = vadd.f32 %v3806_v2, %v3794_v8 }
 0x2ef   :  { %v3825_v3 = vpack.c.bf16 %v3768_v40, %v3768_v40 }
 0x2f1   :  { %4120 = vmatmul.bf16.vlgmr.msrb.gmra.mxu2 %v3825_v3 }
 0x2f4   :  { %v3769_v5 = vpop.f32.mrf.mxu3 }
 0x2f5   :  { %v3808_v6 = vpop.f32.mrf.mxu2 }
 0x30c   :  { %v3819_v9 = vpop.f32.mrf.mxu3 }
 0x30d   :  { %v3820_v10 = vadd.f32 %v3819_v9, %v3807_v59 }
 0x30f   :  { %v3826_v24 = vpack.c.bf16 %v3820_v10, %v3820_v10 }
 0x311   :  { %4133 = vmatmul.bf16.vlgmr.msrb.gmra.mxu3 %v3826_v24 }
 0x314   :  { %v3821_v52 = vpop.f32.mrf.mxu3 }
 0x34e   :  { %v4095_v61 = vpop.f32.mrf.mxu0 }
 0x34f   :  { %v4096_v21 = vadd.f32 %v6714_v16, %v4095_v61 }
 0x356   :  { %v4097_v12 = vpop.f32.mrf.mxu0 }
 0x35e   :  { %v4108_v13 = vpop.f32.mrf.mxu1 }
 0x35f   :  { %v4109_v11 = vadd.f32 %v4108_v13, %v4096_v21 }
 0x366   :  { %v4110_v15 = vpop.f32.mrf.mxu1 }
 0x374   :  { %v4121_v33 = vpop.f32.mrf.mxu2 }
 0x375   :  { %v4122_v41 = vadd.f32 %v4121_v33, %v4109_v11 }
 0x37c   :  { %v4123_v17 = vpop.f32.mrf.mxu2 }
 0x394   :  { %v4134_v28 = vpop.f32.mrf.mxu3 }
 0x395   :  { %v4135_v25 = vadd.f32 %v4134_v28, %v4122_v41 }
 0x397   :  { %4138 = vst [vmem:[%s7121_s9] sm:$0xff] %v4135_v25 }
 0x39c   :  { %v4136_v27 = vpop.f32.mrf.mxu3 }
 0x39d   :  { %4143 = vsyncpa [#allocation3], 1 }
 0x39e   :  { %4144 = vsyncpa [#allocation5], 1 }
 0x39f   :  { %4145 = vsyncpa [#allocation8], 1 }

</bundles_post_ra>
